<compile_context>
chip_gen: v7x
topology: tpu7x:2x2x1
jax: 0.10.0
libtpu: 0.0.40
codegen_flags: <defaults>
</compile_context>

<pallas_src>
import math

import jax
import jax.numpy as jnp
from jax import lax
from jax.experimental import pallas as pl
from jax.experimental.pallas import tpu as pltpu  # noqa: F401  (kept for TPU-specific knobs)

# ----------------------------- config (small) --------------------------------
BATCH = 2
PATCH = 4                         # patch_size
P2 = PATCH * PATCH                # flattened patch = 16
IMG_H = IMG_W = 16
PATCHES_SEQ = (IMG_H // PATCH) * (IMG_W // PATCH)   # 16 patches per image
IMG_SEQ = 2                       # img_sequence
SEQ_ENC = IMG_SEQ * PATCHES_SEQ   # 32 encoder tokens / batch element
HIDDEN = 32                       # embedding_size
HEADS = 4                         # mha
DK = HIDDEN // HEADS              # 8
FF = 64                           # neuron
LAYERS = 2                        # layer
OUT_DIM = 4                       # output_dimension
OUT1 = OUT_DIM + 1                # decoder feature / output channels = 5
HORIZON = 8                       # decoder sequence length
EPS = 1e-6

SEQ_T = BATCH * SEQ_ENC           # 64 folded encoder rows
TGT_T = BATCH * HORIZON           # 16 folded decoder rows

assert HIDDEN % HEADS == 0

# --------------------- stacked-weight index constants -------------------------
# w32 stack (15, 32, 32)
W_EMB_E, W_EMB_D = 0, 1
W_E_Q, W_E_K, W_E_V, W_E_M = 2, 3, 4, 5
W_D_Q, W_D_K, W_D_V, W_D_M = 6, 7, 8, 9
W_C_Q, W_C_K, W_C_V, W_C_M = 10, 11, 12, 13
W_FIN = 14

# vec32 stack rows (width 32)
V_EPE = 0                          # 64 rows: enc embed-bias*sqrt(H)+PE, tiled x B
V_DPE = 64                         # 16 rows: dec embed-bias*sqrt(H)+PE, tiled x B
V_HMASK = 80                       # 4 rows : per-head lane masks
V_E_BQ, V_E_BK, V_E_BV, V_E_BM = 84, 85, 86, 87
V_E_G1, V_E_BT1, V_E_FB2, V_E_G2, V_E_BT2 = 88, 89, 90, 91, 92
V_D_BQ, V_D_BK, V_D_BV, V_D_BM, V_D_G1, V_D_BT1 = 93, 94, 95, 96, 97, 98
V_C_BQ, V_C_BK, V_C_BV, V_C_BM, V_D_G2, V_D_BT2 = 99, 100, 101, 102, 103, 104
V_D_FB2, V_D_G3, V_D_BT3 = 105, 106, 107
V_FINB = 108
N_VEC32 = 109


# ------------------------------ fused kernel ----------------------------------
def fused_net_kernel(data_ref, masks_ref, w32_ref, wff1_ref, wff2_ref,
                     vec32_ref, vec64_ref, o_ref):
    f32 = jnp.float32
    inv_sqrt_dk = 1.0 / math.sqrt(DK)

    hmask = vec32_ref[V_HMASK:V_HMASK + HEADS, :]                  # (heads, H)

    def vrow(i):                                                    # (1, H)
        return vec32_ref[i:i + 1, :]

    def layernorm(t, gi, bi):
        # matches the custom torch LayerNorm: unbiased std, divide by (std+eps)
        mean = jnp.mean(t, axis=-1, keepdims=True)
        var = jnp.sum((t - mean) ** 2, axis=-1, keepdims=True) * (1.0 / (HIDDEN - 1))
        return vrow(gi) * (t - mean) / (jnp.sqrt(var) + EPS) + vrow(bi)

    def proj(t, wi, bi):
        return jnp.dot(t, w32_ref[wi], preferred_element_type=f32) + vrow(bi)

    def mha(q, k, v, mask_add):
        # q (Sq,H) pre-scaled by 1/sqrt(dk); k, v (Sk,H); mask_add (Sq,Sk).
        # Heads selected via lane masks (no dk-wide lane slices / lane concat):
        #   scores_h = (q * m_h) @ k^T ; merged = sum_h softmax(scores_h) @ (v * m_h)
        sq = q.shape[0]
        parts = []
        for h in range(HEADS):
            s = lax.dot_general(q * hmask[h:h + 1, :], k,
                                (((1,), (1,)), ((), ())),
                                preferred_element_type=f32)          # (Sq, Sk)
            parts.append(s + mask_add)
        s_all = jnp.concatenate(parts, axis=0)                       # (heads*Sq, Sk)
        m = jnp.max(s_all, axis=-1, keepdims=True)                   # one softmax
        p = jnp.exp(s_all - m)
        p = p / jnp.sum(p, axis=-1, keepdims=True)
        out = None
        for h in range(HEADS):
            t = jnp.dot(p[h * sq:(h + 1) * sq, :], v * hmask[h:h + 1, :],
                        preferred_element_type=f32)                  # (Sq, H)
            out = t if out is None else out + t
        return out

    enc_mask = masks_ref[0:SEQ_T, :]                                 # (64, 64)
    cross_mask = masks_ref[SEQ_T:SEQ_T + TGT_T, :]                   # (16, 64)
    dec_mask = masks_ref[SEQ_T + TGT_T:SEQ_T + 2 * TGT_T, 0:TGT_T]   # (16, 16)

    # ============ encoder (last layer only; earlier layers are dead code) =====
    xe = data_ref[0:SEQ_T, :]                                        # (64, 32)
    he = (jnp.dot(xe, w32_ref[W_EMB_E], preferred_element_type=f32)
          + vec32_ref[V_EPE:V_EPE + SEQ_T, :])

    qe = proj(he, W_E_Q, V_E_BQ) * inv_sqrt_dk
    ae = mha(qe, proj(he, W_E_K, V_E_BK), proj(he, W_E_V, V_E_BV), enc_mask)
    ae = jnp.dot(ae, w32_ref[W_E_M], preferred_element_type=f32) + vrow(V_E_BM)
    y1 = layernorm(he + ae, V_E_G1, V_E_BT1)

    ff = jnp.maximum(jnp.dot(y1, wff1_ref[0], preferred_element_type=f32)
                     + vec64_ref[0:1, :], 0.0)
    ff = jnp.dot(ff, wff2_ref[0], preferred_element_type=f32) + vrow(V_E_FB2)
    enc_out = layernorm(y1 + ff, V_E_G2, V_E_BT2)                    # (64, 32)

    # ============ decoder (last layer only) ===================================
    xt = data_ref[SEQ_T:SEQ_T + TGT_T, :]                            # (16, 32)
    hd = (jnp.dot(xt, w32_ref[W_EMB_D], preferred_element_type=f32)
          + vec32_ref[V_DPE:V_DPE + TGT_T, :])

    # masked self-attention over tgt
    qd = proj(hd, W_D_Q, V_D_BQ) * inv_sqrt_dk
    a1 = mha(qd, proj(hd, W_D_K, V_D_BK), proj(hd, W_D_V, V_D_BV), dec_mask)
    a1 = jnp.dot(a1, w32_ref[W_D_M], preferred_element_type=f32) + vrow(V_D_BM)
    z1 = layernorm(hd + a1, V_D_G1, V_D_BT1)

    # cross-attention: q from decoder state, k/v from encoder output
    q2 = proj(z1, W_C_Q, V_C_BQ) * inv_sqrt_dk
    a2 = mha(q2, proj(enc_out, W_C_K, V_C_BK), proj(enc_out, W_C_V, V_C_BV),
             cross_mask)
    a2 = jnp.dot(a2, w32_ref[W_C_M], preferred_element_type=f32) + vrow(V_C_BM)
    z2 = layernorm(z1 + a2, V_D_G2, V_D_BT2)

    # FFN
    fd = jnp.maximum(jnp.dot(z2, wff1_ref[1], preferred_element_type=f32)
                     + vec64_ref[1:2, :], 0.0)
    fd = jnp.dot(fd, wff2_ref[1], preferred_element_type=f32) + vrow(V_D_FB2)
    z3 = layernorm(z2 + fd, V_D_G3, V_D_BT3)

    # final projection (output lanes zero-padded to 32; wrapper slices to 5)
    o_ref[...] = (jnp.dot(z3, w32_ref[W_FIN], preferred_element_type=f32)
                  + vrow(V_FINB))


# ------------------------------ host-side packing ------------------------------
def prepare_fused_weights(params):
    """Fold scale/PE into embeddings, stack everything into 5 refs, keep only
    the layers whose output is actually used (last encoder / last decoder)."""
    sH = math.sqrt(HIDDEN)
    enc = params["enc_layers"][-1]
    dec = params["dec_layers"][-1]

    def pad_rows(w):
        out = jnp.zeros((HIDDEN, HIDDEN), jnp.float32)
        return out.at[:w.shape[0], :].set(w)

    w_emb_e = pad_rows(params["w_emb"] * sH)                    # (32,32) rows 16+ zero
    w_emb_d = pad_rows(params["w_dec"] * sH)                    # (32,32) rows 5+ zero
    w_fin = jnp.zeros((HIDDEN, HIDDEN), jnp.float32).at[:, :OUT1].set(params["w_final"])

    w32 = jnp.stack([
        w_emb_e, w_emb_d,
        enc["wq"], enc["wk"], enc["wv"], enc["wm"],
        dec["sa_wq"], dec["sa_wk"], dec["sa_wv"], dec["sa_wm"],
        dec["ca_wq"], dec["ca_wk"], dec["ca_wv"], dec["ca_wm"],
        w_fin,
    ])                                                          # (15, 32, 32)
    wff1 = jnp.stack([enc["w1"], dec["w1"]])                    # (2, 32, 64)
    wff2 = jnp.stack([enc["w2"], dec["w2"]])                    # (2, 64, 32)
    vec64 = jnp.concatenate([enc["b1"], dec["b1"]], axis=0)     # (2, 64)

    bpe_e = jnp.tile(params["b_emb"] * sH + params["pe_enc"], (BATCH, 1))   # (64,32)
    bpe_d = jnp.tile(params["b_dec"] * sH + params["pe_dec"], (BATCH, 1))   # (16,32)
    hmask = (jnp.arange(HIDDEN)[None, :] // DK
             == jnp.arange(HEADS)[:, None]).astype(jnp.float32)            # (4,32)
    b_fin = jnp.zeros((1, HIDDEN), jnp.float32).at[:, :OUT1].set(params["b_final"])

    vec32 = jnp.concatenate([
        bpe_e,                                                   # rows 0:64
        bpe_d,                                                   # rows 64:80
        hmask,                                                   # rows 80:84
        enc["bq"], enc["bk"], enc["bv"], enc["bm"],              # 84..87
        enc["g1"], enc["be1"], enc["b2"], enc["g2"], enc["be2"],  # 88..92
        dec["sa_bq"], dec["sa_bk"], dec["sa_bv"], dec["sa_bm"],   # 93..96
        dec["g1"], dec["be1"],                                    # 97..98
        dec["ca_bq"], dec["ca_bk"], dec["ca_bv"], dec["ca_bm"],   # 99..102
        dec["g2"], dec["be2"],                                    # 103..104
        dec["b2"], dec["g3"], dec["be3"],                         # 105..107
        b_fin,                                                    # 108
    ], axis=0)
    assert vec32.shape == (N_VEC32, HIDDEN)
    vec32 = jnp.pad(vec32, ((0, (-N_VEC32) % 8), (0, 0)))        # sublane-align rows

    return [w32, wff1, wff2, vec32, vec64]


def _block_diag_add(blocks):
    """(B, Sq, Sk) per-batch additive masks -> (B*Sq, B*Sk) block-diagonal
    additive mask with -1e9 off the diagonal (blocks cross-batch attention)."""
    B, Sq, Sk = blocks.shape
    neg = jnp.full((Sq, Sk), -1e9, jnp.float32)
    rows = []
    for qb in range(B):
        rows.append(jnp.concatenate(
            [blocks[qb] if kb == qb else neg for kb in range(B)], axis=1))
    return jnp.concatenate(rows, axis=0)


@jax.jit
def net_forward(x, x_mask, tgt, tgt_mask, params):
    B = x.shape[0]
    assert B == BATCH

    # --- data slab: batch rows concatenated, features zero-padded to 32 lanes
    xf = jnp.pad(x.reshape(B * SEQ_ENC, P2), ((0, 0), (0, HIDDEN - P2)))
    tf = jnp.pad(tgt.reshape(B * HORIZON, OUT1), ((0, 0), (0, HIDDEN - OUT1)))
    data = jnp.concatenate([xf, tf], axis=0)                                  # (80, 32)

    # --- additive masks precomputed on host (0 keep / -1e9 drop) -------------
    neg = jnp.float32(-1e9)
    key_add = jnp.where(x_mask[:, 0, :] == 0, neg, jnp.float32(0.0))          # (B, S)
    enc_m = _block_diag_add(
        jnp.broadcast_to(key_add[:, None, :], (B, SEQ_ENC, SEQ_ENC)))         # (64, 64)
    cross_m = _block_diag_add(
        jnp.broadcast_to(key_add[:, None, :], (B, HORIZON, SEQ_ENC)))         # (16, 64)
    dec_m = _block_diag_add(jnp.where(tgt_mask == 0, neg, jnp.float32(0.0)))  # (16, 16)
    dec_m = jnp.pad(dec_m, ((0, 0), (0, SEQ_T - TGT_T)))                      # (16, 64)
    masks = jnp.concatenate([enc_m, cross_m, dec_m], axis=0)                  # (96, 64)

    weights = prepare_fused_weights(params)

    macs = (SEQ_T * HIDDEN * (5 * HIDDEN + 2 * FF)
            + SEQ_T * 2 * HIDDEN * HIDDEN
            + TGT_T * HIDDEN * (8 * HIDDEN + 2 * FF)
            + 2 * HEADS * HIDDEN * (SEQ_T * SEQ_T + TGT_T * TGT_T + TGT_T * SEQ_T))
    transcendentals = HEADS * (SEQ_T * SEQ_T + TGT_T * TGT_T + TGT_T * SEQ_T)
    bytes_accessed = 4 * (data.size + masks.size
                          + sum(int(w.size) for w in weights) + TGT_T * HIDDEN)

    # Single invocation, no grid: every operand is one whole-array VMEM block
    # (total resident data < 1 MiB), so no BlockSpecs / pipelining are needed.
    out = pl.pallas_call(
        fused_net_kernel,
        out_shape=jax.ShapeDtypeStruct((TGT_T, HIDDEN), jnp.float32),
        cost_estimate=pl.CostEstimate(flops=int(2 * macs),
                                      transcendentals=int(transcendentals),
                                      bytes_accessed=int(bytes_accessed)),
    )(data, masks, *weights)

    return out[:, :OUT1].reshape(B, HORIZON, OUT1)


# --------------------------- params & positional enc ---------------------------
def make_positional_encoding(seq, d_model):
    position = jnp.arange(seq, dtype=jnp.float32)[:, None]
    div_term = jnp.exp(jnp.arange(0, d_model, 2, dtype=jnp.float32)
                       * -(math.log(10000.0) / d_model))
    pe = jnp.zeros((seq, d_model), jnp.float32)
    pe = pe.at[:, 0::2].set(jnp.sin(position * div_term))
    pe = pe.at[:, 1::2].set(jnp.cos(position * div_term))
    return pe


def init_params(key):
    def lin(k, din, dout, scale=0.05):
        kw, kb = jax.random.split(k)
        return (scale * jax.random.normal(kw, (din, dout), jnp.float32),
                scale * jax.random.normal(kb, (1, dout), jnp.float32))

    def ln_params():
        return (jnp.ones((1, HIDDEN), jnp.float32),
                jnp.zeros((1, HIDDEN), jnp.float32))

    keys = jax.random.split(key, 4 + 2 * LAYERS)
    w_emb, b_emb = lin(keys[0], P2, HIDDEN)
    w_dec, b_dec = lin(keys[1], OUT1, HIDDEN)
    w_final, b_final = lin(keys[2], HIDDEN, OUT1)

    enc_layers = []
    for li in range(LAYERS):
        lk = jax.random.split(keys[4 + li], 6)
        wq, bq = lin(lk[0], HIDDEN, HIDDEN)
        wk, bk = lin(lk[1], HIDDEN, HIDDEN)
        wv, bv = lin(lk[2], HIDDEN, HIDDEN)
        wm, bm = lin(lk[3], HIDDEN, HIDDEN)
        w1, b1 = lin(lk[4], HIDDEN, FF)
        w2, b2 = lin(lk[5], FF, HIDDEN)
        g1, be1 = ln_params(); g2, be2 = ln_params()
        enc_layers.append(dict(wq=wq, bq=bq, wk=wk, bk=bk, wv=wv, bv=bv,
                               wm=wm, bm=bm, w1=w1, b1=b1, w2=w2, b2=b2,
                               g1=g1, be1=be1, g2=g2, be2=be2))

    dec_layers = []
    for li in range(LAYERS):
        lk = jax.random.split(keys[4 + LAYERS + li], 10)
        sa_wq, sa_bq = lin(lk[0], HIDDEN, HIDDEN)
        sa_wk, sa_bk = lin(lk[1], HIDDEN, HIDDEN)
        sa_wv, sa_bv = lin(lk[2], HIDDEN, HIDDEN)
        sa_wm, sa_bm = lin(lk[3], HIDDEN, HIDDEN)
        ca_wq, ca_bq = lin(lk[4], HIDDEN, HIDDEN)
        ca_wk, ca_bk = lin(lk[5], HIDDEN, HIDDEN)
        ca_wv, ca_bv = lin(lk[6], HIDDEN, HIDDEN)
        ca_wm, ca_bm = lin(lk[7], HIDDEN, HIDDEN)
        w1, b1 = lin(lk[8], HIDDEN, FF)
        w2, b2 = lin(lk[9], FF, HIDDEN)
        g1, be1 = ln_params(); g2, be2 = ln_params(); g3, be3 = ln_params()
        dec_layers.append(dict(
            sa_wq=sa_wq, sa_bq=sa_bq, sa_wk=sa_wk, sa_bk=sa_bk,
            sa_wv=sa_wv, sa_bv=sa_bv, sa_wm=sa_wm, sa_bm=sa_bm,
            ca_wq=ca_wq, ca_bq=ca_bq, ca_wk=ca_wk, ca_bk=ca_bk,
            ca_wv=ca_wv, ca_bv=ca_bv, ca_wm=ca_wm, ca_bm=ca_bm,
            w1=w1, b1=b1, w2=w2, b2=b2,
            g1=g1, be1=be1, g2=g2, be2=be2, g3=g3, be3=be3))

    # combined encoder PE: spatio-temporal PE over the full 32-token sequence
    # plus the spatial PE tiled per image (exactly the two view+add steps).
    pe_temp = make_positional_encoding(SEQ_ENC, HIDDEN)
    pe_spatial = make_positional_encoding(PATCHES_SEQ, HIDDEN)
    pe_enc = pe_temp + jnp.tile(pe_spatial, (IMG_SEQ, 1))
    pe_dec = make_positional_encoding(HORIZON, HIDDEN)

    return dict(w_emb=w_emb, b_emb=b_emb, w_dec=w_dec, b_dec=b_dec,
                w_final=w_final, b_final=b_final,
                pe_enc=pe_enc, pe_dec=pe_dec,
                enc_layers=enc_layers, dec_layers=dec_layers)


# ------------------------------ pure-JAX reference -----------------------------
def reference_forward(x, x_mask, tgt, tgt_mask, params):
    """Faithful mirror of the PyTorch forward (eval mode), including the
    'each layer consumes the original input, only the last is kept' loops."""
    B = x.shape[0]

    def ln(t, g, b):
        mean = t.mean(-1, keepdims=True)
        var = ((t - mean) ** 2).sum(-1, keepdims=True) / (t.shape[-1] - 1)
        return g * (t - mean) / (jnp.sqrt(var) + EPS) + b

    def mha(v_in, k_in, q_in, mask, p, pre):
        q = q_in @ p[pre + "wq"] + p[pre + "bq"]
        k = k_in @ p[pre + "wk"] + p[pre + "bk"]
        v = v_in @ p[pre + "wv"] + p[pre + "bv"]
        Bq, Sq, H = q.shape
        Sk = k.shape[1]
        dk = H // HEADS
        qh = q.reshape(Bq, Sq, HEADS, dk).transpose(0, 2, 1, 3)
        kh = k.reshape(Bq, Sk, HEADS, dk).transpose(0, 2, 1, 3)
        vh = v.reshape(Bq, Sk, HEADS, dk).transpose(0, 2, 1, 3)
        scores = jnp.einsum("bhqd,bhkd->bhqk", qh, kh) / math.sqrt(dk)
        scores = jnp.where(mask[:, None] == 0, -1e9, scores)
        att = jax.nn.softmax(scores, axis=-1)
        out = jnp.einsum("bhqk,bhkd->bhqd", att, vh)
        out = out.transpose(0, 2, 1, 3).reshape(Bq, Sq, H)
        return out @ p[pre + "wm"] + p[pre + "bm"]

    xf = x.reshape(B, SEQ_ENC, P2)
    h = (xf @ params["w_emb"] + params["b_emb"]) * math.sqrt(HIDDEN)
    h = h + params["pe_enc"][None]

    for lp in params["enc_layers"]:                   # each layer sees h
        a = mha(h, h, h, x_mask, lp, "")
        y1 = ln(h + a, lp["g1"], lp["be1"])
        f = jnp.maximum(y1 @ lp["w1"] + lp["b1"], 0.0) @ lp["w2"] + lp["b2"]
        y = ln(y1 + f, lp["g2"], lp["be2"])
    enc_out = y

    td = (tgt @ params["w_dec"] + params["b_dec"]) * math.sqrt(HIDDEN)
    td = td + params["pe_dec"][None]

    for lp in params["dec_layers"]:                   # each layer sees td
        a1 = mha(td, td, td, tgt_mask, lp, "sa_")
        y1 = ln(td + a1, lp["g1"], lp["be1"])
        a2 = mha(enc_out, enc_out, y1, x_mask, lp, "ca_")
        y2 = ln(y1 + a2, lp["g2"], lp["be2"])
        f = jnp.maximum(y2 @ lp["w1"] + lp["b1"], 0.0) @ lp["w2"] + lp["b2"]
        y = ln(y2 + f, lp["g3"], lp["be3"])

    return y @ params["w_final"] + params["b_final"]


# ------------------------------------ main -------------------------------------
if __name__ == "__main__":
    key = jax.random.PRNGKey(0)
    kx, kt, kp = jax.random.split(key, 3)

    # x: (B, img_sequence, patches_sequence, patch_size^2) — viewed internally
    x = jax.random.normal(kx, (BATCH, IMG_SEQ, PATCHES_SEQ, P2), jnp.float32)
    tgt = jax.random.normal(kt, (BATCH, HORIZON, OUT1), jnp.float32)

    # x_mask: (B, 1, S_enc); 1 = keep, 0 = mask (last 5 keys of batch 1 masked)
    x_mask = jnp.ones((BATCH, 1, SEQ_ENC), jnp.float32)
    x_mask = x_mask.at[1, 0, SEQ_ENC - 5:].set(0.0)
    # tgt_mask: causal (B, T, T)
    tgt_mask = jnp.broadcast_to(
        jnp.tril(jnp.ones((HORIZON, HORIZON), jnp.float32)),
        (BATCH, HORIZON, HORIZON))

    params = init_params(kp)

    out = net_forward(x, x_mask, tgt, tgt_mask, params)
    out = jax.block_until_ready(out)

    ref = reference_forward(x, x_mask, tgt, tgt_mask, params)
    assert out.shape == (BATCH, HORIZON, OUT1)
    assert jnp.allclose(out, ref, atol=2e-3, rtol=2e-3), (out, ref)

    print("KERNEL_OK")
</pallas_src>

<mosaic_0001>
module attributes {stable_mosaic.version = 11 : i64} {
  func.func @fused_net_kernel(%arg0: memref<80x32xf32, #tpu.memory_space<vmem>>, %arg1: memref<96x64xf32, #tpu.memory_space<vmem>>, %arg2: memref<15x32x32xf32, #tpu.memory_space<vmem>>, %arg3: memref<2x32x64xf32, #tpu.memory_space<vmem>>, %arg4: memref<2x64x32xf32, #tpu.memory_space<vmem>>, %arg5: memref<112x32xf32, #tpu.memory_space<vmem>>, %arg6: memref<2x64xf32, #tpu.memory_space<vmem>>, %arg7: memref<16x32xf32, #tpu.memory_space<vmem>>) attributes {dimension_semantics = [], scalar_prefetch = 0 : i64, scratch_operands = 0 : i64, tpu.core_type = #tpu.core_type<tc>} {
    %c80 = arith.constant 80 : index
    %c0 = arith.constant 0 : index
    %0 = vector.load %arg5[%c80, %c0] : memref<112x32xf32, #tpu.memory_space<vmem>>, vector<4x32xf32>
    %c0_0 = arith.constant 0 : index
    %c0_1 = arith.constant 0 : index
    %1 = vector.load %arg1[%c0_0, %c0_1] : memref<96x64xf32, #tpu.memory_space<vmem>>, vector<64x64xf32>
    %c64 = arith.constant 64 : index
    %c0_2 = arith.constant 0 : index
    %2 = vector.load %arg1[%c64, %c0_2] : memref<96x64xf32, #tpu.memory_space<vmem>>, vector<16x64xf32>
    %c80_3 = arith.constant 80 : index
    %c0_4 = arith.constant 0 : index
    %3 = vector.load %arg1[%c80_3, %c0_4] : memref<96x64xf32, #tpu.memory_space<vmem>>, vector<16x16xf32>
    %c0_5 = arith.constant 0 : index
    %c0_6 = arith.constant 0 : index
    %4 = vector.load %arg0[%c0_5, %c0_6] : memref<80x32xf32, #tpu.memory_space<vmem>>, vector<64x32xf32>
    %c0_7 = arith.constant 0 : index
    %c0_8 = arith.constant 0 : index
    %c0_9 = arith.constant 0 : index
    %5 = vector.load %arg2[%c0_7, %c0_8, %c0_9] : memref<15x32x32xf32, #tpu.memory_space<vmem>>, vector<1x32x32xf32>
    %6 = vector.shape_cast %5 : vector<1x32x32xf32> to vector<32x32xf32>
    %cst = arith.constant dense<0.000000e+00> : vector<64x32xf32>
    %7 = tpu.matmul %4, %6, %cst {dimension_numbers = #tpu.dot_dimension_numbers<[1], [0], [0], [1], [0, 0, 1, 1], [], []>} : vector<64x32xf32>, vector<32x32xf32>, vector<64x32xf32> -> vector<64x32xf32>
    %c0_10 = arith.constant 0 : index
    %c0_11 = arith.constant 0 : index
    %8 = vector.load %arg5[%c0_10, %c0_11] : memref<112x32xf32, #tpu.memory_space<vmem>>, vector<64x32xf32>
    %9 = arith.addf %7, %8 : vector<64x32xf32>
    %c2 = arith.constant 2 : index
    %c0_12 = arith.constant 0 : index
    %c0_13 = arith.constant 0 : index
    %10 = vector.load %arg2[%c2, %c0_12, %c0_13] : memref<15x32x32xf32, #tpu.memory_space<vmem>>, vector<1x32x32xf32>
    %11 = vector.shape_cast %10 : vector<1x32x32xf32> to vector<32x32xf32>
    %cst_14 = arith.constant dense<0.000000e+00> : vector<64x32xf32>
    %12 = tpu.matmul %9, %11, %cst_14 {dimension_numbers = #tpu.dot_dimension_numbers<[1], [0], [0], [1], [0, 0, 1, 1], [], []>} : vector<64x32xf32>, vector<32x32xf32>, vector<64x32xf32> -> vector<64x32xf32>
    %c84 = arith.constant 84 : index
    %c0_15 = arith.constant 0 : index
    %13 = vector.load %arg5[%c84, %c0_15] : memref<112x32xf32, #tpu.memory_space<vmem>>, vector<1x32xf32>
    %14 = vector.broadcast %13 : vector<1x32xf32> to vector<64x32xf32>
    %15 = arith.addf %12, %14 : vector<64x32xf32>
    %cst_16 = arith.constant 0.353553385 : f32
    %16 = vector.broadcast %cst_16 : f32 to vector<64x32xf32>
    %17 = arith.mulf %15, %16 : vector<64x32xf32>
    %c3 = arith.constant 3 : index
    %c0_17 = arith.constant 0 : index
    %c0_18 = arith.constant 0 : index
    %18 = vector.load %arg2[%c3, %c0_17, %c0_18] : memref<15x32x32xf32, #tpu.memory_space<vmem>>, vector<1x32x32xf32>
    %19 = vector.shape_cast %18 : vector<1x32x32xf32> to vector<32x32xf32>
    %cst_19 = arith.constant dense<0.000000e+00> : vector<64x32xf32>
    %20 = tpu.matmul %9, %19, %cst_19 {dimension_numbers = #tpu.dot_dimension_numbers<[1], [0], [0], [1], [0, 0, 1, 1], [], []>} : vector<64x32xf32>, vector<32x32xf32>, vector<64x32xf32> -> vector<64x32xf32>
    %c85 = arith.constant 85 : index
    %c0_20 = arith.constant 0 : index
    %21 = vector.load %arg5[%c85, %c0_20] : memref<112x32xf32, #tpu.memory_space<vmem>>, vector<1x32xf32>
    %22 = vector.broadcast %21 : vector<1x32xf32> to vector<64x32xf32>
    %23 = arith.addf %20, %22 : vector<64x32xf32>
    %c4 = arith.constant 4 : index
    %c0_21 = arith.constant 0 : index
    %c0_22 = arith.constant 0 : index
    %24 = vector.load %arg2[%c4, %c0_21, %c0_22] : memref<15x32x32xf32, #tpu.memory_space<vmem>>, vector<1x32x32xf32>
    %25 = vector.shape_cast %24 : vector<1x32x32xf32> to vector<32x32xf32>
    %cst_23 = arith.constant dense<0.000000e+00> : vector<64x32xf32>
    %26 = tpu.matmul %9, %25, %cst_23 {dimension_numbers = #tpu.dot_dimension_numbers<[1], [0], [0], [1], [0, 0, 1, 1], [], []>} : vector<64x32xf32>, vector<32x32xf32>, vector<64x32xf32> -> vector<64x32xf32>
    %c86 = arith.constant 86 : index
    %c0_24 = arith.constant 0 : index
    %27 = vector.load %arg5[%c86, %c0_24] : memref<112x32xf32, #tpu.memory_space<vmem>>, vector<1x32xf32>
    %28 = vector.broadcast %27 : vector<1x32xf32> to vector<64x32xf32>
    %29 = arith.addf %26, %28 : vector<64x32xf32>
    %30 = vector.extract_strided_slice %0 {offsets = [0, 0], sizes = [1, 32], strides = [1, 1]} : vector<4x32xf32> to vector<1x32xf32>
    %31 = vector.broadcast %30 : vector<1x32xf32> to vector<64x32xf32>
    %32 = arith.mulf %17, %31 : vector<64x32xf32>
    %cst_25 = arith.constant dense<0.000000e+00> : vector<64x64xf32>
    %33 = tpu.matmul %32, %23, %cst_25 {dimension_numbers = #tpu.dot_dimension_numbers<[1], [1], [0], [0], [0, 0, 1, 0], [], []>} : vector<64x32xf32>, vector<64x32xf32>, vector<64x64xf32> -> vector<64x64xf32>
    %34 = arith.addf %33, %1 : vector<64x64xf32>
    %35 = vector.extract_strided_slice %0 {offsets = [1, 0], sizes = [1, 32], strides = [1, 1]} : vector<4x32xf32> to vector<1x32xf32>
    %36 = vector.broadcast %35 : vector<1x32xf32> to vector<64x32xf32>
    %37 = arith.mulf %17, %36 : vector<64x32xf32>
    %cst_26 = arith.constant dense<0.000000e+00> : vector<64x64xf32>
    %38 = tpu.matmul %37, %23, %cst_26 {dimension_numbers = #tpu.dot_dimension_numbers<[1], [1], [0], [0], [0, 0, 1, 0], [], []>} : vector<64x32xf32>, vector<64x32xf32>, vector<64x64xf32> -> vector<64x64xf32>
    %39 = arith.addf %38, %1 : vector<64x64xf32>
    %40 = vector.extract_strided_slice %0 {offsets = [2, 0], sizes = [1, 32], strides = [1, 1]} : vector<4x32xf32> to vector<1x32xf32>
    %41 = vector.broadcast %40 : vector<1x32xf32> to vector<64x32xf32>
    %42 = arith.mulf %17, %41 : vector<64x32xf32>
    %cst_27 = arith.constant dense<0.000000e+00> : vector<64x64xf32>
    %43 = tpu.matmul %42, %23, %cst_27 {dimension_numbers = #tpu.dot_dimension_numbers<[1], [1], [0], [0], [0, 0, 1, 0], [], []>} : vector<64x32xf32>, vector<64x32xf32>, vector<64x64xf32> -> vector<64x64xf32>
    %44 = arith.addf %43, %1 : vector<64x64xf32>
    %45 = vector.extract_strided_slice %0 {offsets = [3, 0], sizes = [1, 32], strides = [1, 1]} : vector<4x32xf32> to vector<1x32xf32>
    %46 = vector.broadcast %45 : vector<1x32xf32> to vector<64x32xf32>
    %47 = arith.mulf %17, %46 : vector<64x32xf32>
    %cst_28 = arith.constant dense<0.000000e+00> : vector<64x64xf32>
    %48 = tpu.matmul %47, %23, %cst_28 {dimension_numbers = #tpu.dot_dimension_numbers<[1], [1], [0], [0], [0, 0, 1, 0], [], []>} : vector<64x32xf32>, vector<64x32xf32>, vector<64x64xf32> -> vector<64x64xf32>
    %49 = arith.addf %48, %1 : vector<64x64xf32>
    %50 = tpu.concatenate %34, %39, %44, %49 in 0 : vector<64x64xf32>, vector<64x64xf32>, vector<64x64xf32>, vector<64x64xf32> -> vector<256x64xf32>
    %cst_29 = arith.constant dense<0xFF800000> : vector<256xf32>
    %51 = vector.multi_reduction <maximumf>, %50, %cst_29 [1] : vector<256x64xf32> to vector<256xf32>
    %52 = vector.shape_cast %51 : vector<256xf32> to vector<256x1xf32>
    %53 = vector.broadcast %52 : vector<256x1xf32> to vector<256x64xf32>
    %54 = arith.subf %50, %53 : vector<256x64xf32>
    %55 = math.exp %54 : vector<256x64xf32>
    %cst_30 = arith.constant dense<0.000000e+00> : vector<256xf32>
    %56 = vector.multi_reduction <add>, %55, %cst_30 [1] : vector<256x64xf32> to vector<256xf32>
    %57 = vector.shape_cast %56 : vector<256xf32> to vector<256x1xf32>
    %58 = vector.broadcast %57 : vector<256x1xf32> to vector<256x64xf32>
    %59 = arith.divf %55, %58 : vector<256x64xf32>
    %60 = vector.extract_strided_slice %59 {offsets = [0, 0], sizes = [64, 64], strides = [1, 1]} : vector<256x64xf32> to vector<64x64xf32>
    %61 = vector.extract_strided_slice %0 {offsets = [0, 0], sizes = [1, 32], strides = [1, 1]} : vector<4x32xf32> to vector<1x32xf32>
    %62 = vector.broadcast %61 : vector<1x32xf32> to vector<64x32xf32>
    %63 = arith.mulf %29, %62 : vector<64x32xf32>
    %cst_31 = arith.constant dense<0.000000e+00> : vector<64x32xf32>
    %64 = tpu.matmul %60, %63, %cst_31 {dimension_numbers = #tpu.dot_dimension_numbers<[1], [0], [0], [1], [0, 0, 1, 1], [], []>} : vector<64x64xf32>, vector<64x32xf32>, vector<64x32xf32> -> vector<64x32xf32>
    %65 = vector.extract_strided_slice %59 {offsets = [64, 0], sizes = [64, 64], strides = [1, 1]} : vector<256x64xf32> to vector<64x64xf32>
    %66 = vector.extract_strided_slice %0 {offsets = [1, 0], sizes = [1, 32], strides = [1, 1]} : vector<4x32xf32> to vector<1x32xf32>
    %67 = vector.broadcast %66 : vector<1x32xf32> to vector<64x32xf32>
    %68 = arith.mulf %29, %67 : vector<64x32xf32>
    %cst_32 = arith.constant dense<0.000000e+00> : vector<64x32xf32>
    %69 = tpu.matmul %65, %68, %cst_32 {dimension_numbers = #tpu.dot_dimension_numbers<[1], [0], [0], [1], [0, 0, 1, 1], [], []>} : vector<64x64xf32>, vector<64x32xf32>, vector<64x32xf32> -> vector<64x32xf32>
    %70 = arith.addf %64, %69 : vector<64x32xf32>
    %71 = vector.extract_strided_slice %59 {offsets = [128, 0], sizes = [64, 64], strides = [1, 1]} : vector<256x64xf32> to vector<64x64xf32>
    %72 = vector.extract_strided_slice %0 {offsets = [2, 0], sizes = [1, 32], strides = [1, 1]} : vector<4x32xf32> to vector<1x32xf32>
    %73 = vector.broadcast %72 : vector<1x32xf32> to vector<64x32xf32>
    %74 = arith.mulf %29, %73 : vector<64x32xf32>
    %cst_33 = arith.constant dense<0.000000e+00> : vector<64x32xf32>
    %75 = tpu.matmul %71, %74, %cst_33 {dimension_numbers = #tpu.dot_dimension_numbers<[1], [0], [0], [1], [0, 0, 1, 1], [], []>} : vector<64x64xf32>, vector<64x32xf32>, vector<64x32xf32> -> vector<64x32xf32>
    %76 = arith.addf %70, %75 : vector<64x32xf32>
    %77 = vector.extract_strided_slice %59 {offsets = [192, 0], sizes = [64, 64], strides = [1, 1]} : vector<256x64xf32> to vector<64x64xf32>
    %78 = vector.extract_strided_slice %0 {offsets = [3, 0], sizes = [1, 32], strides = [1, 1]} : vector<4x32xf32> to vector<1x32xf32>
    %79 = vector.broadcast %78 : vector<1x32xf32> to vector<64x32xf32>
    %80 = arith.mulf %29, %79 : vector<64x32xf32>
    %cst_34 = arith.constant dense<0.000000e+00> : vector<64x32xf32>
    %81 = tpu.matmul %77, %80, %cst_34 {dimension_numbers = #tpu.dot_dimension_numbers<[1], [0], [0], [1], [0, 0, 1, 1], [], []>} : vector<64x64xf32>, vector<64x32xf32>, vector<64x32xf32> -> vector<64x32xf32>
    %82 = arith.addf %76, %81 : vector<64x32xf32>
    %c5 = arith.constant 5 : index
    %c0_35 = arith.constant 0 : index
    %c0_36 = arith.constant 0 : index
    %83 = vector.load %arg2[%c5, %c0_35, %c0_36] : memref<15x32x32xf32, #tpu.memory_space<vmem>>, vector<1x32x32xf32>
    %84 = vector.shape_cast %83 : vector<1x32x32xf32> to vector<32x32xf32>
    %cst_37 = arith.constant dense<0.000000e+00> : vector<64x32xf32>
    %85 = tpu.matmul %82, %84, %cst_37 {dimension_numbers = #tpu.dot_dimension_numbers<[1], [0], [0], [1], [0, 0, 1, 1], [], []>} : vector<64x32xf32>, vector<32x32xf32>, vector<64x32xf32> -> vector<64x32xf32>
    %c87 = arith.constant 87 : index
    %c0_38 = arith.constant 0 : index
    %86 = vector.load %arg5[%c87, %c0_38] : memref<112x32xf32, #tpu.memory_space<vmem>>, vector<1x32xf32>
    %87 = vector.broadcast %86 : vector<1x32xf32> to vector<64x32xf32>
    %88 = arith.addf %85, %87 : vector<64x32xf32>
    %89 = arith.addf %9, %88 : vector<64x32xf32>
    %cst_39 = arith.constant dense<0.000000e+00> : vector<64xf32>
    %90 = vector.multi_reduction <add>, %89, %cst_39 [1] : vector<64x32xf32> to vector<64xf32>
    %91 = vector.shape_cast %90 : vector<64xf32> to vector<64x1xf32>
    %cst_40 = arith.constant 3.200000e+01 : f32
    %92 = vector.broadcast %cst_40 : f32 to vector<64x1xf32>
    %93 = arith.divf %91, %92 : vector<64x1xf32>
    %94 = vector.broadcast %93 : vector<64x1xf32> to vector<64x32xf32>
    %95 = arith.subf %89, %94 : vector<64x32xf32>
    %96 = arith.mulf %95, %95 : vector<64x32xf32>
    %cst_41 = arith.constant dense<0.000000e+00> : vector<64xf32>
    %97 = vector.multi_reduction <add>, %96, %cst_41 [1] : vector<64x32xf32> to vector<64xf32>
    %98 = vector.shape_cast %97 : vector<64xf32> to vector<64x1xf32>
    %cst_42 = arith.constant 0.0322580636 : f32
    %99 = vector.broadcast %cst_42 : f32 to vector<64x1xf32>
    %100 = arith.mulf %98, %99 : vector<64x1xf32>
    %c88 = arith.constant 88 : index
    %c0_43 = arith.constant 0 : index
    %101 = vector.load %arg5[%c88, %c0_43] : memref<112x32xf32, #tpu.memory_space<vmem>>, vector<1x32xf32>
    %102 = vector.broadcast %93 : vector<64x1xf32> to vector<64x32xf32>
    %103 = arith.subf %89, %102 : vector<64x32xf32>
    %104 = vector.broadcast %101 : vector<1x32xf32> to vector<64x32xf32>
    %105 = arith.mulf %104, %103 : vector<64x32xf32>
    %106 = math.sqrt %100 : vector<64x1xf32>
    %cst_44 = arith.constant 9.99999997E-7 : f32
    %107 = vector.broadcast %cst_44 : f32 to vector<64x1xf32>
    %108 = arith.addf %106, %107 : vector<64x1xf32>
    %109 = vector.broadcast %108 : vector<64x1xf32> to vector<64x32xf32>
    %110 = arith.divf %105, %109 : vector<64x32xf32>
    %c89 = arith.constant 89 : index
    %c0_45 = arith.constant 0 : index
    %111 = vector.load %arg5[%c89, %c0_45] : memref<112x32xf32, #tpu.memory_space<vmem>>, vector<1x32xf32>
    %112 = vector.broadcast %111 : vector<1x32xf32> to vector<64x32xf32>
    %113 = arith.addf %110, %112 : vector<64x32xf32>
    %c0_46 = arith.constant 0 : index
    %c0_47 = arith.constant 0 : index
    %c0_48 = arith.constant 0 : index
    %114 = vector.load %arg3[%c0_46, %c0_47, %c0_48] : memref<2x32x64xf32, #tpu.memory_space<vmem>>, vector<1x32x64xf32>
    %115 = vector.shape_cast %114 : vector<1x32x64xf32> to vector<32x64xf32>
    %cst_49 = arith.constant dense<0.000000e+00> : vector<64x64xf32>
    %116 = tpu.matmul %113, %115, %cst_49 {dimension_numbers = #tpu.dot_dimension_numbers<[1], [0], [0], [1], [0, 0, 1, 1], [], []>} : vector<64x32xf32>, vector<32x64xf32>, vector<64x64xf32> -> vector<64x64xf32>
    %c0_50 = arith.constant 0 : index
    %c0_51 = arith.constant 0 : index
    %117 = vector.load %arg6[%c0_50, %c0_51] : memref<2x64xf32, #tpu.memory_space<vmem>>, vector<1x64xf32>
    %118 = vector.broadcast %117 : vector<1x64xf32> to vector<64x64xf32>
    %119 = arith.addf %116, %118 : vector<64x64xf32>
    %cst_52 = arith.constant 0.000000e+00 : f32
    %120 = vector.broadcast %cst_52 : f32 to vector<64x64xf32>
    %121 = arith.maximumf %119, %120 : vector<64x64xf32>
    %c0_53 = arith.constant 0 : index
    %c0_54 = arith.constant 0 : index
    %c0_55 = arith.constant 0 : index
    %122 = vector.load %arg4[%c0_53, %c0_54, %c0_55] : memref<2x64x32xf32, #tpu.memory_space<vmem>>, vector<1x64x32xf32>
    %123 = vector.shape_cast %122 : vector<1x64x32xf32> to vector<64x32xf32>
    %cst_56 = arith.constant dense<0.000000e+00> : vector<64x32xf32>
    %124 = tpu.matmul %121, %123, %cst_56 {dimension_numbers = #tpu.dot_dimension_numbers<[1], [0], [0], [1], [0, 0, 1, 1], [], []>} : vector<64x64xf32>, vector<64x32xf32>, vector<64x32xf32> -> vector<64x32xf32>
    %c90 = arith.constant 90 : index
    %c0_57 = arith.constant 0 : index
    %125 = vector.load %arg5[%c90, %c0_57] : memref<112x32xf32, #tpu.memory_space<vmem>>, vector<1x32xf32>
    %126 = vector.broadcast %125 : vector<1x32xf32> to vector<64x32xf32>
    %127 = arith.addf %124, %126 : vector<64x32xf32>
    %128 = arith.addf %113, %127 : vector<64x32xf32>
    %cst_58 = arith.constant dense<0.000000e+00> : vector<64xf32>
    %129 = vector.multi_reduction <add>, %128, %cst_58 [1] : vector<64x32xf32> to vector<64xf32>
    %130 = vector.shape_cast %129 : vector<64xf32> to vector<64x1xf32>
    %cst_59 = arith.constant 3.200000e+01 : f32
    %131 = vector.broadcast %cst_59 : f32 to vector<64x1xf32>
    %132 = arith.divf %130, %131 : vector<64x1xf32>
    %133 = vector.broadcast %132 : vector<64x1xf32> to vector<64x32xf32>
    %134 = arith.subf %128, %133 : vector<64x32xf32>
    %135 = arith.mulf %134, %134 : vector<64x32xf32>
    %cst_60 = arith.constant dense<0.000000e+00> : vector<64xf32>
    %136 = vector.multi_reduction <add>, %135, %cst_60 [1] : vector<64x32xf32> to vector<64xf32>
    %137 = vector.shape_cast %136 : vector<64xf32> to vector<64x1xf32>
    %cst_61 = arith.constant 0.0322580636 : f32
    %138 = vector.broadcast %cst_61 : f32 to vector<64x1xf32>
    %139 = arith.mulf %137, %138 : vector<64x1xf32>
    %c91 = arith.constant 91 : index
    %c0_62 = arith.constant 0 : index
    %140 = vector.load %arg5[%c91, %c0_62] : memref<112x32xf32, #tpu.memory_space<vmem>>, vector<1x32xf32>
    %141 = vector.broadcast %132 : vector<64x1xf32> to vector<64x32xf32>
    %142 = arith.subf %128, %141 : vector<64x32xf32>
    %143 = vector.broadcast %140 : vector<1x32xf32> to vector<64x32xf32>
    %144 = arith.mulf %143, %142 : vector<64x32xf32>
    %145 = math.sqrt %139 : vector<64x1xf32>
    %cst_63 = arith.constant 9.99999997E-7 : f32
    %146 = vector.broadcast %cst_63 : f32 to vector<64x1xf32>
    %147 = arith.addf %145, %146 : vector<64x1xf32>
    %148 = vector.broadcast %147 : vector<64x1xf32> to vector<64x32xf32>
    %149 = arith.divf %144, %148 : vector<64x32xf32>
    %c92 = arith.constant 92 : index
    %c0_64 = arith.constant 0 : index
    %150 = vector.load %arg5[%c92, %c0_64] : memref<112x32xf32, #tpu.memory_space<vmem>>, vector<1x32xf32>
    %151 = vector.broadcast %150 : vector<1x32xf32> to vector<64x32xf32>
    %152 = arith.addf %149, %151 : vector<64x32xf32>
    %c64_65 = arith.constant 64 : index
    %c0_66 = arith.constant 0 : index
    %153 = vector.load %arg0[%c64_65, %c0_66] : memref<80x32xf32, #tpu.memory_space<vmem>>, vector<16x32xf32>
    %c1 = arith.constant 1 : index
    %c0_67 = arith.constant 0 : index
    %c0_68 = arith.constant 0 : index
    %154 = vector.load %arg2[%c1, %c0_67, %c0_68] : memref<15x32x32xf32, #tpu.memory_space<vmem>>, vector<1x32x32xf32>
    %155 = vector.shape_cast %154 : vector<1x32x32xf32> to vector<32x32xf32>
    %cst_69 = arith.constant dense<0.000000e+00> : vector<16x32xf32>
    %156 = tpu.matmul %153, %155, %cst_69 {dimension_numbers = #tpu.dot_dimension_numbers<[1], [0], [0], [1], [0, 0, 1, 1], [], []>} : vector<16x32xf32>, vector<32x32xf32>, vector<16x32xf32> -> vector<16x32xf32>
    %c64_70 = arith.constant 64 : index
    %c0_71 = arith.constant 0 : index
    %157 = vector.load %arg5[%c64_70, %c0_71] : memref<112x32xf32, #tpu.memory_space<vmem>>, vector<16x32xf32>
    %158 = arith.addf %156, %157 : vector<16x32xf32>
    %c6 = arith.constant 6 : index
    %c0_72 = arith.constant 0 : index
    %c0_73 = arith.constant 0 : index
    %159 = vector.load %arg2[%c6, %c0_72, %c0_73] : memref<15x32x32xf32, #tpu.memory_space<vmem>>, vector<1x32x32xf32>
    %160 = vector.shape_cast %159 : vector<1x32x32xf32> to vector<32x32xf32>
    %cst_74 = arith.constant dense<0.000000e+00> : vector<16x32xf32>
    %161 = tpu.matmul %158, %160, %cst_74 {dimension_numbers = #tpu.dot_dimension_numbers<[1], [0], [0], [1], [0, 0, 1, 1], [], []>} : vector<16x32xf32>, vector<32x32xf32>, vector<16x32xf32> -> vector<16x32xf32>
    %c93 = arith.constant 93 : index
    %c0_75 = arith.constant 0 : index
    %162 = vector.load %arg5[%c93, %c0_75] : memref<112x32xf32, #tpu.memory_space<vmem>>, vector<1x32xf32>
    %163 = vector.broadcast %162 : vector<1x32xf32> to vector<16x32xf32>
    %164 = arith.addf %161, %163 : vector<16x32xf32>
    %cst_76 = arith.constant 0.353553385 : f32
    %165 = vector.broadcast %cst_76 : f32 to vector<16x32xf32>
    %166 = arith.mulf %164, %165 : vector<16x32xf32>
    %c7 = arith.constant 7 : index
    %c0_77 = arith.constant 0 : index
    %c0_78 = arith.constant 0 : index
    %167 = vector.load %arg2[%c7, %c0_77, %c0_78] : memref<15x32x32xf32, #tpu.memory_space<vmem>>, vector<1x32x32xf32>
    %168 = vector.shape_cast %167 : vector<1x32x32xf32> to vector<32x32xf32>
    %cst_79 = arith.constant dense<0.000000e+00> : vector<16x32xf32>
    %169 = tpu.matmul %158, %168, %cst_79 {dimension_numbers = #tpu.dot_dimension_numbers<[1], [0], [0], [1], [0, 0, 1, 1], [], []>} : vector<16x32xf32>, vector<32x32xf32>, vector<16x32xf32> -> vector<16x32xf32>
    %c94 = arith.constant 94 : index
    %c0_80 = arith.constant 0 : index
    %170 = vector.load %arg5[%c94, %c0_80] : memref<112x32xf32, #tpu.memory_space<vmem>>, vector<1x32xf32>
    %171 = vector.broadcast %170 : vector<1x32xf32> to vector<16x32xf32>
    %172 = arith.addf %169, %171 : vector<16x32xf32>
    %c8 = arith.constant 8 : index
    %c0_81 = arith.constant 0 : index
    %c0_82 = arith.constant 0 : index
    %173 = vector.load %arg2[%c8, %c0_81, %c0_82] : memref<15x32x32xf32, #tpu.memory_space<vmem>>, vector<1x32x32xf32>
    %174 = vector.shape_cast %173 : vector<1x32x32xf32> to vector<32x32xf32>
    %cst_83 = arith.constant dense<0.000000e+00> : vector<16x32xf32>
    %175 = tpu.matmul %158, %174, %cst_83 {dimension_numbers = #tpu.dot_dimension_numbers<[1], [0], [0], [1], [0, 0, 1, 1], [], []>} : vector<16x32xf32>, vector<32x32xf32>, vector<16x32xf32> -> vector<16x32xf32>
    %c95 = arith.constant 95 : index
    %c0_84 = arith.constant 0 : index
    %176 = vector.load %arg5[%c95, %c0_84] : memref<112x32xf32, #tpu.memory_space<vmem>>, vector<1x32xf32>
    %177 = vector.broadcast %176 : vector<1x32xf32> to vector<16x32xf32>
    %178 = arith.addf %175, %177 : vector<16x32xf32>
    %179 = vector.extract_strided_slice %0 {offsets = [0, 0], sizes = [1, 32], strides = [1, 1]} : vector<4x32xf32> to vector<1x32xf32>
    %180 = vector.broadcast %179 : vector<1x32xf32> to vector<16x32xf32>
    %181 = arith.mulf %166, %180 : vector<16x32xf32>
    %cst_85 = arith.constant dense<0.000000e+00> : vector<16x16xf32>
    %182 = tpu.matmul %181, %172, %cst_85 {dimension_numbers = #tpu.dot_dimension_numbers<[1], [1], [0], [0], [0, 0, 1, 0], [], []>} : vector<16x32xf32>, vector<16x32xf32>, vector<16x16xf32> -> vector<16x16xf32>
    %183 = arith.addf %182, %3 : vector<16x16xf32>
    %184 = vector.extract_strided_slice %0 {offsets = [1, 0], sizes = [1, 32], strides = [1, 1]} : vector<4x32xf32> to vector<1x32xf32>
    %185 = vector.broadcast %184 : vector<1x32xf32> to vector<16x32xf32>
    %186 = arith.mulf %166, %185 : vector<16x32xf32>
    %cst_86 = arith.constant dense<0.000000e+00> : vector<16x16xf32>
    %187 = tpu.matmul %186, %172, %cst_86 {dimension_numbers = #tpu.dot_dimension_numbers<[1], [1], [0], [0], [0, 0, 1, 0], [], []>} : vector<16x32xf32>, vector<16x32xf32>, vector<16x16xf32> -> vector<16x16xf32>
    %188 = arith.addf %187, %3 : vector<16x16xf32>
    %189 = vector.extract_strided_slice %0 {offsets = [2, 0], sizes = [1, 32], strides = [1, 1]} : vector<4x32xf32> to vector<1x32xf32>
    %190 = vector.broadcast %189 : vector<1x32xf32> to vector<16x32xf32>
    %191 = arith.mulf %166, %190 : vector<16x32xf32>
    %cst_87 = arith.constant dense<0.000000e+00> : vector<16x16xf32>
    %192 = tpu.matmul %191, %172, %cst_87 {dimension_numbers = #tpu.dot_dimension_numbers<[1], [1], [0], [0], [0, 0, 1, 0], [], []>} : vector<16x32xf32>, vector<16x32xf32>, vector<16x16xf32> -> vector<16x16xf32>
    %193 = arith.addf %192, %3 : vector<16x16xf32>
    %194 = vector.extract_strided_slice %0 {offsets = [3, 0], sizes = [1, 32], strides = [1, 1]} : vector<4x32xf32> to vector<1x32xf32>
    %195 = vector.broadcast %194 : vector<1x32xf32> to vector<16x32xf32>
    %196 = arith.mulf %166, %195 : vector<16x32xf32>
    %cst_88 = arith.constant dense<0.000000e+00> : vector<16x16xf32>
    %197 = tpu.matmul %196, %172, %cst_88 {dimension_numbers = #tpu.dot_dimension_numbers<[1], [1], [0], [0], [0, 0, 1, 0], [], []>} : vector<16x32xf32>, vector<16x32xf32>, vector<16x16xf32> -> vector<16x16xf32>
    %198 = arith.addf %197, %3 : vector<16x16xf32>
    %199 = tpu.concatenate %183, %188, %193, %198 in 0 : vector<16x16xf32>, vector<16x16xf32>, vector<16x16xf32>, vector<16x16xf32> -> vector<64x16xf32>
    %cst_89 = arith.constant dense<0xFF800000> : vector<64xf32>
    %200 = vector.multi_reduction <maximumf>, %199, %cst_89 [1] : vector<64x16xf32> to vector<64xf32>
    %201 = vector.shape_cast %200 : vector<64xf32> to vector<64x1xf32>
    %202 = vector.broadcast %201 : vector<64x1xf32> to vector<64x16xf32>
    %203 = arith.subf %199, %202 : vector<64x16xf32>
    %204 = math.exp %203 : vector<64x16xf32>
    %cst_90 = arith.constant dense<0.000000e+00> : vector<64xf32>
    %205 = vector.multi_reduction <add>, %204, %cst_90 [1] : vector<64x16xf32> to vector<64xf32>
    %206 = vector.shape_cast %205 : vector<64xf32> to vector<64x1xf32>
    %207 = vector.broadcast %206 : vector<64x1xf32> to vector<64x16xf32>
    %208 = arith.divf %204, %207 : vector<64x16xf32>
    %209 = vector.extract_strided_slice %208 {offsets = [0, 0], sizes = [16, 16], strides = [1, 1]} : vector<64x16xf32> to vector<16x16xf32>
    %210 = vector.extract_strided_slice %0 {offsets = [0, 0], sizes = [1, 32], strides = [1, 1]} : vector<4x32xf32> to vector<1x32xf32>
    %211 = vector.broadcast %210 : vector<1x32xf32> to vector<16x32xf32>
    %212 = arith.mulf %178, %211 : vector<16x32xf32>
    %cst_91 = arith.constant dense<0.000000e+00> : vector<16x32xf32>
    %213 = tpu.matmul %209, %212, %cst_91 {dimension_numbers = #tpu.dot_dimension_numbers<[1], [0], [0], [1], [0, 0, 1, 1], [], []>} : vector<16x16xf32>, vector<16x32xf32>, vector<16x32xf32> -> vector<16x32xf32>
    %214 = vector.extract_strided_slice %208 {offsets = [16, 0], sizes = [16, 16], strides = [1, 1]} : vector<64x16xf32> to vector<16x16xf32>
    %215 = vector.extract_strided_slice %0 {offsets = [1, 0], sizes = [1, 32], strides = [1, 1]} : vector<4x32xf32> to vector<1x32xf32>
    %216 = vector.broadcast %215 : vector<1x32xf32> to vector<16x32xf32>
    %217 = arith.mulf %178, %216 : vector<16x32xf32>
    %cst_92 = arith.constant dense<0.000000e+00> : vector<16x32xf32>
    %218 = tpu.matmul %214, %217, %cst_92 {dimension_numbers = #tpu.dot_dimension_numbers<[1], [0], [0], [1], [0, 0, 1, 1], [], []>} : vector<16x16xf32>, vector<16x32xf32>, vector<16x32xf32> -> vector<16x32xf32>
    %219 = arith.addf %213, %218 : vector<16x32xf32>
    %220 = vector.extract_strided_slice %208 {offsets = [32, 0], sizes = [16, 16], strides = [1, 1]} : vector<64x16xf32> to vector<16x16xf32>
    %221 = vector.extract_strided_slice %0 {offsets = [2, 0], sizes = [1, 32], strides = [1, 1]} : vector<4x32xf32> to vector<1x32xf32>
    %222 = vector.broadcast %221 : vector<1x32xf32> to vector<16x32xf32>
    %223 = arith.mulf %178, %222 : vector<16x32xf32>
    %cst_93 = arith.constant dense<0.000000e+00> : vector<16x32xf32>
    %224 = tpu.matmul %220, %223, %cst_93 {dimension_numbers = #tpu.dot_dimension_numbers<[1], [0], [0], [1], [0, 0, 1, 1], [], []>} : vector<16x16xf32>, vector<16x32xf32>, vector<16x32xf32> -> vector<16x32xf32>
    %225 = arith.addf %219, %224 : vector<16x32xf32>
    %226 = vector.extract_strided_slice %208 {offsets = [48, 0], sizes = [16, 16], strides = [1, 1]} : vector<64x16xf32> to vector<16x16xf32>
    %227 = vector.extract_strided_slice %0 {offsets = [3, 0], sizes = [1, 32], strides = [1, 1]} : vector<4x32xf32> to vector<1x32xf32>
    %228 = vector.broadcast %227 : vector<1x32xf32> to vector<16x32xf32>
    %229 = arith.mulf %178, %228 : vector<16x32xf32>
    %cst_94 = arith.constant dense<0.000000e+00> : vector<16x32xf32>
    %230 = tpu.matmul %226, %229, %cst_94 {dimension_numbers = #tpu.dot_dimension_numbers<[1], [0], [0], [1], [0, 0, 1, 1], [], []>} : vector<16x16xf32>, vector<16x32xf32>, vector<16x32xf32> -> vector<16x32xf32>
    %231 = arith.addf %225, %230 : vector<16x32xf32>
    %c9 = arith.constant 9 : index
    %c0_95 = arith.constant 0 : index
    %c0_96 = arith.constant 0 : index
    %232 = vector.load %arg2[%c9, %c0_95, %c0_96] : memref<15x32x32xf32, #tpu.memory_space<vmem>>, vector<1x32x32xf32>
    %233 = vector.shape_cast %232 : vector<1x32x32xf32> to vector<32x32xf32>
    %cst_97 = arith.constant dense<0.000000e+00> : vector<16x32xf32>
    %234 = tpu.matmul %231, %233, %cst_97 {dimension_numbers = #tpu.dot_dimension_numbers<[1], [0], [0], [1], [0, 0, 1, 1], [], []>} : vector<16x32xf32>, vector<32x32xf32>, vector<16x32xf32> -> vector<16x32xf32>
    %c96 = arith.constant 96 : index
    %c0_98 = arith.constant 0 : index
    %235 = vector.load %arg5[%c96, %c0_98] : memref<112x32xf32, #tpu.memory_space<vmem>>, vector<1x32xf32>
    %236 = vector.broadcast %235 : vector<1x32xf32> to vector<16x32xf32>
    %237 = arith.addf %234, %236 : vector<16x32xf32>
    %238 = arith.addf %158, %237 : vector<16x32xf32>
    %cst_99 = arith.constant dense<0.000000e+00> : vector<16xf32>
    %239 = vector.multi_reduction <add>, %238, %cst_99 [1] : vector<16x32xf32> to vector<16xf32>
    %240 = vector.shape_cast %239 : vector<16xf32> to vector<16x1xf32>
    %cst_100 = arith.constant 3.200000e+01 : f32
    %241 = vector.broadcast %cst_100 : f32 to vector<16x1xf32>
    %242 = arith.divf %240, %241 : vector<16x1xf32>
    %243 = vector.broadcast %242 : vector<16x1xf32> to vector<16x32xf32>
    %244 = arith.subf %238, %243 : vector<16x32xf32>
    %245 = arith.mulf %244, %244 : vector<16x32xf32>
    %cst_101 = arith.constant dense<0.000000e+00> : vector<16xf32>
    %246 = vector.multi_reduction <add>, %245, %cst_101 [1] : vector<16x32xf32> to vector<16xf32>
    %247 = vector.shape_cast %246 : vector<16xf32> to vector<16x1xf32>
    %cst_102 = arith.constant 0.0322580636 : f32
    %248 = vector.broadcast %cst_102 : f32 to vector<16x1xf32>
    %249 = arith.mulf %247, %248 : vector<16x1xf32>
    %c97 = arith.constant 97 : index
    %c0_103 = arith.constant 0 : index
    %250 = vector.load %arg5[%c97, %c0_103] : memref<112x32xf32, #tpu.memory_space<vmem>>, vector<1x32xf32>
    %251 = vector.broadcast %242 : vector<16x1xf32> to vector<16x32xf32>
    %252 = arith.subf %238, %251 : vector<16x32xf32>
    %253 = vector.broadcast %250 : vector<1x32xf32> to vector<16x32xf32>
    %254 = arith.mulf %253, %252 : vector<16x32xf32>
    %255 = math.sqrt %249 : vector<16x1xf32>
    %cst_104 = arith.constant 9.99999997E-7 : f32
    %256 = vector.broadcast %cst_104 : f32 to vector<16x1xf32>
    %257 = arith.addf %255, %256 : vector<16x1xf32>
    %258 = vector.broadcast %257 : vector<16x1xf32> to vector<16x32xf32>
    %259 = arith.divf %254, %258 : vector<16x32xf32>
    %c98 = arith.constant 98 : index
    %c0_105 = arith.constant 0 : index
    %260 = vector.load %arg5[%c98, %c0_105] : memref<112x32xf32, #tpu.memory_space<vmem>>, vector<1x32xf32>
    %261 = vector.broadcast %260 : vector<1x32xf32> to vector<16x32xf32>
    %262 = arith.addf %259, %261 : vector<16x32xf32>
    %c10 = arith.constant 10 : index
    %c0_106 = arith.constant 0 : index
    %c0_107 = arith.constant 0 : index
    %263 = vector.load %arg2[%c10, %c0_106, %c0_107] : memref<15x32x32xf32, #tpu.memory_space<vmem>>, vector<1x32x32xf32>
    %264 = vector.shape_cast %263 : vector<1x32x32xf32> to vector<32x32xf32>
    %cst_108 = arith.constant dense<0.000000e+00> : vector<16x32xf32>
    %265 = tpu.matmul %262, %264, %cst_108 {dimension_numbers = #tpu.dot_dimension_numbers<[1], [0], [0], [1], [0, 0, 1, 1], [], []>} : vector<16x32xf32>, vector<32x32xf32>, vector<16x32xf32> -> vector<16x32xf32>
    %c99 = arith.constant 99 : index
    %c0_109 = arith.constant 0 : index
    %266 = vector.load %arg5[%c99, %c0_109] : memref<112x32xf32, #tpu.memory_space<vmem>>, vector<1x32xf32>
    %267 = vector.broadcast %266 : vector<1x32xf32> to vector<16x32xf32>
    %268 = arith.addf %265, %267 : vector<16x32xf32>
    %cst_110 = arith.constant 0.353553385 : f32
    %269 = vector.broadcast %cst_110 : f32 to vector<16x32xf32>
    %270 = arith.mulf %268, %269 : vector<16x32xf32>
    %c11 = arith.constant 11 : index
    %c0_111 = arith.constant 0 : index
    %c0_112 = arith.constant 0 : index
    %271 = vector.load %arg2[%c11, %c0_111, %c0_112] : memref<15x32x32xf32, #tpu.memory_space<vmem>>, vector<1x32x32xf32>
    %272 = vector.shape_cast %271 : vector<1x32x32xf32> to vector<32x32xf32>
    %cst_113 = arith.constant dense<0.000000e+00> : vector<64x32xf32>
    %273 = tpu.matmul %152, %272, %cst_113 {dimension_numbers = #tpu.dot_dimension_numbers<[1], [0], [0], [1], [0, 0, 1, 1], [], []>} : vector<64x32xf32>, vector<32x32xf32>, vector<64x32xf32> -> vector<64x32xf32>
    %c100 = arith.constant 100 : index
    %c0_114 = arith.constant 0 : index
    %274 = vector.load %arg5[%c100, %c0_114] : memref<112x32xf32, #tpu.memory_space<vmem>>, vector<1x32xf32>
    %275 = vector.broadcast %274 : vector<1x32xf32> to vector<64x32xf32>
    %276 = arith.addf %273, %275 : vector<64x32xf32>
    %c12 = arith.constant 12 : index
    %c0_115 = arith.constant 0 : index
    %c0_116 = arith.constant 0 : index
    %277 = vector.load %arg2[%c12, %c0_115, %c0_116] : memref<15x32x32xf32, #tpu.memory_space<vmem>>, vector<1x32x32xf32>
    %278 = vector.shape_cast %277 : vector<1x32x32xf32> to vector<32x32xf32>
    %cst_117 = arith.constant dense<0.000000e+00> : vector<64x32xf32>
    %279 = tpu.matmul %152, %278, %cst_117 {dimension_numbers = #tpu.dot_dimension_numbers<[1], [0], [0], [1], [0, 0, 1, 1], [], []>} : vector<64x32xf32>, vector<32x32xf32>, vector<64x32xf32> -> vector<64x32xf32>
    %c101 = arith.constant 101 : index
    %c0_118 = arith.constant 0 : index
    %280 = vector.load %arg5[%c101, %c0_118] : memref<112x32xf32, #tpu.memory_space<vmem>>, vector<1x32xf32>
    %281 = vector.broadcast %280 : vector<1x32xf32> to vector<64x32xf32>
    %282 = arith.addf %279, %281 : vector<64x32xf32>
    %283 = vector.extract_strided_slice %0 {offsets = [0, 0], sizes = [1, 32], strides = [1, 1]} : vector<4x32xf32> to vector<1x32xf32>
    %284 = vector.broadcast %283 : vector<1x32xf32> to vector<16x32xf32>
    %285 = arith.mulf %270, %284 : vector<16x32xf32>
    %cst_119 = arith.constant dense<0.000000e+00> : vector<16x64xf32>
    %286 = tpu.matmul %285, %276, %cst_119 {dimension_numbers = #tpu.dot_dimension_numbers<[1], [1], [0], [0], [0, 0, 1, 0], [], []>} : vector<16x32xf32>, vector<64x32xf32>, vector<16x64xf32> -> vector<16x64xf32>
    %287 = arith.addf %286, %2 : vector<16x64xf32>
    %288 = vector.extract_strided_slice %0 {offsets = [1, 0], sizes = [1, 32], strides = [1, 1]} : vector<4x32xf32> to vector<1x32xf32>
    %289 = vector.broadcast %288 : vector<1x32xf32> to vector<16x32xf32>
    %290 = arith.mulf %270, %289 : vector<16x32xf32>
    %cst_120 = arith.constant dense<0.000000e+00> : vector<16x64xf32>
    %291 = tpu.matmul %290, %276, %cst_120 {dimension_numbers = #tpu.dot_dimension_numbers<[1], [1], [0], [0], [0, 0, 1, 0], [], []>} : vector<16x32xf32>, vector<64x32xf32>, vector<16x64xf32> -> vector<16x64xf32>
    %292 = arith.addf %291, %2 : vector<16x64xf32>
    %293 = vector.extract_strided_slice %0 {offsets = [2, 0], sizes = [1, 32], strides = [1, 1]} : vector<4x32xf32> to vector<1x32xf32>
    %294 = vector.broadcast %293 : vector<1x32xf32> to vector<16x32xf32>
    %295 = arith.mulf %270, %294 : vector<16x32xf32>
    %cst_121 = arith.constant dense<0.000000e+00> : vector<16x64xf32>
    %296 = tpu.matmul %295, %276, %cst_121 {dimension_numbers = #tpu.dot_dimension_numbers<[1], [1], [0], [0], [0, 0, 1, 0], [], []>} : vector<16x32xf32>, vector<64x32xf32>, vector<16x64xf32> -> vector<16x64xf32>
    %297 = arith.addf %296, %2 : vector<16x64xf32>
    %298 = vector.extract_strided_slice %0 {offsets = [3, 0], sizes = [1, 32], strides = [1, 1]} : vector<4x32xf32> to vector<1x32xf32>
    %299 = vector.broadcast %298 : vector<1x32xf32> to vector<16x32xf32>
    %300 = arith.mulf %270, %299 : vector<16x32xf32>
    %cst_122 = arith.constant dense<0.000000e+00> : vector<16x64xf32>
    %301 = tpu.matmul %300, %276, %cst_122 {dimension_numbers = #tpu.dot_dimension_numbers<[1], [1], [0], [0], [0, 0, 1, 0], [], []>} : vector<16x32xf32>, vector<64x32xf32>, vector<16x64xf32> -> vector<16x64xf32>
    %302 = arith.addf %301, %2 : vector<16x64xf32>
    %303 = tpu.concatenate %287, %292, %297, %302 in 0 : vector<16x64xf32>, vector<16x64xf32>, vector<16x64xf32>, vector<16x64xf32> -> vector<64x64xf32>
    %cst_123 = arith.constant dense<0xFF800000> : vector<64xf32>
    %304 = vector.multi_reduction <maximumf>, %303, %cst_123 [1] : vector<64x64xf32> to vector<64xf32>
    %305 = vector.shape_cast %304 : vector<64xf32> to vector<64x1xf32>
    %306 = vector.broadcast %305 : vector<64x1xf32> to vector<64x64xf32>
    %307 = arith.subf %303, %306 : vector<64x64xf32>
    %308 = math.exp %307 : vector<64x64xf32>
    %cst_124 = arith.constant dense<0.000000e+00> : vector<64xf32>
    %309 = vector.multi_reduction <add>, %308, %cst_124 [1] : vector<64x64xf32> to vector<64xf32>
    %310 = vector.shape_cast %309 : vector<64xf32> to vector<64x1xf32>
    %311 = vector.broadcast %310 : vector<64x1xf32> to vector<64x64xf32>
    %312 = arith.divf %308, %311 : vector<64x64xf32>
    %313 = vector.extract_strided_slice %312 {offsets = [0, 0], sizes = [16, 64], strides = [1, 1]} : vector<64x64xf32> to vector<16x64xf32>
    %314 = vector.extract_strided_slice %0 {offsets = [0, 0], sizes = [1, 32], strides = [1, 1]} : vector<4x32xf32> to vector<1x32xf32>
    %315 = vector.broadcast %314 : vector<1x32xf32> to vector<64x32xf32>
    %316 = arith.mulf %282, %315 : vector<64x32xf32>
    %cst_125 = arith.constant dense<0.000000e+00> : vector<16x32xf32>
    %317 = tpu.matmul %313, %316, %cst_125 {dimension_numbers = #tpu.dot_dimension_numbers<[1], [0], [0], [1], [0, 0, 1, 1], [], []>} : vector<16x64xf32>, vector<64x32xf32>, vector<16x32xf32> -> vector<16x32xf32>
    %318 = vector.extract_strided_slice %312 {offsets = [16, 0], sizes = [16, 64], strides = [1, 1]} : vector<64x64xf32> to vector<16x64xf32>
    %319 = vector.extract_strided_slice %0 {offsets = [1, 0], sizes = [1, 32], strides = [1, 1]} : vector<4x32xf32> to vector<1x32xf32>
    %320 = vector.broadcast %319 : vector<1x32xf32> to vector<64x32xf32>
    %321 = arith.mulf %282, %320 : vector<64x32xf32>
    %cst_126 = arith.constant dense<0.000000e+00> : vector<16x32xf32>
    %322 = tpu.matmul %318, %321, %cst_126 {dimension_numbers = #tpu.dot_dimension_numbers<[1], [0], [0], [1], [0, 0, 1, 1], [], []>} : vector<16x64xf32>, vector<64x32xf32>, vector<16x32xf32> -> vector<16x32xf32>
    %323 = arith.addf %317, %322 : vector<16x32xf32>
    %324 = vector.extract_strided_slice %312 {offsets = [32, 0], sizes = [16, 64], strides = [1, 1]} : vector<64x64xf32> to vector<16x64xf32>
    %325 = vector.extract_strided_slice %0 {offsets = [2, 0], sizes = [1, 32], strides = [1, 1]} : vector<4x32xf32> to vector<1x32xf32>
    %326 = vector.broadcast %325 : vector<1x32xf32> to vector<64x32xf32>
    %327 = arith.mulf %282, %326 : vector<64x32xf32>
    %cst_127 = arith.constant dense<0.000000e+00> : vector<16x32xf32>
    %328 = tpu.matmul %324, %327, %cst_127 {dimension_numbers = #tpu.dot_dimension_numbers<[1], [0], [0], [1], [0, 0, 1, 1], [], []>} : vector<16x64xf32>, vector<64x32xf32>, vector<16x32xf32> -> vector<16x32xf32>
    %329 = arith.addf %323, %328 : vector<16x32xf32>
    %330 = vector.extract_strided_slice %312 {offsets = [48, 0], sizes = [16, 64], strides = [1, 1]} : vector<64x64xf32> to vector<16x64xf32>
    %331 = vector.extract_strided_slice %0 {offsets = [3, 0], sizes = [1, 32], strides = [1, 1]} : vector<4x32xf32> to vector<1x32xf32>
    %332 = vector.broadcast %331 : vector<1x32xf32> to vector<64x32xf32>
    %333 = arith.mulf %282, %332 : vector<64x32xf32>
    %cst_128 = arith.constant dense<0.000000e+00> : vector<16x32xf32>
    %334 = tpu.matmul %330, %333, %cst_128 {dimension_numbers = #tpu.dot_dimension_numbers<[1], [0], [0], [1], [0, 0, 1, 1], [], []>} : vector<16x64xf32>, vector<64x32xf32>, vector<16x32xf32> -> vector<16x32xf32>
    %335 = arith.addf %329, %334 : vector<16x32xf32>
    %c13 = arith.constant 13 : index
    %c0_129 = arith.constant 0 : index
    %c0_130 = arith.constant 0 : index
    %336 = vector.load %arg2[%c13, %c0_129, %c0_130] : memref<15x32x32xf32, #tpu.memory_space<vmem>>, vector<1x32x32xf32>
    %337 = vector.shape_cast %336 : vector<1x32x32xf32> to vector<32x32xf32>
    %cst_131 = arith.constant dense<0.000000e+00> : vector<16x32xf32>
    %338 = tpu.matmul %335, %337, %cst_131 {dimension_numbers = #tpu.dot_dimension_numbers<[1], [0], [0], [1], [0, 0, 1, 1], [], []>} : vector<16x32xf32>, vector<32x32xf32>, vector<16x32xf32> -> vector<16x32xf32>
    %c102 = arith.constant 102 : index
    %c0_132 = arith.constant 0 : index
    %339 = vector.load %arg5[%c102, %c0_132] : memref<112x32xf32, #tpu.memory_space<vmem>>, vector<1x32xf32>
    %340 = vector.broadcast %339 : vector<1x32xf32> to vector<16x32xf32>
    %341 = arith.addf %338, %340 : vector<16x32xf32>
    %342 = arith.addf %262, %341 : vector<16x32xf32>
    %cst_133 = arith.constant dense<0.000000e+00> : vector<16xf32>
    %343 = vector.multi_reduction <add>, %342, %cst_133 [1] : vector<16x32xf32> to vector<16xf32>
    %344 = vector.shape_cast %343 : vector<16xf32> to vector<16x1xf32>
    %cst_134 = arith.constant 3.200000e+01 : f32
    %345 = vector.broadcast %cst_134 : f32 to vector<16x1xf32>
    %346 = arith.divf %344, %345 : vector<16x1xf32>
    %347 = vector.broadcast %346 : vector<16x1xf32> to vector<16x32xf32>
    %348 = arith.subf %342, %347 : vector<16x32xf32>
    %349 = arith.mulf %348, %348 : vector<16x32xf32>
    %cst_135 = arith.constant dense<0.000000e+00> : vector<16xf32>
    %350 = vector.multi_reduction <add>, %349, %cst_135 [1] : vector<16x32xf32> to vector<16xf32>
    %351 = vector.shape_cast %350 : vector<16xf32> to vector<16x1xf32>
    %cst_136 = arith.constant 0.0322580636 : f32
    %352 = vector.broadcast %cst_136 : f32 to vector<16x1xf32>
    %353 = arith.mulf %351, %352 : vector<16x1xf32>
    %c103 = arith.constant 103 : index
    %c0_137 = arith.constant 0 : index
    %354 = vector.load %arg5[%c103, %c0_137] : memref<112x32xf32, #tpu.memory_space<vmem>>, vector<1x32xf32>
    %355 = vector.broadcast %346 : vector<16x1xf32> to vector<16x32xf32>
    %356 = arith.subf %342, %355 : vector<16x32xf32>
    %357 = vector.broadcast %354 : vector<1x32xf32> to vector<16x32xf32>
    %358 = arith.mulf %357, %356 : vector<16x32xf32>
    %359 = math.sqrt %353 : vector<16x1xf32>
    %cst_138 = arith.constant 9.99999997E-7 : f32
    %360 = vector.broadcast %cst_138 : f32 to vector<16x1xf32>
    %361 = arith.addf %359, %360 : vector<16x1xf32>
    %362 = vector.broadcast %361 : vector<16x1xf32> to vector<16x32xf32>
    %363 = arith.divf %358, %362 : vector<16x32xf32>
    %c104 = arith.constant 104 : index
    %c0_139 = arith.constant 0 : index
    %364 = vector.load %arg5[%c104, %c0_139] : memref<112x32xf32, #tpu.memory_space<vmem>>, vector<1x32xf32>
    %365 = vector.broadcast %364 : vector<1x32xf32> to vector<16x32xf32>
    %366 = arith.addf %363, %365 : vector<16x32xf32>
    %c1_140 = arith.constant 1 : index
    %c0_141 = arith.constant 0 : index
    %c0_142 = arith.constant 0 : index
    %367 = vector.load %arg3[%c1_140, %c0_141, %c0_142] : memref<2x32x64xf32, #tpu.memory_space<vmem>>, vector<1x32x64xf32>
    %368 = vector.shape_cast %367 : vector<1x32x64xf32> to vector<32x64xf32>
    %cst_143 = arith.constant dense<0.000000e+00> : vector<16x64xf32>
    %369 = tpu.matmul %366, %368, %cst_143 {dimension_numbers = #tpu.dot_dimension_numbers<[1], [0], [0], [1], [0, 0, 1, 1], [], []>} : vector<16x32xf32>, vector<32x64xf32>, vector<16x64xf32> -> vector<16x64xf32>
    %c1_144 = arith.constant 1 : index
    %c0_145 = arith.constant 0 : index
    %370 = vector.load %arg6[%c1_144, %c0_145] : memref<2x64xf32, #tpu.memory_space<vmem>>, vector<1x64xf32>
    %371 = vector.broadcast %370 : vector<1x64xf32> to vector<16x64xf32>
    %372 = arith.addf %369, %371 : vector<16x64xf32>
    %cst_146 = arith.constant 0.000000e+00 : f32
    %373 = vector.broadcast %cst_146 : f32 to vector<16x64xf32>
    %374 = arith.maximumf %372, %373 : vector<16x64xf32>
    %c1_147 = arith.constant 1 : index
    %c0_148 = arith.constant 0 : index
    %c0_149 = arith.constant 0 : index
    %375 = vector.load %arg4[%c1_147, %c0_148, %c0_149] : memref<2x64x32xf32, #tpu.memory_space<vmem>>, vector<1x64x32xf32>
    %376 = vector.shape_cast %375 : vector<1x64x32xf32> to vector<64x32xf32>
    %cst_150 = arith.constant dense<0.000000e+00> : vector<16x32xf32>
    %377 = tpu.matmul %374, %376, %cst_150 {dimension_numbers = #tpu.dot_dimension_numbers<[1], [0], [0], [1], [0, 0, 1, 1], [], []>} : vector<16x64xf32>, vector<64x32xf32>, vector<16x32xf32> -> vector<16x32xf32>
    %c105 = arith.constant 105 : index
    %c0_151 = arith.constant 0 : index
    %378 = vector.load %arg5[%c105, %c0_151] : memref<112x32xf32, #tpu.memory_space<vmem>>, vector<1x32xf32>
    %379 = vector.broadcast %378 : vector<1x32xf32> to vector<16x32xf32>
    %380 = arith.addf %377, %379 : vector<16x32xf32>
    %381 = arith.addf %366, %380 : vector<16x32xf32>
    %cst_152 = arith.constant dense<0.000000e+00> : vector<16xf32>
    %382 = vector.multi_reduction <add>, %381, %cst_152 [1] : vector<16x32xf32> to vector<16xf32>
    %383 = vector.shape_cast %382 : vector<16xf32> to vector<16x1xf32>
    %cst_153 = arith.constant 3.200000e+01 : f32
    %384 = vector.broadcast %cst_153 : f32 to vector<16x1xf32>
    %385 = arith.divf %383, %384 : vector<16x1xf32>
    %386 = vector.broadcast %385 : vector<16x1xf32> to vector<16x32xf32>
    %387 = arith.subf %381, %386 : vector<16x32xf32>
    %388 = arith.mulf %387, %387 : vector<16x32xf32>
    %cst_154 = arith.constant dense<0.000000e+00> : vector<16xf32>
    %389 = vector.multi_reduction <add>, %388, %cst_154 [1] : vector<16x32xf32> to vector<16xf32>
    %390 = vector.shape_cast %389 : vector<16xf32> to vector<16x1xf32>
    %cst_155 = arith.constant 0.0322580636 : f32
    %391 = vector.broadcast %cst_155 : f32 to vector<16x1xf32>
    %392 = arith.mulf %390, %391 : vector<16x1xf32>
    %c106 = arith.constant 106 : index
    %c0_156 = arith.constant 0 : index
    %393 = vector.load %arg5[%c106, %c0_156] : memref<112x32xf32, #tpu.memory_space<vmem>>, vector<1x32xf32>
    %394 = vector.broadcast %385 : vector<16x1xf32> to vector<16x32xf32>
    %395 = arith.subf %381, %394 : vector<16x32xf32>
    %396 = vector.broadcast %393 : vector<1x32xf32> to vector<16x32xf32>
    %397 = arith.mulf %396, %395 : vector<16x32xf32>
    %398 = math.sqrt %392 : vector<16x1xf32>
    %cst_157 = arith.constant 9.99999997E-7 : f32
    %399 = vector.broadcast %cst_157 : f32 to vector<16x1xf32>
    %400 = arith.addf %398, %399 : vector<16x1xf32>
    %401 = vector.broadcast %400 : vector<16x1xf32> to vector<16x32xf32>
    %402 = arith.divf %397, %401 : vector<16x32xf32>
    %c107 = arith.constant 107 : index
    %c0_158 = arith.constant 0 : index
    %403 = vector.load %arg5[%c107, %c0_158] : memref<112x32xf32, #tpu.memory_space<vmem>>, vector<1x32xf32>
    %404 = vector.broadcast %403 : vector<1x32xf32> to vector<16x32xf32>
    %405 = arith.addf %402, %404 : vector<16x32xf32>
    %c14 = arith.constant 14 : index
    %c0_159 = arith.constant 0 : index
    %c0_160 = arith.constant 0 : index
    %406 = vector.load %arg2[%c14, %c0_159, %c0_160] : memref<15x32x32xf32, #tpu.memory_space<vmem>>, vector<1x32x32xf32>
    %407 = vector.shape_cast %406 : vector<1x32x32xf32> to vector<32x32xf32>
    %cst_161 = arith.constant dense<0.000000e+00> : vector<16x32xf32>
    %408 = tpu.matmul %405, %407, %cst_161 {dimension_numbers = #tpu.dot_dimension_numbers<[1], [0], [0], [1], [0, 0, 1, 1], [], []>} : vector<16x32xf32>, vector<32x32xf32>, vector<16x32xf32> -> vector<16x32xf32>
    %c108 = arith.constant 108 : index
    %c0_162 = arith.constant 0 : index
    %409 = vector.load %arg5[%c108, %c0_162] : memref<112x32xf32, #tpu.memory_space<vmem>>, vector<1x32xf32>
    %410 = vector.broadcast %409 : vector<1x32xf32> to vector<16x32xf32>
    %411 = arith.addf %408, %410 : vector<16x32xf32>
    %c0_163 = arith.constant 0 : index
    %c0_164 = arith.constant 0 : index
    %412 = vector.load %arg7[%c0_163, %c0_164] : memref<16x32xf32, #tpu.memory_space<vmem>>, vector<16x32xf32>
    tpu.vector_store %arg7[%c0_163, %c0_164], %411 {strides = array<i32>} : memref<16x32xf32, #tpu.memory_space<vmem>>, vector<16x32xf32>,
    return
  }
}

</mosaic_0001>

<bundles_post_ra>
// kernel: net_forward.1
= control target key start
LH: loop header
LB: loop body
LE: loop exit
PB: predicated region body
PF: predicated region fallthrough
CT: control target
= control target key end

     0   :  { %vm59_vm0 = vcmask 261120   ;;  %v566_v56 = vlaneseq  ;;  %vm1154_vm2 = vcmask 523264   ;;  %s10229_s2 = inlined_call_operand.vmem [shape: f32[15,32,32], index: 2, kind: input, shape index: {}]   ;;  %s10230_s0 = inlined_call_operand.vmem [shape: f32[80,32], index: 0, kind: input, shape index: {}]   ;;  %s10231_s5 = inlined_call_operand.vmem [shape: f32[112,32], index: 5, kind: input, shape index: {}]   ;;  %s10232_s1 = inlined_call_operand.vmem [shape: f32[96,64], index: 1, kind: input, shape index: {}]   ;;  %s10233_s3 = inlined_call_operand.vmem [shape: f32[2,32,64], index: 3, kind: input, shape index: {}]   ;;  %s10234_s4 = inlined_call_operand.vmem [shape: f32[2,64,32], index: 4, kind: input, shape index: {}]   ;;  %s10235_s6 = inlined_call_operand.vmem [shape: f32[2,64], index: 6, kind: input, shape index: {}]   ;;  %s10236_s7 = inlined_call_operand.vmem [shape: f32[16,32], index: 7, kind: output, shape index: {}]  }
   0x1   :  { %v47_v0 = vld [vmem:[%s10229_s2] sm:$0xff]  ;;  %v48_v1 = vld [vmem:[%s10229_s2 + $0x8] sm:$0xff]  ;;  %v49_v2 = vld [vmem:[%s10229_s2 + $0x10] sm:$0xff] }
   0x2   :  { %v7298_v3 = vpack.c.bf16 %v48_v1, %v47_v0  ;;  %v50_v4 = vld [vmem:[%s10229_s2 + $0x18] sm:$0xff]  ;;  %v39_v5 = vld [vmem:[%s10230_s0] sm:$0xff]  ;;  %v5798_v8 = vld [vmem:[%s10229_s2 + $0x48] sm:$0xff]  ;;  %v567_v57 = vshrl.u32 %v566_v56, 7 }
   0x3   :  { %v7302_v6 = vpack.c.bf16 %v50_v4, %v49_v2  ;;  %6568 = vmatprep.mubr.msk.f32.mxu1 %vm59_vm0, %v39_v5  ;;  %v5797_v7 = vld [vmem:[%s10229_s2 + $0x40] sm:$0xff]  ;;  %v5811_v11 = vld [vmem:[%s10229_s2 + $0x68] sm:$0xff]  ;;  %v41_v14 = vld [vmem:[%s10230_s0 + $0x10] sm:$0xff] }
   0x4   :  { %7299 = vmatprep.subr.bf16.mxu1 %v7298_v3  ;;  %v5810_v9 = vld [vmem:[%s10229_s2 + $0x60] sm:$0xff]  ;;  %v7306_v10 = vpack.c.bf16 %v5798_v8, %v5797_v7  ;;  %v40_v13 = vld [vmem:[%s10230_s0 + $0x8] sm:$0xff]  ;;  %v42_v15 = vld [vmem:[%s10230_s0 + $0x18] sm:$0xff]  ;;  %v568_v60 = vsub.s32 0, %v567_v57  ;;  %v733_v61 = vsub.s32 1, %v567_v57  ;;  %v10255_v8 = vmov 0 }
   0x5   :  { %7301 = vmatpush3.bf16.msra.mxu1 %v7298_v3  ;;  %v7314_v12 = vpack.c.bf16 %v5811_v11, %v5810_v9  ;;  %v43_v16 = vld [vmem:[%s10230_s0 + $0x20] sm:$0xff]  ;;  %v44_v17 = vld [vmem:[%s10230_s0 + $0x28] sm:$0xff]  ;;  %v45_v18 = vld [vmem:[%s10230_s0 + $0x30] sm:$0xff] }
   0x6   :  { %7303 = vmatprep.subr.bf16.mxu1 %v7302_v6  ;;  %v46_v19 = vld [vmem:[%s10230_s0 + $0x38] sm:$0xff]  ;;  %v5799_v20 = vld [vmem:[%s10229_s2 + $0x50] sm:$0xff]  ;;  %v5823_v26 = vld [vmem:[%s10229_s2 + $0x80] sm:$0xff] }
   0x7   :  { %7315 = vmatprep.subr.bf16.mxu0 %v7314_v12  ;;  %v5800_v21 = vld [vmem:[%s10229_s2 + $0x58] sm:$0xff]  ;;  %v5812_v22 = vld [vmem:[%s10229_s2 + $0x70] sm:$0xff]  ;;  %v5824_v27 = vld [vmem:[%s10229_s2 + $0x88] sm:$0xff] }
   0x8   :  { %7317 = vmatpush3.bf16.msra.mxu0 %v7314_v12  ;;  %v7310_v23 = vpack.c.bf16 %v5800_v21, %v5799_v20  ;;  %v5813_v24 = vld [vmem:[%s10229_s2 + $0x78] sm:$0xff]  ;;  %v7322_v28 = vpack.c.bf16 %v5824_v27, %v5823_v26  ;;  %v51_v29 = vld [vmem:[%s10231_s5] sm:$0xff]  ;;  %v52_v30 = vld [vmem:[%s10231_s5 + $0x8] sm:$0xff] }
   0x9   :  { %7305 = vmatpush3.bf16.msra.mxu1 %v7302_v6  ;;  %v7318_v25 = vpack.c.bf16 %v5813_v24, %v5812_v22  ;;  %v5825_v32 = vld [vmem:[%s10229_s2 + $0x90] sm:$0xff]  ;;  %v5826_v33 = vld [vmem:[%s10229_s2 + $0x98] sm:$0xff]  ;;  %v56_v44 = vld [vmem:[%s10231_s5 + $0x28] sm:$0xff] }
   0xa   :  { %7307 = vmatprep.subr.bf16.mxu1 %v7306_v10  ;;  %v54_v36 = vld [vmem:[%s10231_s5 + $0x18] sm:$0xff]  ;;  %v53_v38 = vld [vmem:[%s10231_s5 + $0x10] sm:$0xff]  ;;  %v7326_v39 = vpack.c.bf16 %v5826_v33, %v5825_v32  ;;  %v55_v45 = vld [vmem:[%s10231_s5 + $0x20] sm:$0xff]  ;;  %v874_v32 = vsub.s32 2, %v567_v57 }
   0xb   :  { %7319 = vmatprep.subr.bf16.mxu0 %v7318_v25  ;;  %v58_v50 = vld [vmem:[%s10231_s5 + $0x38] sm:$0xff]  ;;  %v57_v51 = vld [vmem:[%s10231_s5 + $0x30] sm:$0xff]  ;;  %vm8370_vm1 = vmpackc.low %vm59_vm0, %vm59_vm0 }
   0xc   :  { %6569 = vmatmul.mubr.msk.f32.vlgmr.msra.gmra.mrb[0].mxu1 %vm59_vm0, %v40_v13  ;;  %7321 = vmatpush3.bf16.msra.mxu0 %v7318_v25  ;;  %v5814_v58 = vld [vmem:[%s10231_s5 + $0x55] ss:$0 sm:$0xff]  ;;  %v8356_v59 = vld [vmem:[%s10231_s5 + $0x54] ss:$0 sm:$0xff]  ;;  %v26_v62 = vld [vmem:[%s10231_s5 + $0x50] sm:$0xf] }
   0xd   :  { %6571 = vmatprep.mubr.msk.f32.mxu1 %vm59_vm0, %v41_v14  ;;  %7309 = vmatpush3.bf16.msra.mxu1 %v7306_v10  ;;  %v8364_v6 = vrot.slane %v26_v62, %v568_v60  ;;  %v8366_v7 = vrot.slane %v26_v62, %v733_v61  ;;  %v10256_v8 = vsel %vm8370_vm1, 4294967295, %v10255_v8  ;;  %v8421_v33 = vld [vmem:[%s10231_s5 + $0x56] ss:$0 sm:$0xff] }
   0xe   :  { %7311 = vmatprep.subr.bf16.mxu1 %v7310_v23  ;;  %10257 = vst [vmem:[#allocation7_spill] sm:$0xff] %v10256_v8 }
   0xf   :  { %10253 = vst [vmem:[#allocation5_spill] sm:$0xff] %v8364_v6  ;;  %10254 = vst [vmem:[#allocation6_spill] sm:$0xff] %v8366_v7 }
  0x10   :  { %6572 = vmatmul.mubr.msk.f32.gmra.mrb[2].mxu1 %vm59_vm0, %v42_v15 }
  0x11   :  { %6574 = vmatprep.mubr.msk.f32.mxu1 %vm59_vm0, %v43_v16  ;;  %7313 = vmatpush3.bf16.msra.mxu1 %v7310_v23 }
  0x12   :  { %7323 = vmatprep.subr.bf16.mxu1 %v7322_v28 }
  0x14   :  { %6575 = vmatmul.mubr.msk.f32.gmra.mrb[4].mxu1 %vm59_vm0, %v44_v17 }
  0x15   :  { %6577 = vmatprep.mubr.msk.f32.mxu1 %vm59_vm0, %v45_v18 }
  0x18   :  { %6578 = vmatmul.mubr.msk.f32.gmra.mrb[6].mxu1 %vm59_vm0, %v46_v19 }
  0xdf   :  { %v6570_v31 = vpop.f32.mrb[0].mxu1 }
  0xe0   :  { %v150_v34 = vpop.f32.mrb[1].mxu1  ;;  %v8273_v37 = vadd.f32 %v6570_v31, %v52_v30 }
  0xe1   :  { %v8268_v35 = vadd.f32 %v150_v34, %v51_v29 }
  0xe3   :  { %v6573_v40 = vpop.f32.mrb[2].mxu1  ;;  %6588 = vmatprep.mubr.msk.f32.mxu1 %vm59_vm0, %v8268_v35  ;;  %6608 = vmatprep.mubr.msk.f32.mxu0 %vm59_vm0, %v8268_v35 }
  0xe4   :  { %v8282_v41 = vadd.f32 %v6573_v40, %v54_v36  ;;  %v160_v42 = vpop.f32.mrb[3].mxu1  ;;  %6589 = vmatmul.mubr.msk.f32.vlgmr.msra.gmra.mrb[8].mxu1 %vm59_vm0, %v8273_v37  ;;  %6609 = vmatmul.mubr.msk.f32.vlgmr.msra.gmra.mrb[0].mxu0 %vm59_vm0, %v8273_v37  ;;  %v1015_v36 = vsub.s32 3, %v567_v57 }
  0xe5   :  { %v8288_v43 = vadd.f32 %v160_v42, %v53_v38  ;;  %7325 = vmatpush3.bf16.msra.mxu1 %v7322_v28 }
  0xe6   :  { %7327 = vmatprep.subr.bf16.mxu1 %v7326_v39 }
  0xe7   :  { %v6576_v46 = vpop.f32.mrb[4].mxu1  ;;  %6591 = vmatprep.mubr.msk.f32.mxu1 %vm59_vm0, %v8288_v43  ;;  %6611 = vmatprep.mubr.msk.f32.mxu0 %vm59_vm0, %v8288_v43 }
  0xe8   :  { %v8300_v47 = vadd.f32 %v6576_v46, %v56_v44  ;;  %v170_v48 = vpop.f32.mrb[5].mxu1  ;;  %6592 = vmatmul.mubr.msk.f32.gmra.mrb[10].mxu1 %vm59_vm0, %v8282_v41  ;;  %6612 = vmatmul.mubr.msk.f32.gmra.mrb[2].mxu0 %vm59_vm0, %v8282_v41  ;;  %v8438_v44 = vrot.slane %v26_v62, %v874_v32  ;;  %v8441_v46 = vrot.slane %v26_v62, %v1015_v36 }
  0xe9   :  { %v8306_v49 = vadd.f32 %v170_v48, %v55_v45  ;;  %7329 = vmatpush3.bf16.msra.mxu1 %v7326_v39 }
  0xea   :  { %10258 = vst [vmem:[#allocation8_spill] sm:$0xff] %v8438_v44  ;;  %10259 = vst [vmem:[#allocation9_spill] sm:$0xff] %v8441_v46 }
  0xeb   :  { %10250 = vst [vmem:[#allocation2_spill] sm:$0xff] %v8306_v49  ;;  %v6579_v52 = vpop.f32.mrb[6].mxu1  ;;  %6594 = vmatprep.mubr.msk.f32.mxu1 %vm59_vm0, %v8306_v49  ;;  %6614 = vmatprep.mubr.msk.f32.mxu0 %vm59_vm0, %v8306_v49 }
  0xec   :  { %v8318_v53 = vadd.f32 %v6579_v52, %v58_v50  ;;  %v180_v54 = vpop.f32.mrb[7].mxu1  ;;  %6595 = vmatmul.mubr.msk.f32.gmra.mrb[12].mxu1 %vm59_vm0, %v8300_v47  ;;  %6615 = vmatmul.mubr.msk.f32.gmra.mrb[4].mxu0 %vm59_vm0, %v8300_v47 }
  0xed   :  { %v8324_v55 = vadd.f32 %v180_v54, %v57_v51 }
  0xee   :  { %10251 = vst [vmem:[#allocation3_spill] sm:$0xff] %v8318_v53 }
  0xef   :  { %10252 = vst [vmem:[#allocation4_spill] sm:$0xff] %v8324_v55  ;;  %6597 = vmatprep.mubr.msk.f32.mxu1 %vm59_vm0, %v8324_v55  ;;  %6617 = vmatprep.mubr.msk.f32.mxu0 %vm59_vm0, %v8324_v55 }
  0xf0   :  { %6598 = vmatmul.mubr.msk.f32.gmra.mrb[14].mxu1 %vm59_vm0, %v8318_v53  ;;  %6618 = vmatmul.mubr.msk.f32.gmra.mrb[6].mxu0 %vm59_vm0, %v8318_v53 }
  0xf1   :  { %6628 = vmatprep.mubr.msk.f32.mxu1 %vm59_vm0, %v8268_v35 }
  0xf4   :  { %6629 = vmatmul.mubr.msk.f32.vlgmr.msra.gmra.mrb[16].mxu1 %vm59_vm0, %v8273_v37 }
  0xf5   :  { %6631 = vmatprep.mubr.msk.f32.mxu1 %vm59_vm0, %v8288_v43 }
  0xf8   :  { %6632 = vmatmul.mubr.msk.f32.gmra.mrb[18].mxu1 %vm59_vm0, %v8282_v41 }
  0xf9   :  { %6634 = vmatprep.mubr.msk.f32.mxu1 %vm59_vm0, %v8306_v49 }
  0xfc   :  { %6635 = vmatmul.mubr.msk.f32.gmra.mrb[20].mxu1 %vm59_vm0, %v8300_v47 }
  0xfd   :  { %6637 = vmatprep.mubr.msk.f32.mxu1 %vm59_vm0, %v8324_v55 }
 0x100   :  { %6638 = vmatmul.mubr.msk.f32.gmra.mrb[22].mxu1 %vm59_vm0, %v8318_v53 }
 0x1b7   :  { %v8361_v63 = vpop.f32.mrb[8].mxu1  ;;  %v6610_v0 = vpop.f32.mrb[0].mxu0 }
 0x1b8   :  { %v418_v1 = vadd.f32 %v6610_v0, %v5814_v58  ;;  %v289_v2 = vpop.f32.mrb[9].mxu1  ;;  %v412_v3 = vpop.f32.mrb[1].mxu0  ;;  %v295_v0 = vadd.f32 %v8361_v63, %v8356_v59 }
 0x1b9   :  { %v290_v4 = vadd.f32 %v8356_v59, %v289_v2  ;;  %v413_v5 = vadd.f32 %v5814_v58, %v412_v3 }
 0x1bb   :  { %v8374_v9 = vmul.f32 0.35355338, %v290_v4  ;;  %v8376_v10 = vpack.c.bf16 %v418_v1, %v413_v5  ;;  %v8378_v11 = vpop.f32.mrb[10].mxu1  ;;  %v6613_v12 = vpop.f32.mrb[2].mxu0 }
 0x1bc   :  { %v8380_v13 = vpop.f32.mrb[11].mxu1  ;;  %v422_v14 = vpop.f32.mrb[3].mxu0  ;;  %v428_v15 = vadd.f32 %v6613_v12, %v5814_v58 }
 0x1bd   :  { %v423_v16 = vadd.f32 %v5814_v58, %v422_v14  ;;  %7332 = vmatprep.subr.msk.bf16.mxu0 %vm8370_vm1, %v8376_v10  ;;  %7356 = vmatprep.subr.msk.bf16.mxu1 %vm8370_vm1, %v8376_v10  ;;  %v570_v17 = vmul.f32 %v8364_v6, %v8374_v9  ;;  %v735_v18 = vmul.f32 %v8366_v7, %v8374_v9 }
 0x1be   :  { %7335 = vmatpush3.bf16.xpose.msk.msra.mxu0 %vm8370_vm1, %v8376_v10  ;;  %7359 = vmatpush3.bf16.xpose.msk.msra.mxu1 %vm8370_vm1, %v8376_v10 }
 0x1bf   :  { %v8395_v19 = vpack.c.bf16 %v428_v15, %v423_v16  ;;  %v8400_v20 = vpop.f32.mrb[12].mxu1  ;;  %v6616_v21 = vpop.f32.mrb[4].mxu0  ;;  %6656 = vmatprep.mubr.msk.f32.mxu0 %vm59_vm0, %v570_v17  ;;  %6684 = vmatprep.mubr.msk.f32.mxu1 %vm59_vm0, %v735_v18 }
 0x1c0   :  { %v8404_v22 = vpop.f32.mrb[13].mxu1  ;;  %v438_v23 = vadd.f32 %v6616_v21, %v5814_v58  ;;  %v432_v24 = vpop.f32.mrb[5].mxu0 }
 0x1c1   :  { %7338 = vmatprep.subr.msk.bf16.mxu0 %vm8370_vm1, %v8395_v19  ;;  %7362 = vmatprep.subr.msk.bf16.mxu1 %vm8370_vm1, %v8395_v19  ;;  %v433_v25 = vadd.f32 %v5814_v58, %v432_v24 }
 0x1c3   :  { %v8412_v26 = vpop.f32.mrb[14].mxu1  ;;  %v8414_v27 = vpack.c.bf16 %v438_v23, %v433_v25  ;;  %v6619_v28 = vpop.f32.mrb[6].mxu0 }
 0x1c4   :  { %v8416_v29 = vpop.f32.mrb[15].mxu1  ;;  %v448_v30 = vadd.f32 %v6619_v28, %v5814_v58  ;;  %v442_v31 = vpop.f32.mrb[7].mxu0 }
 0x1c5   :  { %v443_v34 = vadd.f32 %v5814_v58, %v442_v31 }
 0x1c6   :  { %7341 = vmatpush3.bf16.xpose.msk.msra.mxu0 %vm8370_vm1, %v8395_v19  ;;  %7365 = vmatpush3.bf16.xpose.msk.msra.mxu1 %vm8370_vm1, %v8395_v19 }
 0x1c7   :  { %v6630_v38 = vpop.f32.mrb[16].mxu1  ;;  %7344 = vmatprep.subr.msk.bf16.mxu0 %vm8370_vm1, %v8414_v27  ;;  %v8432_v39 = vpack.c.bf16 %v448_v30, %v443_v34  ;;  %7368 = vmatprep.subr.msk.bf16.mxu1 %vm8370_vm1, %v8414_v27 }
 0x1c8   :  { %v533_v40 = vadd.f32 %v6630_v38, %v8421_v33  ;;  %v527_v42 = vpop.f32.mrb[17].mxu1 }
 0x1c9   :  { %v528_v45 = vadd.f32 %v8421_v33, %v527_v42 }
 0x1ca   :  { %v1516_v48 = vmul.f32 %v8366_v7, %v533_v40  ;;  %v1508_v54 = vmul.f32 %v8364_v6, %v533_v40  ;;  %v1782_v60 = vmul.f32 %v8438_v44, %v533_v40  ;;  %v1927_v62 = vmul.f32 %v8441_v46, %v533_v40 }
 0x1cb   :  { %v6633_v50 = vpop.f32.mrb[18].mxu1  ;;  %v1515_v51 = vmul.f32 %v8366_v7, %v528_v45  ;;  %v1507_v52 = vmul.f32 %v8364_v6, %v528_v45  ;;  %v1781_v56 = vmul.f32 %v8438_v44, %v528_v45  ;;  %v1926_v61 = vmul.f32 %v8441_v46, %v528_v45 }
 0x1cc   :  { %v543_v57 = vadd.f32 %v6633_v50, %v8421_v33  ;;  %v537_v58 = vpop.f32.mrb[19].mxu1 }
 0x1cd   :  { %v538_v1 = vadd.f32 %v8421_v33, %v537_v58  ;;  %v8455_v2 = vpack.c.bf16 %v1516_v48, %v1515_v51  ;;  %v8457_v3 = vpack.c.bf16 %v1508_v54, %v1507_v52  ;;  %v8464_v12 = vpack.c.bf16 %v1782_v60, %v1781_v56 }
 0x1ce   :  { %7347 = vmatpush3.bf16.xpose.msk.msra.mxu0 %vm8370_vm1, %v8414_v27  ;;  %v1518_v4 = vmul.f32 %v8366_v7, %v543_v57  ;;  %v1510_v5 = vmul.f32 %v8364_v6, %v543_v57  ;;  %v1784_v14 = vmul.f32 %v8438_v44, %v543_v57  ;;  %7371 = vmatpush3.bf16.xpose.msk.msra.mxu1 %vm8370_vm1, %v8414_v27 }
 0x1cf   :  { %v6636_v63 = vpop.f32.mrb[20].mxu1  ;;  %7350 = vmatprep.subr.msk.bf16.mxu0 %vm8370_vm1, %v8432_v39  ;;  %v1517_v15 = vmul.f32 %v8366_v7, %v538_v1  ;;  %v1509_v16 = vmul.f32 %v8364_v6, %v538_v1  ;;  %v1783_v17 = vmul.f32 %v8438_v44, %v538_v1  ;;  %7374 = vmatprep.subr.msk.bf16.mxu1 %vm8370_vm1, %v8432_v39 }
 0x1d0   :  { %v553_v18 = vadd.f32 %v6636_v63, %v8421_v33  ;;  %v547_v21 = vpop.f32.mrb[21].mxu1  ;;  %v8480_v23 = vpack.c.bf16 %v1927_v62, %v1926_v61  ;;  %v1928_v24 = vmul.f32 %v8441_v46, %v538_v1  ;;  %v1929_v25 = vmul.f32 %v8441_v46, %v543_v57 }
 0x1d1   :  { %v548_v28 = vadd.f32 %v8421_v33, %v547_v21  ;;  %v8485_v30 = vpack.c.bf16 %v1518_v4, %v1517_v15  ;;  %v8487_v31 = vpack.c.bf16 %v1510_v5, %v1509_v16  ;;  %v8489_v32 = vpack.c.bf16 %v1784_v14, %v1783_v17 }
 0x1d2   :  { %v1520_v34 = vmul.f32 %v8366_v7, %v553_v18  ;;  %v1512_v36 = vmul.f32 %v8364_v6, %v553_v18  ;;  %v1786_v38 = vmul.f32 %v8438_v44, %v553_v18  ;;  %v8494_v40 = vpack.c.bf16 %v1929_v25, %v1928_v24 }
 0x1d3   :  { %v6639_v42 = vpop.f32.mrb[22].mxu1  ;;  %v1519_v45 = vmul.f32 %v8366_v7, %v548_v28  ;;  %v1511_v48 = vmul.f32 %v8364_v6, %v548_v28  ;;  %v1785_v50 = vmul.f32 %v8438_v44, %v548_v28  ;;  %v1930_v51 = vmul.f32 %v8441_v46, %v548_v28 }
 0x1d4   :  { %v305_v52 = vadd.f32 %v8378_v11, %v8356_v59  ;;  %v300_v54 = vadd.f32 %v8356_v59, %v8380_v13  ;;  %v563_v56 = vadd.f32 %v6639_v42, %v8421_v33  ;;  %v557_v57 = vpop.f32.mrb[23].mxu1  ;;  %v1931_v58 = vmul.f32 %v8441_v46, %v553_v18 }
 0x1d5   :  { %v558_v60 = vadd.f32 %v8421_v33, %v557_v57  ;;  %v8507_v61 = vpack.c.bf16 %v1520_v34, %v1519_v45  ;;  %v8509_v62 = vpack.c.bf16 %v1512_v36, %v1511_v48  ;;  %v8511_v1 = vpack.c.bf16 %v1786_v38, %v1785_v50 }
 0x1d6   :  { %7353 = vmatpush3.bf16.xpose.msk.msra.mxu0 %vm8370_vm1, %v8432_v39  ;;  %v1522_v11 = vmul.f32 %v8366_v7, %v563_v56  ;;  %v1514_v13 = vmul.f32 %v8364_v6, %v563_v56  ;;  %v1788_v4 = vmul.f32 %v8438_v44, %v563_v56  ;;  %v8519_v5 = vpack.c.bf16 %v1931_v58, %v1930_v51 }
 0x1d7   :  { %v8521_v14 = vmul.f32 0.35355338, %v295_v0  ;;  %7377 = vmatpush3.bf16.xpose.msk.msra.mxu1 %vm8370_vm1, %v8432_v39  ;;  %7380 = vmatprep.subr.msk.bf16.mxu0 %vm8370_vm1, %v8376_v10  ;;  %v1521_v33 = vmul.f32 %v8366_v7, %v558_v60  ;;  %v1513_v63 = vmul.f32 %v8364_v6, %v558_v60  ;;  %v1787_v15 = vmul.f32 %v8438_v44, %v558_v60 }
 0x1d8   :  { %v8532_v16 = vmul.f32 0.35355338, %v300_v54  ;;  %v310_v0 = vadd.f32 %v8356_v59, %v8404_v22  ;;  %7404 = vmatprep.subr.msk.bf16.mxu1 %vm8370_vm1, %v8376_v10  ;;  %v1932_v17 = vmul.f32 %v8441_v46, %v558_v60  ;;  %v1933_v18 = vmul.f32 %v8441_v46, %v563_v56 }
 0x1d9   :  { %v8541_v21 = vpack.c.bf16 %v1522_v11, %v1521_v33  ;;  %v8543_v24 = vpack.c.bf16 %v1514_v13, %v1513_v63  ;;  %v8545_v25 = vpack.c.bf16 %v1788_v4, %v1787_v15  ;;  %v571_v34 = vmul.f32 %v8364_v6, %v8521_v14 }
 0x1da   :  { %v8547_v28 = vpack.c.bf16 %v1933_v18, %v1932_v17  ;;  %v8551_v22 = vmul.f32 0.35355338, %v305_v52  ;;  %v315_v36 = vadd.f32 %v8400_v20, %v8356_v59  ;;  %v736_v38 = vmul.f32 %v8366_v7, %v8521_v14 }
 0x1db   :  { %v8557_v42 = vmul.f32 0.35355338, %v310_v0  ;;  %v320_v45 = vadd.f32 %v8356_v59, %v8416_v29  ;;  %v572_v48 = vmul.f32 %v8364_v6, %v8532_v16  ;;  %v737_v50 = vmul.f32 %v8366_v7, %v8532_v16 }
 0x1dc   :  { %v8568_v20 = vmul.f32 0.35355338, %v315_v36  ;;  %v325_v51 = vadd.f32 %v8412_v26, %v8356_v59  ;;  %v573_v29 = vmul.f32 %v8364_v6, %v8551_v22  ;;  %v738_v59 = vmul.f32 %v8366_v7, %v8551_v22  ;;  %v8703_v36 = vld [vmem:[%s10232_s1] sm:$0xff] }
 0x1dd   :  { %6657 = vmatmul.mubr.msk.f32.vlgmr.msra.gmra.mrb[8].mxu0 %vm59_vm0, %v571_v34  ;;  %v8578_v52 = vmul.f32 0.35355338, %v320_v45  ;;  %v574_v26 = vmul.f32 %v8364_v6, %v8557_v42  ;;  %v739_v54 = vmul.f32 %v8366_v7, %v8557_v42  ;;  %v876_v4 = vmul.f32 %v8438_v44, %v8374_v9 }
 0x1de   :  { %6685 = vmatmul.mubr.msk.f32.vlgmr.msra.gmra.mrb[24].mxu1 %vm59_vm0, %v736_v38  ;;  %6659 = vmatprep.mubr.msk.f32.mxu0 %vm59_vm0, %v572_v48  ;;  %v575_v56 = vmul.f32 %v8364_v6, %v8568_v20  ;;  %v740_v57 = vmul.f32 %v8366_v7, %v8568_v20  ;;  %v1017_v33 = vmul.f32 %v8441_v46, %v8374_v9 }
 0x1df   :  { %6687 = vmatprep.mubr.msk.f32.mxu1 %vm59_vm0, %v737_v50  ;;  %7383 = vmatpush3.bf16.xpose.msk.msra.mxu0 %vm8370_vm1, %v8376_v10  ;;  %v576_v58 = vmul.f32 %v8364_v6, %v8578_v52  ;;  %v741_v60 = vmul.f32 %v8366_v7, %v8578_v52  ;;  %v877_v9 = vmul.f32 %v8438_v44, %v8521_v14  ;;  %v8716_v50 = vld [vmem:[%s10232_s1 + $0x10] sm:$0xff] }
 0x1e0   :  { %7407 = vmatpush3.bf16.xpose.msk.msra.mxu1 %vm8370_vm1, %v8376_v10  ;;  %7386 = vmatprep.subr.msk.bf16.mxu0 %vm8370_vm1, %v8395_v19  ;;  %v335_v10 = vmul.f32 0.35355338, %v325_v51  ;;  %v1019_v63 = vmul.f32 %v8441_v46, %v8532_v16  ;;  %v880_v15 = vmul.f32 %v8438_v44, %v8557_v42  ;;  %v1022_v0 = vmul.f32 %v8441_v46, %v8568_v20 }
 0x1e1   :  { %7410 = vmatprep.subr.msk.bf16.mxu1 %vm8370_vm1, %v8395_v19  ;;  %6660 = vmatmul.mubr.msk.f32.gmra.mrb[10].mxu0 %vm59_vm0, %v573_v29  ;;  %v882_v17 = vmul.f32 %v8438_v44, %v8578_v52  ;;  %v1023_v18 = vmul.f32 %v8441_v46, %v8578_v52 }
 0x1e2   :  { %6688 = vmatmul.mubr.msk.f32.gmra.mrb[26].mxu1 %vm59_vm0, %v738_v59  ;;  %6662 = vmatprep.mubr.msk.f32.mxu0 %vm59_vm0, %v574_v26  ;;  %v577_v11 = vmul.f32 %v8364_v6, %v335_v10  ;;  %v742_v13 = vmul.f32 %v8366_v7, %v335_v10  ;;  %v1024_v34 = vmul.f32 %v8441_v46, %v335_v10  ;;  %v8726_v59 = vld [vmem:[%s10232_s1 + $0x18] sm:$0xff] }
 0x1e3   :  { %6690 = vmatprep.mubr.msk.f32.mxu1 %vm59_vm0, %v739_v54 }
 0x1e5   :  { %6663 = vmatmul.mubr.msk.f32.gmra.mrb[12].mxu0 %vm59_vm0, %v575_v56  ;;  %v8734_v56 = vld [vmem:[%s10232_s1 + $0x20] sm:$0xff] }
 0x1e6   :  { %6691 = vmatmul.mubr.msk.f32.gmra.mrb[28].mxu1 %vm59_vm0, %v740_v57  ;;  %6665 = vmatprep.mubr.msk.f32.mxu0 %vm59_vm0, %v576_v58 }
 0x1e7   :  { %6693 = vmatprep.mubr.msk.f32.mxu1 %vm59_vm0, %v741_v60  ;;  %7389 = vmatpush3.bf16.xpose.msk.msra.mxu0 %vm8370_vm1, %v8395_v19 }
 0x1e8   :  { %7413 = vmatpush3.bf16.xpose.msk.msra.mxu1 %vm8370_vm1, %v8395_v19  ;;  %7392 = vmatprep.subr.msk.bf16.mxu0 %vm8370_vm1, %v8414_v27  ;;  %v1018_v19 = vmul.f32 %v8441_v46, %v8521_v14  ;;  %v1020_v14 = vmul.f32 %v8441_v46, %v8551_v22 }
 0x1e9   :  { %7416 = vmatprep.subr.msk.bf16.mxu1 %vm8370_vm1, %v8414_v27  ;;  %6666 = vmatmul.mubr.msk.f32.gmra.mrb[14].mxu0 %vm59_vm0, %v577_v11 }
 0x1ea   :  { %6694 = vmatmul.mubr.msk.f32.gmra.mrb[30].mxu1 %vm59_vm0, %v742_v13  ;;  %6712 = vmatprep.mubr.msk.f32.mxu0 %vm59_vm0, %v876_v4  ;;  %v8746_v4 = vld [vmem:[%s10232_s1 + $0x28] sm:$0xff] }
 0x1eb   :  { %6740 = vmatprep.mubr.msk.f32.mxu1 %vm59_vm0, %v1017_v33 }
 0x1ef   :  { %7395 = vmatpush3.bf16.xpose.msk.msra.mxu0 %vm8370_vm1, %v8414_v27 }
 0x1f0   :  { %7419 = vmatpush3.bf16.xpose.msk.msra.mxu1 %vm8370_vm1, %v8414_v27  ;;  %7398 = vmatprep.subr.msk.bf16.mxu0 %vm8370_vm1, %v8432_v39  ;;  %v878_v27 = vmul.f32 %v8438_v44, %v8532_v16  ;;  %v1021_v16 = vmul.f32 %v8441_v46, %v8557_v42  ;;  %v8708_v42 = vld [vmem:[%s10232_s1 + $0x8] sm:$0xff] }
 0x1f1   :  { %7422 = vmatprep.subr.msk.bf16.mxu1 %vm8370_vm1, %v8432_v39 }
 0x1f7   :  { %7401 = vmatpush3.bf16.xpose.msk.msra.mxu0 %vm8370_vm1, %v8432_v39 }
 0x1f8   :  { %7425 = vmatpush3.bf16.xpose.msk.msra.mxu1 %vm8370_vm1, %v8432_v39  ;;  %7427 = vmatprep.subr.bf16.mxu0 %v8455_v2  ;;  %v879_v39 = vmul.f32 %v8438_v44, %v8551_v22 }
 0x1fe   :  { %6713 = vmatmul.mubr.msk.f32.vlgmr.msra.gmra.mrb[16].mxu0 %vm59_vm0, %v877_v9 }
 0x1ff   :  { %6741 = vmatmul.mubr.msk.f32.vlgmr.msra.gmra.mrb[32].mxu1 %vm59_vm0, %v1018_v19  ;;  %6715 = vmatprep.mubr.msk.f32.mxu0 %vm59_vm0, %v878_v27  ;;  %v8754_v27 = vld [vmem:[%s10232_s1 + $0x30] sm:$0xff] }
 0x200   :  { %6743 = vmatprep.mubr.msk.f32.mxu1 %vm59_vm0, %v1019_v63  ;;  %7429 = vmatpush3.bf16.msra.mxu0 %v8455_v2  ;;  %v881_v2 = vmul.f32 %v8438_v44, %v8568_v20 }
 0x201   :  { %7431 = vmatprep.subr.bf16.mxu0 %v8485_v30 }
 0x202   :  { %6716 = vmatmul.mubr.msk.f32.gmra.mrb[18].mxu0 %vm59_vm0, %v879_v39 }
 0x203   :  { %6744 = vmatmul.mubr.msk.f32.gmra.mrb[34].mxu1 %vm59_vm0, %v1020_v14  ;;  %6718 = vmatprep.mubr.msk.f32.mxu0 %vm59_vm0, %v880_v15 }
 0x204   :  { %6746 = vmatprep.mubr.msk.f32.mxu1 %vm59_vm0, %v1021_v16  ;;  %7433 = vmatpush3.bf16.msra.mxu0 %v8485_v30  ;;  %v883_v30 = vmul.f32 %v8438_v44, %v335_v10 }
 0x205   :  { %7435 = vmatprep.subr.bf16.mxu0 %v8507_v61 }
 0x206   :  { %6719 = vmatmul.mubr.msk.f32.gmra.mrb[20].mxu0 %vm59_vm0, %v881_v2  ;;  %v8766_v2 = vld [vmem:[%s10232_s1 + $0x38] sm:$0xff] }
 0x207   :  { %6747 = vmatmul.mubr.msk.f32.gmra.mrb[36].mxu1 %vm59_vm0, %v1022_v0  ;;  %6721 = vmatprep.mubr.msk.f32.mxu0 %vm59_vm0, %v882_v17 }
 0x208   :  { %6749 = vmatprep.mubr.msk.f32.mxu1 %vm59_vm0, %v1023_v18  ;;  %7437 = vmatpush3.bf16.msra.mxu0 %v8507_v61 }
 0x209   :  { %7439 = vmatprep.subr.bf16.mxu0 %v8541_v21 }
 0x20a   :  { %6722 = vmatmul.mubr.msk.f32.gmra.mrb[22].mxu0 %vm59_vm0, %v883_v30 }
 0x20b   :  { %6750 = vmatmul.mubr.msk.f32.gmra.mrb[38].mxu1 %vm59_vm0, %v1024_v34 }
 0x20c   :  { %7441 = vmatpush3.bf16.msra.mxu0 %v8541_v21 }
 0x20d   :  { %7443 = vmatprep.subr.bf16.mxu0 %v8457_v3 }
 0x2b0   :  { %v6658_v22 = vpop.f32.mrb[8].mxu0 }
 0x2b1   :  { %v6686_v61 = vpop.f32.mrb[24].mxu1  ;;  %v692_v38 = vpop.f32.mrb[9].mxu0 }
 0x2b2   :  { %v833_v45 = vpop.f32.mrb[25].mxu1  ;;  %v8719_v20 = vadd.f32 %v6686_v61, %v8708_v42  ;;  %v8772_v18 = vadd.f32 %v692_v38, %v8703_v36 }
 0x2b3   :  { %v8711_v48 = vadd.f32 %v833_v45, %v8703_v36  ;;  %v8782_v45 = vadd.f32 %v6658_v22, %v8708_v42 }
 0x2b4   :  { %v6661_v21 = vpop.f32.mrb[10].mxu0  ;;  %v1182_v11 = vsel %vm1154_vm2, %v8719_v20, -inf }
 0x2b5   :  { %v6689_v51 = vpop.f32.mrb[26].mxu1  ;;  %v1179_v29 = vsel %vm1154_vm2, %v8711_v48, -inf  ;;  %v702_v52 = vpop.f32.mrb[11].mxu0  ;;  %v1158_v22 = vsel %vm1154_vm2, %v8782_v45, -inf }
 0x2b6   :  { %v843_v26 = vpop.f32.mrb[27].mxu1  ;;  %1180 = vmax.xlane.f32.xlu0 %v1179_v29  ;;  %v8737_v57 = vadd.f32 %v6689_v51, %v8726_v59  ;;  %v8785_v51 = vadd.f32 %v702_v52, %v8716_v50  ;;  %v1155_v29 = vsel %vm1154_vm2, %v8772_v18, -inf }
 0x2b7   :  { %v8729_v54 = vadd.f32 %v843_v26, %v8716_v50  ;;  %v8792_v26 = vadd.f32 %v6661_v21, %v8726_v59 }
 0x2b8   :  { %v6664_v10 = vpop.f32.mrb[12].mxu0  ;;  %v1188_v14 = vsel %vm1154_vm2, %v8737_v57, -inf  ;;  %v1161_v52 = vsel %vm1154_vm2, %v8785_v51, -inf }
 0x2b9   :  { %v6692_v58 = vpop.f32.mrb[28].mxu1  ;;  %v1185_v60 = vsel %vm1154_vm2, %v8729_v54, -inf  ;;  %v712_v13 = vpop.f32.mrb[13].mxu0  ;;  %v1164_v21 = vsel %vm1154_vm2, %v8792_v26, -inf }
 0x2ba   :  { %v853_v33 = vpop.f32.mrb[29].mxu1  ;;  %1186 = vmax.xlane.f32.xlu1 %v1185_v60  ;;  %1183 = vmax.xlane.f32.xlu0 %v1182_v11  ;;  %v8757_v63 = vadd.f32 %v6692_v58, %v8746_v4  ;;  %v8795_v58 = vadd.f32 %v712_v13, %v8734_v56  ;;  %v8802_v60 = vadd.f32 %v6664_v10, %v8746_v4 }
 0x2bb   :  { %v8749_v9 = vadd.f32 %v853_v33, %v8734_v56 }
 0x2bc   :  { %v6667_v19 = vpop.f32.mrb[14].mxu0  ;;  %v1194_v34 = vsel %vm1154_vm2, %v8757_v63, -inf  ;;  %v1167_v13 = vsel %vm1154_vm2, %v8795_v58, -inf }
 0x2bd   :  { %v6695_v39 = vpop.f32.mrb[30].mxu1  ;;  %v1191_v15 = vsel %vm1154_vm2, %v8749_v9, -inf  ;;  %v722_v16 = vpop.f32.mrb[15].mxu0  ;;  %v8812_v33 = vadd.f32 %v6667_v19, %v8766_v2 }
 0x2be   :  { %v863_v0 = vpop.f32.mrb[31].mxu1  ;;  %1189 = vmax.xlane.f32.xlu1 %v1188_v14  ;;  %1192 = vmax.xlane.f32.xlu0 %v1191_v15  ;;  %v8775_v30 = vadd.f32 %v6695_v39, %v8766_v2  ;;  %v8805_v11 = vadd.f32 %v722_v16, %v8754_v27  ;;  %v1170_v14 = vsel %vm1154_vm2, %v8802_v60, -inf }
 0x2bf   :  { %v8769_v17 = vadd.f32 %v863_v0, %v8754_v27 }
 0x2c0   :  { %v1200_v38 = vsel %vm1154_vm2, %v8775_v30, -inf  ;;  %v1173_v10 = vsel %vm1154_vm2, %v8805_v11, -inf }
 0x2c1   :  { %v1197_v61 = vsel %vm1154_vm2, %v8769_v17, -inf }
 0x2c2   :  { %1195 = vmax.xlane.f32.xlu1 %v1194_v34  ;;  %1198 = vmax.xlane.f32.xlu0 %v1197_v61 }
 0x2c6   :  { %1201 = vmax.xlane.f32.xlu1 %v1200_v38  ;;  %1156 = vmax.xlane.f32.xlu0 %v1155_v29  ;;  %v1176_v38 = vsel %vm1154_vm2, %v8812_v33, -inf }
 0x2ca   :  { %1159 = vmax.xlane.f32.xlu1 %v1158_v22  ;;  %1162 = vmax.xlane.f32.xlu0 %v1161_v52 }
 0x2ce   :  { %1165 = vmax.xlane.f32.xlu1 %v1164_v21  ;;  %1168 = vmax.xlane.f32.xlu0 %v1167_v13 }
 0x2d1   :  { %v6714_v39 = vpop.f32.mrb[16].mxu0 }
 0x2d2   :  { %v6742_v15 = vpop.f32.mrb[32].mxu1  ;;  %1171 = vmax.xlane.f32.xlu1 %v1170_v14  ;;  %v974_v16 = vpop.f32.mrb[17].mxu0  ;;  %1174 = vmax.xlane.f32.xlu0 %v1173_v10  ;;  %v8822_v61 = vadd.f32 %v6714_v39, %v8708_v42 }
 0x2d3   :  { %v1115_v0 = vpop.f32.mrb[33].mxu1  ;;  %v8819_v34 = vadd.f32 %v974_v16, %v8703_v36 }
 0x2d4   :  { %v1206_v10 = vsel %vm1154_vm2, %v8822_v61, -inf }
 0x2d5   :  { %v6717_v19 = vpop.f32.mrb[18].mxu0  ;;  %v1203_v29 = vsel %vm1154_vm2, %v8819_v34, -inf }
 0x2d6   :  { %v6745_v22 = vpop.f32.mrb[34].mxu1  ;;  %1177 = vmax.xlane.f32.xlu1 %v1176_v38  ;;  %v984_v52 = vpop.f32.mrb[19].mxu0  ;;  %1204 = vmax.xlane.f32.xlu0 %v1203_v29  ;;  %v8832_v14 = vadd.f32 %v6717_v19, %v8726_v59 }
 0x2d7   :  { %v1125_v21 = vpop.f32.mrb[35].mxu1  ;;  %v8829_v13 = vadd.f32 %v984_v52, %v8716_v50 }
 0x2d8   :  { %v1212_v7 = vsel %vm1154_vm2, %v8832_v14, -inf }
 0x2d9   :  { %v6720_v39 = vpop.f32.mrb[20].mxu0  ;;  %v1209_v16 = vsel %vm1154_vm2, %v8829_v13, -inf }
 0x2da   :  { %v6748_v46 = vpop.f32.mrb[36].mxu1  ;;  %1207 = vmax.xlane.f32.xlu1 %v1206_v10  ;;  %v994_v44 = vpop.f32.mrb[21].mxu0  ;;  %1210 = vmax.xlane.f32.xlu0 %v1209_v16  ;;  %v8842_v52 = vadd.f32 %v6720_v39, %v8746_v4 }
 0x2db   :  { %v1135_v38 = vpop.f32.mrb[37].mxu1  ;;  %v8839_v29 = vadd.f32 %v994_v44, %v8734_v56  ;;  %v8852_v44 = vadd.f32 %v1115_v0, %v8703_v36  ;;  %v8872_v0 = vadd.f32 %v6745_v22, %v8726_v59 }
 0x2dc   :  { %v1218_v53 = vsel %vm1154_vm2, %v8842_v52, -inf }
 0x2dd   :  { %v6723_v19 = vpop.f32.mrb[22].mxu0  ;;  %v1215_v6 = vsel %vm1154_vm2, %v8839_v29, -inf  ;;  %v1227_v36 = vsel %vm1154_vm2, %v8852_v44, -inf  ;;  %v1236_v59 = vsel %vm1154_vm2, %v8872_v0, -inf }
 0x2de   :  { %v6751_v8 = vpop.f32.mrb[38].mxu1  ;;  %1213 = vmax.xlane.f32.xlu1 %v1212_v7  ;;  %v1004_v55 = vpop.f32.mrb[23].mxu0  ;;  %1216 = vmax.xlane.f32.xlu0 %v1215_v6  ;;  %v8855_v39 = vadd.f32 %v6723_v19, %v8766_v2  ;;  %v8862_v6 = vadd.f32 %v6742_v15, %v8708_v42 }
 0x2df   :  { %v1145_v10 = vpop.f32.mrb[39].mxu1  ;;  %v8849_v16 = vadd.f32 %v1004_v55, %v8754_v27  ;;  %v8865_v55 = vadd.f32 %v1125_v21, %v8716_v50  ;;  %v8882_v50 = vadd.f32 %v6748_v46, %v8746_v4  ;;  %v8892_v22 = vadd.f32 %v6751_v8, %v8766_v2 }
 0x2e0   :  { %v1224_v7 = vsel %vm1154_vm2, %v8855_v39, -inf  ;;  %v8885_v15 = vadd.f32 %v1145_v10, %v8754_v27 }
 0x2e1   :  { %v1221_v49 = vsel %vm1154_vm2, %v8849_v16, -inf  ;;  %v1233_v42 = vsel %vm1154_vm2, %v8865_v55, -inf  ;;  %v1242_v21 = vsel %vm1154_vm2, %v8882_v50, -inf  ;;  %v1248_v4 = vsel %vm1154_vm2, %v8892_v22, -inf }
 0x2e2   :  { %1219 = vmax.xlane.f32.xlu1 %v1218_v53  ;;  %1222 = vmax.xlane.f32.xlu0 %v1221_v49  ;;  %v8875_v53 = vadd.f32 %v1135_v38, %v8734_v56  ;;  %v1230_v49 = vsel %vm1154_vm2, %v8862_v6, -inf  ;;  %v1245_v46 = vsel %vm1154_vm2, %v8885_v15, -inf }
 0x2e4   :  { %v1239_v56 = vsel %vm1154_vm2, %v8875_v53, -inf }
 0x2e6   :  { %1225 = vmax.xlane.f32.xlu1 %v1224_v7  ;;  %1228 = vmax.xlane.f32.xlu0 %v1227_v36 }
 0x2ea   :  { %1231 = vmax.xlane.f32.xlu1 %v1230_v49  ;;  %1234 = vmax.xlane.f32.xlu0 %v1233_v42 }
 0x2ee   :  { %1237 = vmax.xlane.f32.xlu1 %v1236_v59  ;;  %1240 = vmax.xlane.f32.xlu0 %v1239_v56 }
 0x2f2   :  { %1243 = vmax.xlane.f32.xlu1 %v1242_v21  ;;  %1246 = vmax.xlane.f32.xlu0 %v1245_v46 }
 0x2f6   :  { %1249 = vmax.xlane.f32.xlu1 %v1248_v4 }
 0x343   :  { %v1181_v27 = vpop.xlane.xlu0 %1180 }
 0x344   :  { %v1259_v38 = vsub.f32 %v8711_v48, %v1181_v27 }
 0x346   :  { %v1299_v19 = vmul.f32 1.442695, %v1259_v38 }
 0x347   :  { %v1187_v10 = vpop.xlane.xlu1 %1186  ;;  %v1184_v7 = vpop.xlane.xlu0 %1183 }
 0x348   :  { %7862 = vpow2.f32 %v1299_v19  ;;  %v1261_v8 = vsub.f32 %v8729_v54, %v1187_v10  ;;  %v1260_v2 = vsub.f32 %v8719_v20, %v1184_v7 }
 0x34a   :  { %v1303_v36 = vmul.f32 1.442695, %v1261_v8  ;;  %v1301_v49 = vmul.f32 1.442695, %v1260_v2 }
 0x34b   :  { %v1190_v42 = vpop.xlane.xlu1 %1189  ;;  %v1193_v59 = vpop.xlane.xlu0 %1192 }
 0x34c   :  { %7864 = vpow2.f32 %v1303_v36  ;;  %v1262_v56 = vsub.f32 %v8737_v57, %v1190_v42  ;;  %v1263_v21 = vsub.f32 %v8749_v9, %v1193_v59 }
 0x34d   :  { %7866 = vpow2.f32 %v1301_v49 }
 0x34e   :  { %v1305_v46 = vmul.f32 1.442695, %v1262_v56  ;;  %v1307_v48 = vmul.f32 1.442695, %v1263_v21 }
 0x34f   :  { %v1196_v4 = vpop.xlane.xlu1 %1195  ;;  %v1199_v27 = vpop.xlane.xlu0 %1198 }
 0x350   :  { %7868 = vpow2.f32 %v1305_v46  ;;  %v1264_v38 = vsub.f32 %v8757_v63, %v1196_v4  ;;  %v1265_v54 = vsub.f32 %v8769_v17, %v1199_v27 }
 0x351   :  { %7870 = vpow2.f32 %v1307_v48 }
 0x352   :  { %v8907_v20 = vpop.eup %7862  ;;  %v1309_v19 = vmul.f32 1.442695, %v1264_v38  ;;  %v1311_v10 = vmul.f32 1.442695, %v1265_v54 }
 0x353   :  { %v1202_v7 = vpop.xlane.xlu1 %1201  ;;  %v1157_v8 = vpop.xlane.xlu0 %1156  ;;  %v1371_v57 = vsel %vm1154_vm2, %v8907_v20, 0.0 }
 0x354   :  { %7872 = vpow2.f32 %v1309_v19  ;;  %v1266_v9 = vsub.f32 %v8775_v30, %v1202_v7  ;;  %v1251_v2 = vsub.f32 %v8772_v18, %v1157_v8  ;;  %1372 = vadd.xlane.f32.xlu0 %v1371_v57 }
 0x355   :  { %7874 = vpow2.f32 %v1311_v10 }
 0x356   :  { %v8913_v63 = vpop.eup %7864  ;;  %v1313_v17 = vmul.f32 1.442695, %v1266_v9  ;;  %v1283_v36 = vmul.f32 1.442695, %v1251_v2 }
 0x357   :  { %v8915_v49 = vpop.eup %7866  ;;  %v1160_v42 = vpop.xlane.xlu1 %1159  ;;  %v1377_v56 = vsel %vm1154_vm2, %v8913_v63, 0.0 }
 0x358   :  { %v1163_v59 = vpop.xlane.xlu0 %1162  ;;  %7876 = vpow2.f32 %v1313_v17  ;;  %v1252_v21 = vsub.f32 %v8782_v45, %v1160_v42  ;;  %v1374_v18 = vsel %vm1154_vm2, %v8915_v49, 0.0  ;;  %1378 = vadd.xlane.f32.xlu0 %v1377_v56 }
 0x359   :  { %v1253_v30 = vsub.f32 %v8785_v51, %v1163_v59  ;;  %7878 = vpow2.f32 %v1283_v36  ;;  %1375 = vadd.xlane.f32.xlu1 %v1374_v18 }
 0x35a   :  { %v8923_v46 = vpop.eup %7868  ;;  %v1285_v48 = vmul.f32 1.442695, %v1252_v21 }
 0x35b   :  { %v1287_v4 = vmul.f32 1.442695, %v1253_v30  ;;  %v8925_v27 = vpop.eup %7870  ;;  %v1166_v38 = vpop.xlane.xlu1 %1165  ;;  %v1380_v19 = vsel %vm1154_vm2, %v8923_v46, 0.0 }
 0x35c   :  { %v1169_v54 = vpop.xlane.xlu0 %1168  ;;  %7880 = vpow2.f32 %v1285_v48  ;;  %v1254_v45 = vsub.f32 %v8792_v26, %v1166_v38  ;;  %v1383_v10 = vsel %vm1154_vm2, %v8925_v27, 0.0 }
 0x35d   :  { %v1255_v51 = vsub.f32 %v8795_v58, %v1169_v54  ;;  %7882 = vpow2.f32 %v1287_v4  ;;  %1381 = vadd.xlane.f32.xlu1 %v1380_v19  ;;  %1384 = vadd.xlane.f32.xlu0 %v1383_v10 }
 0x35e   :  { %v8933_v7 = vpop.eup %7872  ;;  %v1289_v8 = vmul.f32 1.442695, %v1254_v45 }
 0x35f   :  { %v1291_v57 = vmul.f32 1.442695, %v1255_v51  ;;  %v8935_v9 = vpop.eup %7874  ;;  %v1172_v2 = vpop.xlane.xlu1 %1171  ;;  %v1386_v36 = vsel %vm1154_vm2, %v8933_v7, 0.0 }
 0x360   :  { %v1175_v17 = vpop.xlane.xlu0 %1174  ;;  %7884 = vpow2.f32 %v1289_v8  ;;  %v1256_v26 = vsub.f32 %v8802_v60, %v1172_v2  ;;  %v1389_v42 = vsel %vm1154_vm2, %v8935_v9, 0.0 }
 0x361   :  { %v1257_v58 = vsub.f32 %v8805_v11, %v1175_v17  ;;  %7886 = vpow2.f32 %v1291_v57  ;;  %1387 = vadd.xlane.f32.xlu1 %v1386_v36  ;;  %1390 = vadd.xlane.f32.xlu0 %v1389_v42 }
 0x362   :  { %v8943_v59 = vpop.eup %7876  ;;  %v1293_v56 = vmul.f32 1.442695, %v1256_v26 }
 0x363   :  { %v1295_v21 = vmul.f32 1.442695, %v1257_v58  ;;  %v8945_v30 = vpop.eup %7878  ;;  %v1178_v18 = vpop.xlane.xlu1 %1177  ;;  %v1392_v4 = vsel %vm1154_vm2, %v8943_v59, 0.0 }
 0x364   :  { %v1205_v48 = vpop.xlane.xlu0 %1204  ;;  %7888 = vpow2.f32 %v1293_v56  ;;  %v1258_v60 = vsub.f32 %v8812_v33, %v1178_v18  ;;  %v1347_v38 = vsel %vm1154_vm2, %v8945_v30, 0.0 }
 0x365   :  { %v1267_v11 = vsub.f32 %v8819_v34, %v1205_v48  ;;  %7890 = vpow2.f32 %v1295_v21  ;;  %1393 = vadd.xlane.f32.xlu1 %v1392_v4  ;;  %1348 = vadd.xlane.f32.xlu0 %v1347_v38 }
 0x366   :  { %v8953_v54 = vpop.eup %7880  ;;  %v1297_v19 = vmul.f32 1.442695, %v1258_v60 }
 0x367   :  { %v1315_v45 = vmul.f32 1.442695, %v1267_v11  ;;  %v8955_v51 = vpop.eup %7882  ;;  %v1208_v10 = vpop.xlane.xlu1 %1207  ;;  %v1350_v57 = vsel %vm1154_vm2, %v8953_v54, 0.0 }
 0x368   :  { %v1211_v8 = vpop.xlane.xlu0 %1210  ;;  %7892 = vpow2.f32 %v1297_v19  ;;  %v1268_v33 = vsub.f32 %v8822_v61, %v1208_v10  ;;  %v1353_v2 = vsel %vm1154_vm2, %v8955_v51, 0.0 }
 0x369   :  { %v1269_v34 = vsub.f32 %v8829_v13, %v1211_v8  ;;  %7894 = vpow2.f32 %v1315_v45  ;;  %1351 = vadd.xlane.f32.xlu1 %v1350_v57  ;;  %1354 = vadd.xlane.f32.xlu0 %v1353_v2 }
 0x36a   :  { %v8963_v17 = vpop.eup %7884  ;;  %v1317_v36 = vmul.f32 1.442695, %v1268_v33 }
 0x36b   :  { %v1319_v26 = vmul.f32 1.442695, %v1269_v34  ;;  %v8965_v58 = vpop.eup %7886  ;;  %v1214_v42 = vpop.xlane.xlu1 %1213  ;;  %v1356_v21 = vsel %vm1154_vm2, %v8963_v17, 0.0 }
 0x36c   :  { %v1217_v56 = vpop.xlane.xlu0 %1216  ;;  %7896 = vpow2.f32 %v1317_v36  ;;  %v1270_v61 = vsub.f32 %v8832_v14, %v1214_v42  ;;  %v1359_v18 = vsel %vm1154_vm2, %v8965_v58, 0.0 }
 0x36d   :  { %v1271_v13 = vsub.f32 %v8839_v29, %v1217_v56  ;;  %7898 = vpow2.f32 %v1319_v26  ;;  %1357 = vadd.xlane.f32.xlu1 %v1356_v21  ;;  %1360 = vadd.xlane.f32.xlu0 %v1359_v18 }
 0x36e   :  { %v8973_v48 = vpop.eup %7888  ;;  %v1321_v4 = vmul.f32 1.442695, %v1270_v61 }
 0x36f   :  { %v1323_v60 = vmul.f32 1.442695, %v1271_v13  ;;  %v8975_v11 = vpop.eup %7890  ;;  %v1220_v38 = vpop.xlane.xlu1 %1219  ;;  %v1362_v45 = vsel %vm1154_vm2, %v8973_v48, 0.0 }
 0x370   :  { %v1223_v19 = vpop.xlane.xlu0 %1222  ;;  %7900 = vpow2.f32 %v1321_v4  ;;  %v1272_v14 = vsub.f32 %v8842_v52, %v1220_v38  ;;  %v1365_v10 = vsel %vm1154_vm2, %v8975_v11, 0.0 }
 0x371   :  { %v1273_v29 = vsub.f32 %v8849_v16, %v1223_v19  ;;  %7902 = vpow2.f32 %v1323_v60  ;;  %1363 = vadd.xlane.f32.xlu1 %v1362_v45  ;;  %1366 = vadd.xlane.f32.xlu0 %v1365_v10 }
 0x372   :  { %v8983_v8 = vpop.eup %7892  ;;  %v1325_v57 = vmul.f32 1.442695, %v1272_v14 }
 0x373   :  { %v1327_v33 = vmul.f32 1.442695, %v1273_v29  ;;  %v8985_v34 = vpop.eup %7894  ;;  %v1226_v2 = vpop.xlane.xlu1 %1225  ;;  %v1368_v26 = vsel %vm1154_vm2, %v8983_v8, 0.0 }
 0x374   :  { %v1229_v36 = vpop.xlane.xlu0 %1228  ;;  %7904 = vpow2.f32 %v1325_v57  ;;  %v1274_v52 = vsub.f32 %v8855_v39, %v1226_v2  ;;  %v1395_v42 = vsel %vm1154_vm2, %v8985_v34, 0.0 }
 0x375   :  { %v1275_v16 = vsub.f32 %v8852_v44, %v1229_v36  ;;  %7906 = vpow2.f32 %v1327_v33  ;;  %1369 = vadd.xlane.f32.xlu1 %v1368_v26  ;;  %1396 = vadd.xlane.f32.xlu0 %v1395_v42 }
 0x376   :  { %v8993_v56 = vpop.eup %7896  ;;  %v1329_v21 = vmul.f32 1.442695, %v1274_v52 }
 0x377   :  { %v1331_v61 = vmul.f32 1.442695, %v1275_v16  ;;  %v8995_v13 = vpop.eup %7898  ;;  %v1232_v18 = vpop.xlane.xlu1 %1231  ;;  %v1398_v60 = vsel %vm1154_vm2, %v8993_v56, 0.0 }
 0x378   :  { %v1235_v4 = vpop.xlane.xlu0 %1234  ;;  %7908 = vpow2.f32 %v1329_v21  ;;  %v1276_v44 = vsub.f32 %v8862_v6, %v1232_v18  ;;  %v1401_v38 = vsel %vm1154_vm2, %v8995_v13, 0.0 }
 0x379   :  { %v1277_v39 = vsub.f32 %v8865_v55, %v1235_v4  ;;  %7910 = vpow2.f32 %v1331_v61  ;;  %1399 = vadd.xlane.f32.xlu1 %v1398_v60  ;;  %1402 = vadd.xlane.f32.xlu0 %v1401_v38 }
 0x37a   :  { %v9003_v19 = vpop.eup %7900  ;;  %v1333_v45 = vmul.f32 1.442695, %v1276_v44 }
 0x37b   :  { %v1335_v14 = vmul.f32 1.442695, %v1277_v39  ;;  %v9005_v29 = vpop.eup %7902  ;;  %v1238_v10 = vpop.xlane.xlu1 %1237  ;;  %v1404_v33 = vsel %vm1154_vm2, %v9003_v19, 0.0 }
 0x37c   :  { %v1241_v57 = vpop.xlane.xlu0 %1240  ;;  %7912 = vpow2.f32 %v1333_v45  ;;  %v1278_v6 = vsub.f32 %v8872_v0, %v1238_v10  ;;  %v1407_v2 = vsel %vm1154_vm2, %v9005_v29, 0.0 }
 0x37d   :  { %v1279_v55 = vsub.f32 %v8875_v53, %v1241_v57  ;;  %7914 = vpow2.f32 %v1335_v14  ;;  %1405 = vadd.xlane.f32.xlu1 %v1404_v33  ;;  %1408 = vadd.xlane.f32.xlu0 %v1407_v2 }
 0x37e   :  { %v9013_v36 = vpop.eup %7904  ;;  %v1337_v26 = vmul.f32 1.442695, %v1278_v6 }
 0x37f   :  { %v1339_v52 = vmul.f32 1.442695, %v1279_v55  ;;  %v9015_v16 = vpop.eup %7906  ;;  %v1244_v42 = vpop.xlane.xlu1 %1243  ;;  %v1410_v61 = vsel %vm1154_vm2, %v9013_v36, 0.0 }
 0x380   :  { %v1247_v21 = vpop.xlane.xlu0 %1246  ;;  %7916 = vpow2.f32 %v1337_v26  ;;  %v1280_v0 = vsub.f32 %v8882_v50, %v1244_v42  ;;  %v1413_v18 = vsel %vm1154_vm2, %v9015_v16, 0.0 }
 0x381   :  { %v1281_v53 = vsub.f32 %v8885_v15, %v1247_v21  ;;  %7918 = vpow2.f32 %v1339_v52  ;;  %1411 = vadd.xlane.f32.xlu1 %v1410_v61  ;;  %1414 = vadd.xlane.f32.xlu0 %v1413_v18  ;;  %v5932_v18 = vld [vmem:[%s10229_s2 + $0xa0] sm:$0xff] }
 0x382   :  { %v9023_v4 = vpop.eup %7908  ;;  %v1341_v60 = vmul.f32 1.442695, %v1280_v0 }
 0x383   :  { %v1343_v44 = vmul.f32 1.442695, %v1281_v53  ;;  %v9025_v39 = vpop.eup %7910  ;;  %v1250_v38 = vpop.xlane.xlu1 %1249  ;;  %v1416_v45 = vsel %vm1154_vm2, %v9023_v4, 0.0 }
 0x384   :  { %7920 = vpow2.f32 %v1341_v60  ;;  %v1282_v50 = vsub.f32 %v8892_v22, %v1250_v38  ;;  %v1419_v15 = vsel %vm1154_vm2, %v9025_v39, 0.0  ;;  %v5933_v60 = vld [vmem:[%s10229_s2 + $0xa8] sm:$0xff] }
 0x385   :  { %7922 = vpow2.f32 %v1343_v44  ;;  %1417 = vadd.xlane.f32.xlu1 %v1416_v45  ;;  %1420 = vadd.xlane.f32.xlu0 %v1419_v15  ;;  %v5934_v44 = vld [vmem:[%s10229_s2 + $0xb0] sm:$0xff]  ;;  %v7490_v38 = vpack.c.bf16 %v5933_v60, %v5932_v18  ;;  %v5935_v45 = vld [vmem:[%s10229_s2 + $0xb8] sm:$0xff] }
 0x386   :  { %v9032_v14 = vpop.eup %7912  ;;  %v1345_v10 = vmul.f32 1.442695, %v1282_v50  ;;  %v7494_v50 = vpack.c.bf16 %v5935_v45, %v5934_v44 }
 0x387   :  { %v9034_v57 = vpop.eup %7914  ;;  %v1422_v33 = vsel %vm1154_vm2, %v9032_v14, 0.0  ;;  %7491 = vmatprep.subr.bf16.mxu1 %v7490_v38 }
 0x388   :  { %7924 = vpow2.f32 %v1345_v10  ;;  %v1425_v6 = vsel %vm1154_vm2, %v9034_v57, 0.0  ;;  %7493 = vmatpush3.bf16.msra.mxu1 %v7490_v38 }
 0x389   :  { %1423 = vadd.xlane.f32.xlu1 %v1422_v33  ;;  %1426 = vadd.xlane.f32.xlu0 %v1425_v6 }
 0x38a   :  { %v9040_v22 = vpop.eup %7916  ;;  %7495 = vmatprep.subr.bf16.mxu1 %v7494_v50 }
 0x38b   :  { %v9042_v55 = vpop.eup %7918  ;;  %v1428_v2 = vsel %vm1154_vm2, %v9040_v22, 0.0 }
 0x38c   :  { %v1431_v26 = vsel %vm1154_vm2, %v9042_v55, 0.0  ;;  %7497 = vmatpush3.bf16.msra.mxu1 %v7494_v50 }
 0x38d   :  { %1429 = vadd.xlane.f32.xlu1 %v1428_v2  ;;  %1432 = vadd.xlane.f32.xlu0 %v1431_v26 }
 0x38e   :  { %v9048_v52 = vpop.eup %7920 }
 0x38f   :  { %v9050_v42 = vpop.eup %7922  ;;  %v1434_v21 = vsel %vm1154_vm2, %v9048_v52, 0.0 }
 0x390   :  { %v1437_v61 = vsel %vm1154_vm2, %v9050_v42, 0.0 }
 0x391   :  { %1435 = vadd.xlane.f32.xlu1 %v1434_v21  ;;  %1438 = vadd.xlane.f32.xlu0 %v1437_v61 }
 0x392   :  { %v9056_v0 = vpop.eup %7924 }
 0x393   :  { %v1440_v53 = vsel %vm1154_vm2, %v9056_v0, 0.0 }
 0x395   :  { %1441 = vadd.xlane.f32.xlu1 %v1440_v53 }
 0x3e1   :  { %v1373_v15 = vpop.xlane.xlu0 %1372 }
 0x3e2   :  { %7926 = vrcp.f32 %v1373_v15 }
 0x3e5   :  { %v1379_v10 = vpop.xlane.xlu0 %1378 }
 0x3e6   :  { %v1376_v33 = vpop.xlane.xlu1 %1375  ;;  %7928 = vrcp.f32 %v1379_v10 }
 0x3e7   :  { %7930 = vrcp.f32 %v1376_v33 }
 0x3ea   :  { %v1382_v6 = vpop.xlane.xlu1 %1381  ;;  %v1385_v2 = vpop.xlane.xlu0 %1384 }
 0x3eb   :  { %7932 = vrcp.f32 %v1382_v6 }
 0x3ec   :  { %v7927_v26 = vpop.eup %7926  ;;  %7934 = vrcp.f32 %v1385_v2 }
 0x3ed   :  { %v1460_v21 = vmul.f32 %v7927_v26, %v8907_v20 }
 0x3ee   :  { %v1388_v61 = vpop.xlane.xlu1 %1387  ;;  %v1391_v53 = vpop.xlane.xlu0 %1390 }
 0x3ef   :  { %7936 = vrcp.f32 %v1388_v61  ;;  %6768 = vmatprep.mubr.msk.f32.mxu0 %vm1154_vm2, %v1460_v21 }
 0x3f0   :  { %v7929_v18 = vpop.eup %7928  ;;  %7938 = vrcp.f32 %v1391_v53 }
 0x3f1   :  { %v7931_v60 = vpop.eup %7930  ;;  %v1464_v44 = vmul.f32 %v7929_v18, %v8913_v63 }
 0x3f2   :  { %v1462_v38 = vmul.f32 %v7931_v60, %v8915_v49  ;;  %v1394_v45 = vpop.xlane.xlu1 %1393  ;;  %v1349_v50 = vpop.xlane.xlu0 %1348 }
 0x3f3   :  { %7940 = vrcp.f32 %v1394_v45 }
 0x3f4   :  { %7942 = vrcp.f32 %v1349_v50  ;;  %6769 = vmatmul.mubr.msk.f32.vlgmr.msra.gmra.mrb[24].mxu0 %vm1154_vm2, %v1462_v38 }
 0x3f5   :  { %v7933_v15 = vpop.eup %7932  ;;  %7445 = vmatpush3.bf16.msra.mxu0 %v8457_v3  ;;  %6771 = vmatprep.mubr.msk.f32.mxu0 %vm1154_vm2, %v1464_v44 }
 0x3f6   :  { %v7935_v20 = vpop.eup %7934  ;;  %7447 = vmatprep.subr.bf16.mxu0 %v8487_v31  ;;  %v1352_v10 = vpop.xlane.xlu1 %1351  ;;  %v1466_v63 = vmul.f32 %v7933_v15, %v8923_v46 }
 0x3f7   :  { %v1355_v33 = vpop.xlane.xlu0 %1354  ;;  %7944 = vrcp.f32 %v1352_v10  ;;  %v1468_v49 = vmul.f32 %v7935_v20, %v8925_v27 }
 0x3f8   :  { %7946 = vrcp.f32 %v1355_v33  ;;  %6772 = vmatmul.mubr.msk.f32.gmra.mrb[26].mxu0 %vm1154_vm2, %v1466_v63 }
 0x3f9   :  { %v7937_v6 = vpop.eup %7936  ;;  %7449 = vmatpush3.bf16.msra.mxu0 %v8487_v31  ;;  %6774 = vmatprep.mubr.msk.f32.mxu0 %vm1154_vm2, %v1468_v49 }
 0x3fa   :  { %v7939_v3 = vpop.eup %7938  ;;  %7451 = vmatprep.subr.bf16.mxu0 %v8509_v62  ;;  %v1358_v2 = vpop.xlane.xlu1 %1357  ;;  %v1470_v21 = vmul.f32 %v7937_v6, %v8933_v7 }
 0x3fb   :  { %v1361_v26 = vpop.xlane.xlu0 %1360  ;;  %7948 = vrcp.f32 %v1358_v2  ;;  %v1472_v46 = vmul.f32 %v7939_v3, %v8935_v9 }
 0x3fc   :  { %7950 = vrcp.f32 %v1361_v26  ;;  %6775 = vmatmul.mubr.msk.f32.gmra.mrb[28].mxu0 %vm1154_vm2, %v1470_v21 }
 0x3fd   :  { %v7941_v27 = vpop.eup %7940  ;;  %7453 = vmatpush3.bf16.msra.mxu0 %v8509_v62  ;;  %6777 = vmatprep.mubr.msk.f32.mxu0 %vm1154_vm2, %v1472_v46 }
 0x3fe   :  { %v7943_v31 = vpop.eup %7942  ;;  %7455 = vmatprep.subr.bf16.mxu0 %v8543_v24  ;;  %v1364_v61 = vpop.xlane.xlu1 %1363  ;;  %v1474_v18 = vmul.f32 %v7941_v27, %v8943_v59 }
 0x3ff   :  { %v1367_v53 = vpop.xlane.xlu0 %1366  ;;  %7952 = vrcp.f32 %v1364_v61  ;;  %v1444_v7 = vmul.f32 %v7943_v31, %v8945_v30 }
 0x400   :  { %7954 = vrcp.f32 %v1367_v53  ;;  %6778 = vmatmul.mubr.msk.f32.gmra.mrb[30].mxu0 %vm1154_vm2, %v1474_v18 }
 0x401   :  { %v7945_v9 = vpop.eup %7944  ;;  %7457 = vmatpush3.bf16.msra.mxu0 %v8543_v24  ;;  %6796 = vmatprep.mubr.msk.f32.mxu0 %vm1154_vm2, %v1444_v7 }
 0x402   :  { %v7947_v62 = vpop.eup %7946  ;;  %v1446_v60 = vmul.f32 %v7945_v9, %v8953_v54  ;;  %7459 = vmatprep.subr.bf16.mxu0 %v8464_v12  ;;  %v1370_v44 = vpop.xlane.xlu1 %1369 }
 0x403   :  { %v1397_v38 = vpop.xlane.xlu0 %1396  ;;  %7956 = vrcp.f32 %v1370_v44  ;;  %v1448_v59 = vmul.f32 %v7947_v62, %v8955_v51 }
 0x404   :  { %7958 = vrcp.f32 %v1397_v38  ;;  %6797 = vmatmul.mubr.msk.f32.vlgmr.msra.gmra.mrb[24].mxu0 %vm1154_vm2, %v1446_v60 }
 0x405   :  { %v7949_v30 = vpop.eup %7948  ;;  %7461 = vmatpush3.bf16.msra.mxu0 %v8464_v12  ;;  %6799 = vmatprep.mubr.msk.f32.mxu0 %vm1154_vm2, %v1448_v59 }
 0x406   :  { %v7951_v24 = vpop.eup %7950  ;;  %7463 = vmatprep.subr.bf16.mxu0 %v8489_v32  ;;  %v1400_v45 = vpop.xlane.xlu1 %1399  ;;  %v1450_v50 = vmul.f32 %v7949_v30, %v8963_v17 }
 0x407   :  { %v1403_v54 = vpop.xlane.xlu0 %1402  ;;  %7960 = vrcp.f32 %v1400_v45  ;;  %v1452_v15 = vmul.f32 %v7951_v24, %v8965_v58 }
 0x408   :  { %7962 = vrcp.f32 %v1403_v54  ;;  %6800 = vmatmul.mubr.msk.f32.gmra.mrb[26].mxu0 %vm1154_vm2, %v1450_v50 }
 0x409   :  { %v7953_v51 = vpop.eup %7952  ;;  %7465 = vmatpush3.bf16.msra.mxu0 %v8489_v32  ;;  %6802 = vmatprep.mubr.msk.f32.mxu0 %vm1154_vm2, %v1452_v15 }
 0x40a   :  { %v7955_v12 = vpop.eup %7954  ;;  %7467 = vmatprep.subr.bf16.mxu0 %v8511_v1  ;;  %v1406_v20 = vpop.xlane.xlu1 %1405  ;;  %v1454_v33 = vmul.f32 %v7953_v51, %v8973_v48  ;;  %v5936_v51 = vld [vmem:[%s10231_s5 + $0x57] ss:$0 sm:$0xff] }
 0x40b   :  { %v1409_v10 = vpop.xlane.xlu0 %1408  ;;  %7964 = vrcp.f32 %v1406_v20  ;;  %v1456_v17 = vmul.f32 %v7955_v12, %v8975_v11 }
 0x40c   :  { %7966 = vrcp.f32 %v1409_v10  ;;  %6803 = vmatmul.mubr.msk.f32.gmra.mrb[28].mxu0 %vm1154_vm2, %v1454_v33 }
 0x40d   :  { %v7957_v58 = vpop.eup %7956  ;;  %7469 = vmatpush3.bf16.msra.mxu0 %v8511_v1  ;;  %6805 = vmatprep.mubr.msk.f32.mxu0 %vm1154_vm2, %v1456_v17 }
 0x40e   :  { %v7959_v32 = vpop.eup %7958  ;;  %7471 = vmatprep.subr.bf16.mxu0 %v8545_v25  ;;  %v1412_v63 = vpop.xlane.xlu1 %1411  ;;  %v1458_v6 = vmul.f32 %v7957_v58, %v8983_v8 }
 0x40f   :  { %v1415_v49 = vpop.xlane.xlu0 %1414  ;;  %7968 = vrcp.f32 %v1412_v63  ;;  %v1476_v48 = vmul.f32 %v7959_v32, %v8985_v34 }
 0x410   :  { %7970 = vrcp.f32 %v1415_v49  ;;  %6806 = vmatmul.mubr.msk.f32.gmra.mrb[30].mxu0 %vm1154_vm2, %v1458_v6 }
 0x411   :  { %v7961_v11 = vpop.eup %7960  ;;  %7473 = vmatpush3.bf16.msra.mxu0 %v8545_v25  ;;  %6824 = vmatprep.mubr.msk.f32.mxu0 %vm1154_vm2, %v1476_v48 }
 0x412   :  { %v7963_v1 = vpop.eup %7962  ;;  %v1478_v3 = vmul.f32 %v7961_v11, %v8993_v56  ;;  %7475 = vmatprep.subr.bf16.mxu0 %v8480_v23  ;;  %v1418_v2 = vpop.xlane.xlu1 %1417 }
 0x413   :  { %v1421_v26 = vpop.xlane.xlu0 %1420  ;;  %7972 = vrcp.f32 %v1418_v2  ;;  %v1480_v8 = vmul.f32 %v7963_v1, %v8995_v13 }
 0x414   :  { %7974 = vrcp.f32 %v1421_v26  ;;  %6825 = vmatmul.mubr.msk.f32.vlgmr.msra.gmra.mrb[24].mxu0 %vm1154_vm2, %v1478_v3 }
 0x415   :  { %v7965_v34 = vpop.eup %7964  ;;  %7477 = vmatpush3.bf16.msra.mxu0 %v8480_v23  ;;  %6827 = vmatprep.mubr.msk.f32.mxu0 %vm1154_vm2, %v1480_v8 }
 0x416   :  { %v7967_v25 = vpop.eup %7966  ;;  %7479 = vmatprep.subr.bf16.mxu0 %v8494_v40  ;;  %v1424_v21 = vpop.xlane.xlu1 %1423  ;;  %v1482_v46 = vmul.f32 %v7965_v34, %v9003_v19 }
 0x417   :  { %v1427_v56 = vpop.xlane.xlu0 %1426  ;;  %7976 = vrcp.f32 %v1424_v21  ;;  %v1484_v27 = vmul.f32 %v7967_v25, %v9005_v29 }
 0x418   :  { %7978 = vrcp.f32 %v1427_v56  ;;  %6828 = vmatmul.mubr.msk.f32.gmra.mrb[26].mxu0 %vm1154_vm2, %v1482_v46  ;;  %v10260_v56 = vld [vmem:[#allocation2_spill] sm:$0xff] }
 0x419   :  { %v7969_v13 = vpop.eup %7968  ;;  %7481 = vmatpush3.bf16.msra.mxu0 %v8494_v40  ;;  %6830 = vmatprep.mubr.msk.f32.mxu0 %vm1154_vm2, %v1484_v27 }
 0x41a   :  { %v7971_v23 = vpop.eup %7970  ;;  %7483 = vmatprep.subr.bf16.mxu0 %v8519_v5  ;;  %v1430_v31 = vpop.xlane.xlu1 %1429  ;;  %v1486_v53 = vmul.f32 %v7969_v13, %v9013_v36 }
 0x41b   :  { %v1433_v61 = vpop.xlane.xlu0 %1432  ;;  %7980 = vrcp.f32 %v1430_v31  ;;  %v1488_v19 = vmul.f32 %v7971_v23, %v9015_v16  ;;  %v10261_v31 = vld [vmem:[#allocation3_spill] sm:$0xff] }
 0x41c   :  { %7982 = vrcp.f32 %v1433_v61  ;;  %6831 = vmatmul.mubr.msk.f32.gmra.mrb[28].mxu0 %vm1154_vm2, %v1486_v53  ;;  %v10262_v53 = vld [vmem:[#allocation4_spill] sm:$0xff] }
 0x41d   :  { %v7973_v29 = vpop.eup %7972  ;;  %7485 = vmatpush3.bf16.msra.mxu0 %v8519_v5  ;;  %6833 = vmatprep.mubr.msk.f32.mxu0 %vm1154_vm2, %v1488_v19 }
 0x41e   :  { %v7975_v40 = vpop.eup %7974  ;;  %7487 = vmatprep.subr.bf16.mxu0 %v8547_v28  ;;  %v1436_v18 = vpop.xlane.xlu1 %1435  ;;  %v1490_v9 = vmul.f32 %v7973_v29, %v9023_v4 }
 0x41f   :  { %v1439_v7 = vpop.xlane.xlu0 %1438  ;;  %7984 = vrcp.f32 %v1436_v18  ;;  %v1492_v36 = vmul.f32 %v7975_v40, %v9025_v39 }
 0x420   :  { %7986 = vrcp.f32 %v1439_v7  ;;  %6834 = vmatmul.mubr.msk.f32.gmra.mrb[30].mxu0 %vm1154_vm2, %v1490_v9 }
 0x421   :  { %v7977_v16 = vpop.eup %7976  ;;  %7489 = vmatpush3.bf16.msra.mxu0 %v8547_v28  ;;  %6852 = vmatprep.mubr.msk.f32.mxu0 %vm1154_vm2, %v1492_v36 }
 0x422   :  { %v7979_v5 = vpop.eup %7978  ;;  %v1494_v62 = vmul.f32 %v7977_v16, %v9032_v14  ;;  %v1442_v60 = vpop.xlane.xlu1 %1441 }
 0x423   :  { %7988 = vrcp.f32 %v1442_v60  ;;  %v1496_v44 = vmul.f32 %v7979_v5, %v9034_v57 }
 0x424   :  { %6853 = vmatmul.mubr.msk.f32.vlgmr.msra.gmra.mrb[24].mxu0 %vm1154_vm2, %v1494_v62 }
 0x425   :  { %v7981_v4 = vpop.eup %7980  ;;  %6855 = vmatprep.mubr.msk.f32.mxu0 %vm1154_vm2, %v1496_v44 }
 0x426   :  { %v7983_v39 = vpop.eup %7982  ;;  %v1498_v38 = vmul.f32 %v7981_v4, %v9040_v22 }
 0x427   :  { %v1500_v59 = vmul.f32 %v7983_v39, %v9042_v55 }
 0x428   :  { %6856 = vmatmul.mubr.msk.f32.gmra.mrb[26].mxu0 %vm1154_vm2, %v1498_v38 }
 0x429   :  { %v7985_v28 = vpop.eup %7984  ;;  %6858 = vmatprep.mubr.msk.f32.mxu0 %vm1154_vm2, %v1500_v59 }
 0x42a   :  { %v7987_v14 = vpop.eup %7986  ;;  %v1502_v30 = vmul.f32 %v7985_v28, %v9048_v52 }
 0x42b   :  { %v1504_v57 = vmul.f32 %v7987_v14, %v9050_v42 }
 0x42c   :  { %6859 = vmatmul.mubr.msk.f32.gmra.mrb[28].mxu0 %vm1154_vm2, %v1502_v30 }
 0x42d   :  { %v7989_v24 = vpop.eup %7988  ;;  %6861 = vmatprep.mubr.msk.f32.mxu0 %vm1154_vm2, %v1504_v57 }
 0x42e   :  { %v1506_v45 = vmul.f32 %v7989_v24, %v9056_v0 }
 0x430   :  { %6862 = vmatmul.mubr.msk.f32.gmra.mrb[30].mxu0 %vm1154_vm2, %v1506_v45 }
 0x4f7   :  { %v6854_v22 = vpop.f32.mrb[24].mxu0 }
 0x4f8   :  { %v2024_v55 = vpop.f32.mrb[25].mxu0 }
 0x4f9   :  { %6872 = vmatprep.mubr.msk.f32.mxu1 %vm59_vm0, %v2024_v55 }
 0x4fa   :  { %6873 = vmatmul.mubr.msk.f32.vlgmr.msra.gmra.mrb[40].mxu1 %vm59_vm0, %v6854_v22 }
 0x4fb   :  { %v6857_v54 = vpop.f32.mrb[26].mxu0 }
 0x4fc   :  { %v2034_v50 = vpop.f32.mrb[27].mxu0 }
 0x4fd   :  { %6875 = vmatprep.mubr.msk.f32.mxu1 %vm59_vm0, %v2034_v50 }
 0x4fe   :  { %6876 = vmatmul.mubr.msk.f32.gmra.mrb[42].mxu1 %vm59_vm0, %v6857_v54 }
 0x4ff   :  { %v6860_v52 = vpop.f32.mrb[28].mxu0 }
 0x500   :  { %v2044_v42 = vpop.f32.mrb[29].mxu0 }
 0x501   :  { %6878 = vmatprep.mubr.msk.f32.mxu1 %vm59_vm0, %v2044_v42 }
 0x502   :  { %6879 = vmatmul.mubr.msk.f32.gmra.mrb[44].mxu1 %vm59_vm0, %v6860_v52 }
 0x503   :  { %v6863_v0 = vpop.f32.mrb[30].mxu0 }
 0x504   :  { %v2054_v15 = vpop.f32.mrb[31].mxu0 }
 0x505   :  { %6881 = vmatprep.mubr.msk.f32.mxu1 %vm59_vm0, %v2054_v15 }
 0x506   :  { %6882 = vmatmul.mubr.msk.f32.gmra.mrb[46].mxu1 %vm59_vm0, %v6863_v0 }
 0x5cd   :  { %v6874_v12 = vpop.f32.mrb[40].mxu1 }
 0x5ce   :  { %v2177_v20 = vadd.f32 %v6874_v12, %v5936_v51  ;;  %v2171_v10 = vpop.f32.mrb[41].mxu1 }
 0x5cf   :  { %v2172_v33 = vadd.f32 %v5936_v51, %v2171_v10 }
 0x5d0   :  { %v2211_v17 = vadd.f32 %v2177_v20, %v8273_v37 }
 0x5d1   :  { %v6877_v58 = vpop.f32.mrb[42].mxu1  ;;  %v2210_v32 = vadd.f32 %v2172_v33, %v8268_v35 }
 0x5d2   :  { %v2187_v63 = vadd.f32 %v6877_v58, %v5936_v51  ;;  %v2181_v49 = vpop.f32.mrb[43].mxu1  ;;  %v2221_v6 = vsel %vm59_vm0, %v2211_v17, 0.0 }
 0x5d3   :  { %v2182_v48 = vadd.f32 %v5936_v51, %v2181_v49  ;;  %2222 = vadd.xlane.f32.xlu1 %v2221_v6  ;;  %v2218_v11 = vsel %vm59_vm0, %v2210_v32, 0.0 }
 0x5d4   :  { %2219 = vadd.xlane.f32.xlu0 %v2218_v11  ;;  %v2213_v1 = vadd.f32 %v2187_v63, %v8282_v41  ;;  %v2405_v11 = vld [vmem:[%s10233_s3] sm:$0xff] }
 0x5d5   :  { %v6880_v3 = vpop.f32.mrb[44].mxu1  ;;  %v2212_v2 = vadd.f32 %v2182_v48, %v8288_v43 }
 0x5d6   :  { %v2197_v26 = vadd.f32 %v6880_v3, %v5936_v51  ;;  %v2191_v8 = vpop.f32.mrb[45].mxu1  ;;  %v2227_v37 = vsel %vm59_vm0, %v2213_v1, 0.0 }
 0x5d7   :  { %v2192_v34 = vadd.f32 %v5936_v51, %v2191_v8  ;;  %2228 = vadd.xlane.f32.xlu1 %v2227_v37  ;;  %v2224_v35 = vsel %vm59_vm0, %v2212_v2, 0.0  ;;  %v2551_v37 = vld [vmem:[%s10234_s4] sm:$0xff] }
 0x5d8   :  { %2225 = vadd.xlane.f32.xlu0 %v2224_v35  ;;  %v2215_v25 = vadd.f32 %v2197_v26, %v8300_v47  ;;  %v2408_v26 = vld [vmem:[%s10233_s3 + $0x18] sm:$0xff] }
 0x5d9   :  { %v6883_v21 = vpop.f32.mrb[46].mxu1  ;;  %v2214_v46 = vadd.f32 %v2192_v34, %v10260_v56  ;;  %v2552_v34 = vld [vmem:[%s10234_s4 + $0x8] sm:$0xff] }
 0x5da   :  { %v2207_v27 = vadd.f32 %v6883_v21, %v5936_v51  ;;  %v2201_v13 = vpop.f32.mrb[47].mxu1  ;;  %v2233_v41 = vsel %vm59_vm0, %v2215_v25, 0.0  ;;  %v9244_v35 = vpack.c.bf16 %v2552_v34, %v2551_v37 }
 0x5db   :  { %v2202_v23 = vadd.f32 %v5936_v51, %v2201_v13  ;;  %2234 = vadd.xlane.f32.xlu1 %v2233_v41  ;;  %v2230_v43 = vsel %vm59_vm0, %v2214_v46, 0.0 }
 0x5dc   :  { %2231 = vadd.xlane.f32.xlu0 %v2230_v43  ;;  %v2217_v61 = vadd.f32 %v2207_v27, %v10261_v31 }
 0x5dd   :  { %v2216_v19 = vadd.f32 %v2202_v23, %v10262_v53 }
 0x5de   :  { %v2239_v29 = vsel %vm59_vm0, %v2217_v61, 0.0 }
 0x5df   :  { %2240 = vadd.xlane.f32.xlu1 %v2239_v29  ;;  %v2236_v47 = vsel %vm59_vm0, %v2216_v19, 0.0 }
 0x5e0   :  { %2237 = vadd.xlane.f32.xlu0 %v2236_v47 }
 0x660   :  { %v2223_v40 = vpop.xlane.xlu1 %2222 }
 0x661   :  { %v2244_v18 = vmul.f32 0.03125, %v2223_v40  ;;  %v2220_v7 = vpop.xlane.xlu0 %2219 }
 0x662   :  { %v2243_v9 = vmul.f32 0.03125, %v2220_v7  ;;  %v9255_v7 = vld [vmem:[%s10231_s5 + $0x58] ss:$0 sm:$0xff] }
 0x663   :  { %v9186_v36 = vsub.f32 %v2211_v17, %v2244_v18 }
 0x664   :  { %v9188_v16 = vsub.f32 %v2210_v32, %v2243_v9  ;;  %v2229_v5 = vpop.xlane.xlu1 %2228 }
 0x665   :  { %v2246_v62 = vmul.f32 0.03125, %v2229_v5  ;;  %v2226_v60 = vpop.xlane.xlu0 %2225  ;;  %v2260_v44 = vmul.f32 %v9186_v36, %v9186_v36 }
 0x666   :  { %v2245_v4 = vmul.f32 0.03125, %v2226_v60  ;;  %v2259_v39 = vmul.f32 %v9188_v16, %v9188_v16 }
 0x667   :  { %v9194_v38 = vsub.f32 %v2213_v1, %v2246_v62  ;;  %v2270_v59 = vsel %vm59_vm0, %v2260_v44, 0.0  ;;  %v2406_v1 = vld [vmem:[%s10233_s3 + $0x8] sm:$0xff] }
 0x668   :  { %v9197_v28 = vsub.f32 %v2212_v2, %v2245_v4  ;;  %v2235_v14 = vpop.xlane.xlu1 %2234  ;;  %2271 = vadd.xlane.f32.xlu1 %v2270_v59  ;;  %v2267_v30 = vsel %vm59_vm0, %v2259_v39, 0.0  ;;  %v7498_v3 = vpack.c.bf16 %v2406_v1, %v2405_v11  ;;  %v2407_v2 = vld [vmem:[%s10233_s3 + $0x10] sm:$0xff]  ;;  %v9263_v59 = vmul.f32 %v9255_v7, %v9186_v36 }
 0x669   :  { %v2248_v57 = vmul.f32 0.03125, %v2235_v14  ;;  %2268 = vadd.xlane.f32.xlu0 %v2267_v30  ;;  %v2232_v24 = vpop.xlane.xlu0 %2231  ;;  %v2262_v45 = vmul.f32 %v9194_v38, %v9194_v38  ;;  %v7502_v8 = vpack.c.bf16 %v2408_v26, %v2407_v2 }
 0x66a   :  { %v2247_v22 = vmul.f32 0.03125, %v2232_v24  ;;  %v2261_v55 = vmul.f32 %v9197_v28, %v9197_v28  ;;  %7499 = vmatprep.subr.bf16.mxu1 %v7498_v3 }
 0x66b   :  { %v9204_v54 = vsub.f32 %v2215_v25, %v2248_v57  ;;  %v2276_v50 = vsel %vm59_vm0, %v2262_v45, 0.0  ;;  %7501 = vmatpush3.bf16.msra.mxu1 %v7498_v3 }
 0x66c   :  { %v9207_v52 = vsub.f32 %v2214_v46, %v2247_v22  ;;  %2277 = vadd.xlane.f32.xlu1 %v2276_v50  ;;  %v2241_v42 = vpop.xlane.xlu1 %2240  ;;  %v2273_v0 = vsel %vm59_vm0, %v2261_v55, 0.0  ;;  %7503 = vmatprep.subr.bf16.mxu1 %v7502_v8 }
 0x66d   :  { %v2250_v15 = vmul.f32 0.03125, %v2241_v42  ;;  %2274 = vadd.xlane.f32.xlu0 %v2273_v0  ;;  %v2238_v51 = vpop.xlane.xlu0 %2237  ;;  %v2264_v12 = vmul.f32 %v9204_v54, %v9204_v54 }
 0x66e   :  { %v2249_v20 = vmul.f32 0.03125, %v2238_v51  ;;  %v2263_v10 = vmul.f32 %v9207_v52, %v9207_v52 }
 0x66f   :  { %v9214_v33 = vsub.f32 %v2217_v61, %v2250_v15  ;;  %v2282_v17 = vsel %vm59_vm0, %v2264_v12, 0.0  ;;  %7505 = vmatpush3.bf16.msra.mxu1 %v7502_v8 }
 0x670   :  { %v9217_v58 = vsub.f32 %v2216_v19, %v2249_v20  ;;  %2283 = vadd.xlane.f32.xlu1 %v2282_v17  ;;  %v2279_v32 = vsel %vm59_vm0, %v2263_v10, 0.0  ;;  %7507 = vmatprep.subr.bf16.mxu1 %v9244_v35 }
 0x671   :  { %2280 = vadd.xlane.f32.xlu0 %v2279_v32  ;;  %v2266_v63 = vmul.f32 %v9214_v33, %v9214_v33 }
 0x672   :  { %v2265_v49 = vmul.f32 %v9217_v58, %v9217_v58 }
 0x673   :  { %v2288_v6 = vsel %vm59_vm0, %v2266_v63, 0.0 }
 0x674   :  { %2289 = vadd.xlane.f32.xlu1 %v2288_v6  ;;  %v2285_v48 = vsel %vm59_vm0, %v2265_v49, 0.0 }
 0x675   :  { %2286 = vadd.xlane.f32.xlu0 %v2285_v48 }
 0x6f5   :  { %v2272_v25 = vpop.xlane.xlu1 %2271 }
 0x6f6   :  { %v2292_v21 = vmul.f32 0.032258064, %v2272_v25  ;;  %v2269_v56 = vpop.xlane.xlu0 %2268 }
 0x6f7   :  { %v2291_v46 = vmul.f32 0.032258064, %v2269_v56 }
 0x6f8   :  { %7990 = vrsqrt.f32 %v2292_v21  ;;  %vm2321_vm3 = vcmp.eq.f32.partialorder %v2292_v21, inf  ;;  %vm2323_vm4 = vcmp.eq.f32.partialorder %v2292_v21, 0.0  ;;  %v2324_v62 = vand.u32 2147483648, %v2292_v21 }
 0x6f9   :  { %7992 = vrsqrt.f32 %v2291_v46  ;;  %v2278_v27 = vpop.xlane.xlu1 %2277  ;;  %vm2314_vm5 = vcmp.eq.f32.partialorder %v2291_v46, inf  ;;  %v2317_v4 = vand.u32 2147483648, %v2291_v46  ;;  %vm2316_vm6 = vcmp.eq.f32.partialorder %v2291_v46, 0.0 }
 0x6fa   :  { %v2294_v13 = vmul.f32 0.032258064, %v2278_v27  ;;  %v2275_v41 = vpop.xlane.xlu0 %2274 }
 0x6fb   :  { %v2293_v23 = vmul.f32 0.032258064, %v2275_v41 }
 0x6fc   :  { %7994 = vrsqrt.f32 %v2294_v13  ;;  %vm2335_vm7 = vcmp.eq.f32.partialorder %v2294_v13, inf  ;;  %vm2337_vm8 = vcmp.eq.f32.partialorder %v2294_v13, 0.0  ;;  %v2338_v55 = vand.u32 2147483648, %v2294_v13 }
 0x6fd   :  { %7996 = vrsqrt.f32 %v2293_v23  ;;  %v2284_v43 = vpop.xlane.xlu1 %2283  ;;  %vm2328_vm9 = vcmp.eq.f32.partialorder %v2293_v23, inf  ;;  %v2331_v15 = vand.u32 2147483648, %v2293_v23  ;;  %vm2330_vm10 = vcmp.eq.f32.partialorder %v2293_v23, 0.0 }
 0x6fe   :  { %v2296_v31 = vmul.f32 0.032258064, %v2284_v43  ;;  %v2281_v61 = vpop.xlane.xlu0 %2280  ;;  %v2304_v43 = vmul.f32 %v9255_v7, %v9188_v16  ;;  %v2554_v16 = vld [vmem:[%s10234_s4 + $0x18] sm:$0xff] }
 0x6ff   :  { %v9247_v53 = vmul.f32 0.032258064, %v2281_v61 }
 0x700   :  { %7998 = vrsqrt.f32 %v2296_v31  ;;  %vm2349_vm11 = vcmp.eq.f32.partialorder %v2296_v31, inf  ;;  %vm2351_vm12 = vcmp.eq.f32.partialorder %v2296_v31, 0.0  ;;  %v2352_v63 = vand.u32 2147483648, %v2296_v31 }
 0x701   :  { %8000 = vrsqrt.f32 %v9247_v53  ;;  %v2290_v19 = vpop.xlane.xlu1 %2289  ;;  %vm2342_vm13 = vcmp.eq.f32.partialorder %v9247_v53, inf  ;;  %v2345_v11 = vand.u32 2147483648, %v9247_v53  ;;  %vm2344_vm14 = vcmp.eq.f32.partialorder %v9247_v53, 0.0 }
 0x702   :  { %v7991_v29 = vpop.eup %7990  ;;  %v9250_v47 = vmul.f32 0.032258064, %v2290_v19  ;;  %v2287_v40 = vpop.xlane.xlu0 %2286  ;;  %v5946_v19 = vld [vmem:[%s10231_s5 + $0x59] ss:$0 sm:$0xff] }
 0x703   :  { %v7993_v18 = vpop.eup %7992  ;;  %v2320_v9 = vmul.f32 %v7991_v29, %v2292_v21  ;;  %v9257_v5 = vmul.f32 0.032258064, %v2287_v40 }
 0x704   :  { %v2313_v60 = vmul.f32 %v7993_v18, %v2291_v46  ;;  %8002 = vrsqrt.f32 %v9250_v47  ;;  %vm2363_vm15 = vcmp.eq.f32.partialorder %v9250_v47, inf  ;;  %v2366_v25 = vand.u32 2147483648, %v9250_v47  ;;  %v2553_v18 = vld [vmem:[%s10234_s4 + $0x10] sm:$0xff] }
 0x705   :  { %v2322_v44 = vsel %vm2321_vm3, %v2292_v21, %v2320_v9  ;;  %8004 = vrsqrt.f32 %v9257_v5  ;;  %vm2365_vm3 = vcmp.eq.f32.partialorder %v9250_v47, 0.0  ;;  %v2359_v27 = vand.u32 2147483648, %v9257_v5 }
 0x706   :  { %v7995_v39 = vpop.eup %7994  ;;  %v2325_v14 = vsel %vm2323_vm4, %v2324_v62, %v2322_v44  ;;  %v2315_v30 = vsel %vm2314_vm5, %v2291_v46, %v2313_v60  ;;  %vm2356_vm4 = vcmp.eq.f32.partialorder %v9257_v5, inf  ;;  %vm2358_vm5 = vcmp.eq.f32.partialorder %v9257_v5, 0.0 }
 0x707   :  { %v7997_v57 = vpop.eup %7996  ;;  %v2369_v24 = vadd.f32 1e-06, %v2325_v14  ;;  %v2318_v45 = vsel %vm2316_vm6, %v2317_v4, %v2315_v30  ;;  %v2334_v22 = vmul.f32 %v7995_v39, %v2294_v13  ;;  %v2307_v9 = vmul.f32 %v9255_v7, %v9194_v38  ;;  %v2555_v38 = vld [vmem:[%s10234_s4 + $0x20] sm:$0xff]  ;;  %v2556_v30 = vld [vmem:[%s10234_s4 + $0x28] sm:$0xff] }
 0x708   :  { %v2327_v50 = vmul.f32 %v7997_v57, %v2293_v23  ;;  %v2368_v42 = vadd.f32 1e-06, %v2318_v45  ;;  %v2306_v62 = vmul.f32 %v9255_v7, %v9197_v28  ;;  %v2309_v28 = vmul.f32 %v9255_v7, %v9204_v54 }
 0x709   :  { %8006 = vrcp.f32 %v2369_v24  ;;  %v2336_v0 = vsel %vm2335_vm7, %v2294_v13, %v2334_v22  ;;  %v2308_v24 = vmul.f32 %v9255_v7, %v9207_v52  ;;  %vm3578_vm6 = vcmask 130048  }
 0x70a   :  { %v7999_v51 = vpop.eup %7998  ;;  %v2339_v12 = vsel %vm2337_vm8, %v2338_v55, %v2336_v0  ;;  %v2329_v36 = vsel %vm2328_vm9, %v2293_v23, %v2327_v50  ;;  %8008 = vrcp.f32 %v2368_v42  ;;  %v7514_v42 = vpack.c.bf16 %v2556_v30, %v2555_v38  ;;  %v5982_v30 = vld [vmem:[%s10229_s2 + $0xf0] sm:$0xff] }
 0x70b   :  { %v8001_v20 = vpop.eup %8000  ;;  %v2332_v10 = vsel %vm2330_vm10, %v2331_v15, %v2329_v36  ;;  %v2348_v17 = vmul.f32 %v7999_v51, %v2296_v31  ;;  %v2371_v32 = vadd.f32 1e-06, %v2339_v12  ;;  %v2311_v0 = vmul.f32 %v9255_v7, %v9214_v33 }
 0x70c   :  { %v2341_v49 = vmul.f32 %v8001_v20, %v9247_v53  ;;  %v2370_v6 = vadd.f32 1e-06, %v2332_v10 }
 0x70d   :  { %v2350_v48 = vsel %vm2349_vm11, %v2296_v31, %v2348_v17  ;;  %8010 = vrcp.f32 %v2371_v32  ;;  %v5967_v32 = vld [vmem:[%s10229_s2 + $0x20] sm:$0xff] }
 0x70e   :  { %v8003_v1 = vpop.eup %8002  ;;  %v2353_v3 = vsel %vm2351_vm12, %v2352_v63, %v2350_v48  ;;  %v2343_v2 = vsel %vm2342_vm13, %v9247_v53, %v2341_v49  ;;  %8012 = vrcp.f32 %v2370_v6  ;;  %v5968_v63 = vld [vmem:[%s10229_s2 + $0x28] sm:$0xff]  ;;  %v5947_v6 = vld [vmem:[%s10235_s6] ss:$0 sm:$0xff] }
 0x70f   :  { %v8005_v26 = vpop.eup %8004  ;;  %v2346_v8 = vsel %vm2344_vm14, %v2345_v11, %v2343_v2  ;;  %v2362_v37 = vmul.f32 %v8003_v1, %v9250_v47  ;;  %v2373_v34 = vadd.f32 1e-06, %v2353_v3  ;;  %v7522_v49 = vpack.c.bf16 %v5968_v63, %v5967_v32  ;;  %v5969_v2 = vld [vmem:[%s10229_s2 + $0x30] sm:$0xff]  ;;  %v2894_v32 = vld [vmem:[%s10231_s5 + $0x40] sm:$0xff]  ;;  %v2895_v63 = vld [vmem:[%s10231_s5 + $0x48] sm:$0xff] }
 0x710   :  { %v2355_v21 = vmul.f32 %v8005_v26, %v9257_v5  ;;  %v2372_v56 = vadd.f32 1e-06, %v2346_v8  ;;  %v5970_v26 = vld [vmem:[%s10229_s2 + $0x38] sm:$0xff] }
 0x711   :  { %v2364_v46 = vsel %vm2363_vm15, %v9250_v47, %v2362_v37  ;;  %8014 = vrcp.f32 %v2373_v34 }
 0x712   :  { %v2367_v13 = vsel %vm2365_vm3, %v2366_v25, %v2364_v46  ;;  %v2357_v41 = vsel %vm2356_vm4, %v9257_v5, %v2355_v21  ;;  %8016 = vrcp.f32 %v2372_v56  ;;  %v7526_v56 = vpack.c.bf16 %v5970_v26, %v5969_v2  ;;  %v5984_v26 = vld [vmem:[%s10231_s5 + $0x5e] ss:$0 sm:$0xff] }
 0x713   :  { %v8007_v23 = vpop.eup %8006  ;;  %v2360_v31 = vsel %vm2358_vm5, %v2359_v27, %v2357_v41  ;;  %v2375_v61 = vadd.f32 1e-06, %v2367_v13 }
 0x714   :  { %v8009_v53 = vpop.eup %8008  ;;  %v2379_v29 = vmul.f32 %v8007_v23, %v9263_v59  ;;  %v2374_v47 = vadd.f32 1e-06, %v2360_v31  ;;  %v7510_v59 = vpack.c.bf16 %v2554_v16, %v2553_v18 }
 0x715   :  { %v2377_v40 = vmul.f32 %v8009_v53, %v2304_v43  ;;  %8018 = vrcp.f32 %v2375_v61 }
 0x716   :  { %8020 = vrcp.f32 %v2374_v47  ;;  %v9298_v4 = vadd.f32 %v5946_v19, %v2379_v29 }
 0x717   :  { %v8011_v5 = vpop.eup %8010  ;;  %v9296_v60 = vadd.f32 %v5946_v19, %v2377_v40 }
 0x718   :  { %v8013_v44 = vpop.eup %8012  ;;  %v2383_v39 = vmul.f32 %v8011_v5, %v2307_v9  ;;  %v2887_v9 = vld [vmem:[%s10230_s0 + $0x40] sm:$0xff]  ;;  %v2888_v5 = vld [vmem:[%s10230_s0 + $0x48] sm:$0xff] }
 0x719   :  { %6892 = vmatprep.mubr.msk.f32.mxu1 %vm59_vm0, %v9296_v60  ;;  %v2381_v14 = vmul.f32 %v8013_v44, %v2306_v62  ;;  %v5980_v62 = vld [vmem:[%s10229_s2 + $0xe0] sm:$0xff]  ;;  %v5981_v44 = vld [vmem:[%s10229_s2 + $0xe8] sm:$0xff] }
 0x71a   :  { %6893 = vmatmul.mubr.msk.f32.vlgmr.msra.gmra.mrb[48].mxu1 %vm59_vm0, %v9298_v4  ;;  %v9317_v55 = vadd.f32 %v5946_v19, %v2383_v39  ;;  %v7538_v39 = vpack.c.bf16 %v5981_v44, %v5980_v62 }
 0x71b   :  { %v8015_v57 = vpop.eup %8014  ;;  %v9314_v45 = vadd.f32 %v5946_v19, %v2381_v14  ;;  %7509 = vmatpush3.bf16.msra.mxu1 %v9244_v35  ;;  %v2310_v35 = vmul.f32 %v9255_v7, %v9217_v58  ;;  %v2557_v58 = vld [vmem:[%s10234_s4 + $0x30] sm:$0xff]  ;;  %v2558_v7 = vld [vmem:[%s10234_s4 + $0x38] sm:$0xff]  ;;  %v5974_v14 = vld [vmem:[%s10229_s2 + $0xc8] sm:$0xff] }
 0x71c   :  { %v8017_v22 = vpop.eup %8016  ;;  %v2387_v50 = vmul.f32 %v8015_v57, %v2309_v28  ;;  %7511 = vmatprep.subr.bf16.mxu1 %v7510_v59  ;;  %v7518_v17 = vpack.c.bf16 %v2558_v7, %v2557_v58  ;;  %7539 = vmatprep.subr.bf16.mxu0 %v7538_v39  ;;  %v5983_v28 = vld [vmem:[%s10229_s2 + $0xf8] sm:$0xff]  ;;  %v5975_v57 = vld [vmem:[%s10229_s2 + $0xd0] sm:$0xff] }
 0x71d   :  { %6895 = vmatprep.mubr.msk.f32.mxu1 %vm59_vm0, %v9314_v45  ;;  %v2385_v54 = vmul.f32 %v8017_v22, %v2308_v24  ;;  %7541 = vmatpush3.bf16.msra.mxu0 %v7538_v39  ;;  %v7542_v24 = vpack.c.bf16 %v5983_v28, %v5982_v30  ;;  %v5976_v22 = vld [vmem:[%s10229_s2 + $0xd8] sm:$0xff] }
 0x71e   :  { %6896 = vmatmul.mubr.msk.f32.gmra.mrb[50].mxu1 %vm59_vm0, %v9317_v55  ;;  %v9329_v12 = vadd.f32 %v5946_v19, %v2387_v50  ;;  %v7534_v50 = vpack.c.bf16 %v5976_v22, %v5975_v57 }
 0x71f   :  { %v8019_v52 = vpop.eup %8018  ;;  %v9327_v15 = vadd.f32 %v5946_v19, %v2385_v54  ;;  %7513 = vmatpush3.bf16.msra.mxu1 %v7510_v59  ;;  %v5973_v59 = vld [vmem:[%s10229_s2 + $0xc0] sm:$0xff]  ;;  %7543 = vmatprep.subr.bf16.mxu0 %v7542_v24  ;;  %v5988_v54 = vld [vmem:[%s10229_s2 + $0x108] sm:$0xff] }
 0x720   :  { %v8021_v51 = vpop.eup %8020  ;;  %v2391_v36 = vmul.f32 %v8019_v52, %v2311_v0  ;;  %7515 = vmatprep.subr.bf16.mxu1 %v7514_v42  ;;  %v7530_v38 = vpack.c.bf16 %v5974_v14, %v5973_v59  ;;  %v10266_v59 = vld [vmem:[#allocation8_spill] sm:$0xff] }
 0x721   :  { %6898 = vmatprep.mubr.msk.f32.mxu1 %vm59_vm0, %v9327_v15  ;;  %v2389_v20 = vmul.f32 %v8021_v51, %v2310_v35  ;;  %7545 = vmatpush3.bf16.msra.mxu0 %v7542_v24 }
 0x722   :  { %6899 = vmatmul.mubr.msk.f32.gmra.mrb[52].mxu1 %vm59_vm0, %v9329_v12  ;;  %v9337_v10 = vadd.f32 %v5946_v19, %v2391_v36 }
 0x723   :  { %v9335_v33 = vadd.f32 %v5946_v19, %v2389_v20  ;;  %7517 = vmatpush3.bf16.msra.mxu1 %v7514_v42  ;;  %v5987_v42 = vld [vmem:[%s10229_s2 + $0x100] sm:$0xff] }
 0x724   :  { %7519 = vmatprep.subr.bf16.mxu1 %v7518_v17  ;;  %v7546_v0 = vpack.c.bf16 %v5988_v54, %v5987_v42 }
 0x725   :  { %6901 = vmatprep.mubr.msk.f32.mxu1 %vm59_vm0, %v9335_v33 }
 0x726   :  { %6902 = vmatmul.mubr.msk.f32.gmra.mrb[54].mxu1 %vm59_vm0, %v9337_v10 }
 0x727   :  { %7521 = vmatpush3.bf16.msra.mxu1 %v7518_v17 }
 0x728   :  { %7523 = vmatprep.subr.bf16.mxu1 %v7522_v49 }
 0x7ed   :  { %v6894_v48 = vpop.f32.mrb[48].mxu1 }
 0x7ee   :  { %v2510_v11 = vadd.f32 %v6894_v48, %v5947_v6  ;;  %v2504_v1 = vpop.f32.mrb[49].mxu1  ;;  %v5990_v48 = vld [vmem:[%s10229_s2 + $0x118] sm:$0xff] }
 0x7ef   :  { %v2505_v3 = vadd.f32 %v5947_v6, %v2504_v1 }
 0x7f0   :  { %v2544_v34 = vmax.f32 %v2510_v11, 0.0 }
 0x7f1   :  { %v2543_v8 = vmax.f32 %v2505_v3, 0.0  ;;  %v6897_v37 = vpop.f32.mrb[50].mxu1 }
 0x7f2   :  { %v2520_v25 = vadd.f32 %v6897_v37, %v5947_v6  ;;  %v2514_v21 = vpop.f32.mrb[51].mxu1 }
 0x7f3   :  { %v2515_v46 = vadd.f32 %v5947_v6, %v2514_v21  ;;  %6920 = vmatprep.mubr.msk.f32.mxu1 %vm1154_vm2, %v2543_v8  ;;  %v5977_v8 = vld [vmem:[%s10231_s5 + $0x5d] ss:$0 sm:$0xff] }
 0x7f4   :  { %6921 = vmatmul.mubr.msk.f32.vlgmr.msra.gmra.mrb[56].mxu1 %vm1154_vm2, %v2544_v34  ;;  %v2546_v41 = vmax.f32 %v2520_v25, 0.0 }
 0x7f5   :  { %v2545_v27 = vmax.f32 %v2515_v46, 0.0  ;;  %7525 = vmatpush3.bf16.msra.mxu1 %v7522_v49  ;;  %v6900_v13 = vpop.f32.mrb[52].mxu1 }
 0x7f6   :  { %v2530_v23 = vadd.f32 %v6900_v13, %v5947_v6  ;;  %v2524_v43 = vpop.f32.mrb[53].mxu1  ;;  %7527 = vmatprep.subr.bf16.mxu1 %v7526_v56 }
 0x7f7   :  { %v2525_v31 = vadd.f32 %v5947_v6, %v2524_v43  ;;  %6923 = vmatprep.mubr.msk.f32.mxu1 %vm1154_vm2, %v2545_v27 }
 0x7f8   :  { %6924 = vmatmul.mubr.msk.f32.gmra.mrb[58].mxu1 %vm1154_vm2, %v2546_v41  ;;  %v2548_v19 = vmax.f32 %v2530_v23, 0.0 }
 0x7f9   :  { %v2547_v61 = vmax.f32 %v2525_v31, 0.0  ;;  %v6903_v53 = vpop.f32.mrb[54].mxu1  ;;  %7529 = vmatpush3.bf16.msra.mxu1 %v7526_v56  ;;  %v36_v31 = vld [vmem:[%s10232_s1 + $0x48] sm:$0xff] }
 0x7fa   :  { %v2540_v29 = vadd.f32 %v6903_v53, %v5947_v6  ;;  %v2534_v47 = vpop.f32.mrb[55].mxu1  ;;  %7531 = vmatprep.subr.bf16.mxu1 %v7530_v38  ;;  %v10264_v53 = vld [vmem:[#allocation5_spill] sm:$0xff] }
 0x7fb   :  { %v2535_v40 = vadd.f32 %v5947_v6, %v2534_v47  ;;  %6926 = vmatprep.mubr.msk.f32.mxu1 %vm1154_vm2, %v2547_v61  ;;  %v5989_v6 = vld [vmem:[%s10229_s2 + $0x110] sm:$0xff]  ;;  %v5991_v61 = vld [vmem:[%s10231_s5 + $0x5f] ss:$0 sm:$0xff] }
 0x7fc   :  { %6927 = vmatmul.mubr.msk.f32.gmra.mrb[60].mxu1 %vm1154_vm2, %v2548_v19  ;;  %v2550_v16 = vmax.f32 %v2540_v29, 0.0  ;;  %v7550_v2 = vpack.c.bf16 %v5990_v48, %v5989_v6  ;;  %v10265_v29 = vld [vmem:[#allocation6_spill] sm:$0xff]  ;;  %v38_v48 = vld [vmem:[%s10232_s1 + $0x58] sm:$0xff] }
 0x7fd   :  { %v2549_v18 = vmax.f32 %v2535_v40, 0.0 }
 0x7ff   :  { %6929 = vmatprep.mubr.msk.f32.mxu1 %vm1154_vm2, %v2549_v18 }
 0x800   :  { %6930 = vmatmul.mubr.msk.f32.gmra.mrb[62].mxu1 %vm1154_vm2, %v2550_v16 }
 0x801   :  { %6940 = vmatprep.mubr.msk.f32.mxu1 %vm59_vm0, %v2887_v9 }
 0x804   :  { %6941 = vmatmul.mubr.msk.f32.vlgmr.msra.gmra.mrb[64].mxu1 %vm59_vm0, %v2888_v5 }
 0x805   :  { %7533 = vmatpush3.bf16.msra.mxu1 %v7530_v38  ;;  %v10267_v38 = vld [vmem:[#allocation9_spill] sm:$0xff] }
 0x806   :  { %7535 = vmatprep.subr.bf16.mxu1 %v7534_v50 }
 0x809   :  { %7537 = vmatpush3.bf16.msra.mxu1 %v7534_v50 }
 0x80a   :  { %7547 = vmatprep.subr.bf16.mxu1 %v7546_v0 }
 0x8c7   :  { %v9410_v52 = vpop.f32.mrb[56].mxu1 }
 0x8c8   :  { %v9412_v35 = vpop.f32.mrb[57].mxu1 }
 0x8cb   :  { %v9414_v51 = vpop.f32.mrb[58].mxu1 }
 0x8cc   :  { %v9416_v36 = vpop.f32.mrb[59].mxu1 }
 0x8cf   :  { %v9418_v20 = vpop.f32.mrb[60].mxu1 }
 0x8d0   :  { %v9420_v58 = vpop.f32.mrb[61].mxu1 }
 0x8d3   :  { %v9422_v7 = vpop.f32.mrb[62].mxu1 }
 0x8d4   :  { %v9424_v17 = vpop.f32.mrb[63].mxu1 }
 0x8d7   :  { %v6942_v49 = vpop.f32.mrb[64].mxu1 }
 0x8d8   :  { %v2968_v11 = vpop.f32.mrb[65].mxu1  ;;  %v9440_v3 = vadd.f32 %v6942_v49, %v2895_v63 }
 0x8d9   :  { %v9438_v1 = vadd.f32 %v2968_v11, %v2894_v32  ;;  %v37_v11 = vld [vmem:[%s10232_s1 + $0x50] sm:$0xff] }
 0x8db   :  { %6951 = vmatprep.mubr.msk.f32.mxu1 %vm59_vm0, %v9438_v1  ;;  %6962 = vmatprep.mubr.msk.f32.mxu0 %vm59_vm0, %v9438_v1 }
 0x8dc   :  { %6952 = vmatmul.mubr.msk.f32.vlgmr.msra.gmra.mrb[66].mxu1 %vm59_vm0, %v9440_v3  ;;  %6963 = vmatmul.mubr.msk.f32.vlgmr.msra.gmra.mrb[32].mxu0 %vm59_vm0, %v9440_v3 }
 0x8dd   :  { %7549 = vmatpush3.bf16.msra.mxu1 %v7546_v0  ;;  %6973 = vmatprep.mubr.msk.f32.mxu1 %vm59_vm0, %v9438_v1 }
 0x8de   :  { %7551 = vmatprep.subr.bf16.mxu1 %v7550_v2 }
 0x8e1   :  { %7553 = vmatpush3.bf16.msra.mxu1 %v7550_v2 }
 0x8e4   :  { %6974 = vmatmul.mubr.msk.f32.vlgmr.msra.gmra.mrb[68].mxu1 %vm59_vm0, %v9440_v3 }
 0x9af   :  { %v6953_v37 = vpop.f32.mrb[66].mxu1  ;;  %v6964_v34 = vpop.f32.mrb[32].mxu0 }
 0x9b0   :  { %v3152_v25 = vadd.f32 %v6964_v34, %v5984_v26  ;;  %v3059_v21 = vpop.f32.mrb[67].mxu1  ;;  %v3146_v56 = vpop.f32.mrb[33].mxu0  ;;  %v3065_v46 = vadd.f32 %v6953_v37, %v5977_v8 }
 0x9b1   :  { %v3060_v27 = vadd.f32 %v5977_v8, %v3059_v21  ;;  %v3147_v13 = vadd.f32 %v5984_v26, %v3146_v56 }
 0x9b2   :  { %v3069_v43 = vmul.f32 0.35355338, %v3065_v46 }
 0x9b3   :  { %v3068_v41 = vmul.f32 0.35355338, %v3060_v27  ;;  %v7554_v23 = vpack.c.bf16 %v3152_v25, %v3147_v13 }
 0x9b4   :  { %v3241_v9 = vmul.f32 %v3069_v43, %v10264_v53  ;;  %v3330_v5 = vmul.f32 %v3069_v43, %v10265_v29  ;;  %v3413_v49 = vmul.f32 %v3069_v43, %v10266_v59  ;;  %v3496_v6 = vmul.f32 %v3069_v43, %v10267_v38 }
 0x9b5   :  { %7556 = vmatprep.subr.msk.bf16.mxu0 %vm8370_vm1, %v7554_v23  ;;  %7562 = vmatprep.subr.msk.bf16.mxu1 %vm8370_vm1, %v7554_v23  ;;  %v3240_v19 = vmul.f32 %v3068_v41, %v10264_v53  ;;  %v3329_v47 = vmul.f32 %v3068_v41, %v10265_v29  ;;  %v3412_v50 = vmul.f32 %v3068_v41, %v10266_v59 }
 0x9b6   :  { %7559 = vmatpush3.bf16.xpose.msk.msra.mxu0 %vm8370_vm1, %v7554_v23  ;;  %7565 = vmatpush3.bf16.xpose.msk.msra.mxu1 %vm8370_vm1, %v7554_v23  ;;  %v3495_v42 = vmul.f32 %v3068_v41, %v10267_v38 }
 0x9b7   :  { %v6975_v40 = vpop.f32.mrb[68].mxu1  ;;  %6980 = vmatprep.mubr.msk.f32.mxu0 %vm59_vm0, %v3240_v19  ;;  %6987 = vmatprep.mubr.msk.f32.mxu1 %vm59_vm0, %v3329_v47 }
 0x9b8   :  { %v3237_v18 = vadd.f32 %v6975_v40, %v5991_v61  ;;  %v3231_v16 = vpop.f32.mrb[69].mxu1  ;;  %7568 = vmatprep.subr.msk.bf16.mxu0 %vm8370_vm1, %v7554_v23  ;;  %7574 = vmatprep.subr.msk.bf16.mxu1 %vm8370_vm1, %v7554_v23 }
 0x9b9   :  { %v3232_v62 = vadd.f32 %v5991_v61, %v3231_v16 }
 0x9ba   :  { %v3670_v44 = vmul.f32 %v3237_v18, %v10265_v29  ;;  %v3668_v39 = vmul.f32 %v3237_v18, %v10264_v53  ;;  %v3834_v14 = vmul.f32 %v3237_v18, %v10266_v59  ;;  %v3919_v30 = vmul.f32 %v3237_v18, %v10267_v38 }
 0x9bb   :  { %v3669_v28 = vmul.f32 %v3232_v62, %v10265_v29  ;;  %v3667_v57 = vmul.f32 %v3232_v62, %v10264_v53  ;;  %v3833_v24 = vmul.f32 %v3232_v62, %v10266_v59  ;;  %v3918_v22 = vmul.f32 %v3232_v62, %v10267_v38 }
 0x9bd   :  { %6981 = vmatmul.mubr.msk.f32.vlgmr.msra.gmra.mrb[34].mxu0 %vm59_vm0, %v3241_v9  ;;  %6988 = vmatmul.mubr.msk.f32.vlgmr.msra.gmra.mrb[70].mxu1 %vm59_vm0, %v3330_v5  ;;  %v7578_v54 = vpack.c.bf16 %v3670_v44, %v3669_v28  ;;  %v9493_v0 = vpack.c.bf16 %v3668_v39, %v3667_v57  ;;  %v9495_v32 = vpack.c.bf16 %v3834_v14, %v3833_v24 }
 0x9be   :  { %7571 = vmatpush3.bf16.xpose.msk.msra.mxu0 %vm8370_vm1, %v7554_v23  ;;  %6994 = vmatprep.mubr.msk.f32.mxu0 %vm59_vm0, %v3412_v50  ;;  %v9500_v63 = vpack.c.bf16 %v3919_v30, %v3918_v22 }
 0x9bf   :  { %7577 = vmatpush3.bf16.xpose.msk.msra.mxu1 %vm8370_vm1, %v7554_v23  ;;  %7001 = vmatprep.mubr.msk.f32.mxu1 %vm59_vm0, %v3495_v42 }
 0x9c0   :  { %7579 = vmatprep.subr.bf16.mxu0 %v7578_v54 }
 0x9c5   :  { %6995 = vmatmul.mubr.msk.f32.vlgmr.msra.gmra.mrb[36].mxu0 %vm59_vm0, %v3413_v49 }
 0x9c6   :  { %7002 = vmatmul.mubr.msk.f32.vlgmr.msra.gmra.mrb[72].mxu1 %vm59_vm0, %v3496_v6  ;;  %7581 = vmatpush3.bf16.msra.mxu0 %v7578_v54 }
 0x9c7   :  { %7583 = vmatprep.subr.bf16.mxu0 %v9493_v0 }
 0xa90   :  { %v6982_v2 = vpop.f32.mrb[34].mxu0  ;;  %v6989_v26 = vpop.f32.mrb[70].mxu1 }
 0xa91   :  { %v3409_v8 = vadd.f32 %v6989_v26, %v38_v48  ;;  %v3320_v37 = vpop.f32.mrb[35].mxu0  ;;  %v3403_v34 = vpop.f32.mrb[71].mxu1  ;;  %v3326_v21 = vadd.f32 %v6982_v2, %v38_v48 }
 0xa92   :  { %v3404_v25 = vadd.f32 %v3403_v34, %v37_v11  ;;  %v3321_v46 = vadd.f32 %v3320_v37, %v37_v11 }
 0xa93   :  { %v3588_v56 = vsel %vm3578_vm6, %v3409_v8, -inf  ;;  %v3582_v13 = vsel %vm3578_vm6, %v3326_v21, -inf }
 0xa94   :  { %3589 = vmax.xlane.f32.xlu1 %v3588_v56  ;;  %v3585_v27 = vsel %vm3578_vm6, %v3404_v25, -inf  ;;  %v3579_v23 = vsel %vm3578_vm6, %v3321_v46, -inf }
 0xa95   :  { %3586 = vmax.xlane.f32.xlu0 %v3585_v27 }
 0xa98   :  { %3583 = vmax.xlane.f32.xlu1 %v3582_v13  ;;  %v6996_v41 = vpop.f32.mrb[36].mxu0 }
 0xa99   :  { %v7003_v43 = vpop.f32.mrb[72].mxu1  ;;  %v3492_v61 = vadd.f32 %v6996_v41, %v38_v48  ;;  %v3486_v19 = vpop.f32.mrb[37].mxu0  ;;  %3580 = vmax.xlane.f32.xlu0 %v3579_v23 }
 0xa9a   :  { %v3487_v47 = vadd.f32 %v3486_v19, %v37_v11  ;;  %v3569_v40 = vpop.f32.mrb[73].mxu1  ;;  %v3575_v18 = vadd.f32 %v7003_v43, %v38_v48 }
 0xa9b   :  { %v3594_v16 = vsel %vm3578_vm6, %v3492_v61, -inf  ;;  %v3570_v9 = vadd.f32 %v3569_v40, %v37_v11  ;;  %v5956_v40 = vld [vmem:[%s10231_s5 + $0x5a] ss:$0 sm:$0xff] }
 0xa9c   :  { %3595 = vmax.xlane.f32.xlu1 %v3594_v16  ;;  %v3591_v5 = vsel %vm3578_vm6, %v3487_v47, -inf  ;;  %v3600_v62 = vsel %vm3578_vm6, %v3575_v18, -inf }
 0xa9d   :  { %3592 = vmax.xlane.f32.xlu0 %v3591_v5  ;;  %v3597_v44 = vsel %vm3578_vm6, %v3570_v9, -inf  ;;  %v2660_v5 = vadd.f32 %v9410_v52, %v5956_v40 }
 0xa9f   :  { %v9561_v52 = vadd.f32 %v2660_v5, %v9298_v4 }
 0xaa0   :  { %3601 = vmax.xlane.f32.xlu1 %v3600_v62 }
 0xaa1   :  { %3598 = vmax.xlane.f32.xlu0 %v3597_v44  ;;  %v2655_v44 = vadd.f32 %v5956_v40, %v9412_v35 }
 0xb21   :  { %v3590_v39 = vpop.xlane.xlu1 %3589 }
 0xb22   :  { %v3606_v14 = vsub.f32 %v3409_v8, %v3590_v39  ;;  %v3587_v30 = vpop.xlane.xlu0 %3586 }
 0xb23   :  { %v3605_v28 = vsub.f32 %v3404_v25, %v3587_v30 }
 0xb24   :  { %v3617_v57 = vmul.f32 1.442695, %v3606_v14 }
 0xb25   :  { %v3615_v24 = vmul.f32 1.442695, %v3605_v28  ;;  %v3584_v22 = vpop.xlane.xlu1 %3583  ;;  %v2670_v28 = vadd.f32 %v9414_v51, %v5956_v40  ;;  %v2680_v51 = vadd.f32 %v9418_v20, %v5956_v40 }
 0xb26   :  { %8022 = vpow2.f32 %v3617_v57  ;;  %v3604_v50 = vsub.f32 %v3326_v21, %v3584_v22  ;;  %v3581_v42 = vpop.xlane.xlu0 %3580  ;;  %v9567_v22 = vadd.f32 %v2655_v44, %v9296_v60 }
 0xb27   :  { %8024 = vpow2.f32 %v3615_v24  ;;  %v3603_v54 = vsub.f32 %v3321_v46, %v3581_v42  ;;  %v2665_v24 = vadd.f32 %v5956_v40, %v9416_v36  ;;  %v2704_v42 = vsel %vm59_vm0, %v9561_v52, 0.0 }
 0xb28   :  { %v3613_v49 = vmul.f32 1.442695, %v3604_v50  ;;  %v9570_v50 = vadd.f32 %v2670_v28, %v9317_v55  ;;  %v2675_v36 = vadd.f32 %v5956_v40, %v9420_v58  ;;  %v9582_v60 = vadd.f32 %v2680_v51, %v9329_v12 }
 0xb29   :  { %v3611_v6 = vmul.f32 1.442695, %v3603_v54  ;;  %v3596_v48 = vpop.xlane.xlu1 %3595  ;;  %v9576_v4 = vadd.f32 %v2665_v24, %v9314_v45  ;;  %v2701_v54 = vsel %vm59_vm0, %v9567_v22, 0.0  ;;  %v2690_v55 = vadd.f32 %v9422_v7, %v5956_v40 }
 0xb2a   :  { %8026 = vpow2.f32 %v3613_v49  ;;  %v3608_v11 = vsub.f32 %v3492_v61, %v3596_v48  ;;  %v3593_v2 = vpop.xlane.xlu0 %3592  ;;  %v2710_v20 = vsel %vm59_vm0, %v9570_v50, 0.0  ;;  %v9588_v49 = vadd.f32 %v2675_v36, %v9327_v15 }
 0xb2b   :  { %8028 = vpow2.f32 %v3611_v6  ;;  %v3607_v26 = vsub.f32 %v3487_v47, %v3593_v2  ;;  %v2685_v45 = vadd.f32 %v5956_v40, %v9424_v17  ;;  %v2707_v58 = vsel %vm59_vm0, %v9576_v4, 0.0 }
 0xb2c   :  { %v3621_v37 = vmul.f32 1.442695, %v3608_v11  ;;  %v9594_v6 = vadd.f32 %v2690_v55, %v9337_v10  ;;  %v2716_v12 = vsel %vm59_vm0, %v9582_v60, 0.0  ;;  %v2713_v15 = vsel %vm59_vm0, %v9588_v49, 0.0  ;;  %v6018_v10 = vld [vmem:[%s10229_s2 + $0x120] sm:$0xff]  ;;  %v6020_v11 = vld [vmem:[%s10229_s2 + $0x130] sm:$0xff] }
 0xb2d   :  { %v3619_v8 = vmul.f32 1.442695, %v3607_v26  ;;  %v3602_v34 = vpop.xlane.xlu1 %3601  ;;  %v9599_v7 = vadd.f32 %v2685_v45, %v9335_v33  ;;  %v6019_v33 = vld [vmem:[%s10229_s2 + $0x128] sm:$0xff]  ;;  %v6021_v26 = vld [vmem:[%s10229_s2 + $0x138] sm:$0xff] }
 0xb2e   :  { %8030 = vpow2.f32 %v3621_v37  ;;  %v3610_v25 = vsub.f32 %v3575_v18, %v3602_v34  ;;  %v3599_v56 = vpop.xlane.xlu0 %3598  ;;  %v2722_v17 = vsel %vm59_vm0, %v9594_v6, 0.0  ;;  %v7594_v2 = vpack.c.bf16 %v6019_v33, %v6018_v10 }
 0xb2f   :  { %8032 = vpow2.f32 %v3619_v8  ;;  %v3609_v27 = vsub.f32 %v3570_v9, %v3599_v56  ;;  %v2719_v48 = vsel %vm59_vm0, %v9599_v7, 0.0  ;;  %v7598_v37 = vpack.c.bf16 %v6021_v26, %v6020_v11 }
 0xb30   :  { %v9524_v21 = vpop.eup %8022  ;;  %v3625_v13 = vmul.f32 1.442695, %v3610_v25  ;;  %7595 = vmatprep.subr.bf16.mxu1 %v7594_v2 }
 0xb31   :  { %v9526_v46 = vpop.eup %8024  ;;  %v3623_v41 = vmul.f32 1.442695, %v3609_v27  ;;  %v3636_v23 = vsel %vm3578_vm6, %v9524_v21, 0.0  ;;  %7597 = vmatpush3.bf16.msra.mxu1 %v7594_v2 }
 0xb32   :  { %8034 = vpow2.f32 %v3625_v13  ;;  %3637 = vadd.xlane.f32.xlu1 %v3636_v23  ;;  %v3633_v43 = vsel %vm3578_vm6, %v9526_v46, 0.0  ;;  %7599 = vmatprep.subr.bf16.mxu1 %v7598_v37 }
 0xb33   :  { %8036 = vpow2.f32 %v3623_v41  ;;  %3634 = vadd.xlane.f32.xlu0 %v3633_v43 }
 0xb34   :  { %v9532_v61 = vpop.eup %8026 }
 0xb35   :  { %v9534_v19 = vpop.eup %8028  ;;  %v3630_v47 = vsel %vm3578_vm6, %v9532_v61, 0.0  ;;  %7601 = vmatpush3.bf16.msra.mxu1 %v7598_v37 }
 0xb36   :  { %3631 = vadd.xlane.f32.xlu1 %v3630_v47  ;;  %v3627_v18 = vsel %vm3578_vm6, %v9534_v19, 0.0 }
 0xb37   :  { %3628 = vadd.xlane.f32.xlu0 %v3627_v18 }
 0xb38   :  { %v9543_v16 = vpop.eup %8030 }
 0xb39   :  { %v9545_v9 = vpop.eup %8032  ;;  %v3642_v62 = vsel %vm3578_vm6, %v9543_v16, 0.0 }
 0xb3a   :  { %3643 = vadd.xlane.f32.xlu1 %v3642_v62  ;;  %v3639_v39 = vsel %vm3578_vm6, %v9545_v9, 0.0 }
 0xb3b   :  { %3640 = vadd.xlane.f32.xlu0 %v3639_v39 }
 0xb3c   :  { %v9553_v14 = vpop.eup %8034 }
 0xb3d   :  { %v9555_v30 = vpop.eup %8036  ;;  %v3648_v57 = vsel %vm3578_vm6, %v9553_v14, 0.0 }
 0xb3e   :  { %3649 = vadd.xlane.f32.xlu1 %v3648_v57  ;;  %v3645_v35 = vsel %vm3578_vm6, %v9555_v30, 0.0 }
 0xb3f   :  { %3646 = vadd.xlane.f32.xlu0 %v3645_v35 }
 0xb42   :  { %2705 = vadd.xlane.f32.xlu1 %v2704_v42 }
 0xb43   :  { %2702 = vadd.xlane.f32.xlu0 %v2701_v54 }
 0xb46   :  { %2711 = vadd.xlane.f32.xlu1 %v2710_v20 }
 0xb47   :  { %2708 = vadd.xlane.f32.xlu0 %v2707_v58 }
 0xb4a   :  { %2717 = vadd.xlane.f32.xlu1 %v2716_v12 }
 0xb4b   :  { %2714 = vadd.xlane.f32.xlu0 %v2713_v15 }
 0xb4e   :  { %2723 = vadd.xlane.f32.xlu1 %v2722_v17 }
 0xb4f   :  { %2720 = vadd.xlane.f32.xlu0 %v2719_v48 }
 0xbbf   :  { %v3638_v8 = vpop.xlane.xlu1 %3637 }
 0xbc0   :  { %8038 = vrcp.f32 %v3638_v8  ;;  %v3635_v34 = vpop.xlane.xlu0 %3634 }
 0xbc1   :  { %8040 = vrcp.f32 %v3635_v34 }
 0xbc3   :  { %v3632_v56 = vpop.xlane.xlu1 %3631 }
 0xbc4   :  { %v3629_v25 = vpop.xlane.xlu0 %3628 }
 0xbc5   :  { %8042 = vrcp.f32 %v3629_v25 }
 0xbc6   :  { %8044 = vrcp.f32 %v3632_v56 }
 0xbc7   :  { %v3644_v47 = vpop.xlane.xlu1 %3643 }
 0xbc8   :  { %v3641_v27 = vpop.xlane.xlu0 %3640 }
 0xbc9   :  { %8046 = vrcp.f32 %v3641_v27 }
 0xbca   :  { %v8039_v13 = vpop.eup %8038  ;;  %8048 = vrcp.f32 %v3644_v47 }
 0xbcb   :  { %v8041_v41 = vpop.eup %8040  ;;  %v3658_v43 = vmul.f32 %v8039_v13, %v9524_v21  ;;  %v3650_v44 = vpop.xlane.xlu1 %3649 }
 0xbcc   :  { %v3656_v23 = vmul.f32 %v8041_v41, %v9526_v46  ;;  %v3647_v40 = vpop.xlane.xlu0 %3646 }
 0xbcd   :  { %8050 = vrcp.f32 %v3647_v40 }
 0xbce   :  { %7008 = vmatprep.mubr.msk.f32.mxu0 %vm3578_vm6, %v3656_v23  ;;  %8052 = vrcp.f32 %v3650_v44  ;;  %v6034_v44 = vld [vmem:[%s10229_s2 + $0x160] sm:$0xff] }
 0xbcf   :  { %v8043_v18 = vpop.eup %8042  ;;  %7009 = vmatmul.mubr.msk.f32.vlgmr.msra.gmra.mrb[38].mxu0 %vm3578_vm6, %v3658_v43 }
 0xbd0   :  { %7585 = vmatpush3.bf16.msra.mxu0 %v9493_v0  ;;  %v3652_v5 = vmul.f32 %v8043_v18, %v9534_v19  ;;  %v8045_v62 = vpop.eup %8044  ;;  %v2703_v35 = vpop.xlane.xlu0 %2702 }
 0xbd1   :  { %7587 = vmatprep.subr.bf16.mxu0 %v9495_v32  ;;  %v3654_v21 = vmul.f32 %v8045_v62, %v9532_v61  ;;  %v2725_v36 = vmul.f32 0.03125, %v2703_v35 }
 0xbd2   :  { %7015 = vmatprep.mubr.msk.f32.mxu0 %vm3578_vm6, %v3652_v5 }
 0xbd3   :  { %v8047_v46 = vpop.eup %8046  ;;  %v9649_v15 = vsub.f32 %v9567_v22, %v2725_v36 }
 0xbd4   :  { %v3660_v39 = vmul.f32 %v8047_v46, %v9545_v9  ;;  %v8049_v0 = vpop.eup %8048  ;;  %v2709_v51 = vpop.xlane.xlu0 %2708 }
 0xbd5   :  { %v3662_v28 = vmul.f32 %v8049_v0, %v9543_v16  ;;  %v2706_v16 = vpop.xlane.xlu1 %2705  ;;  %v2727_v17 = vmul.f32 0.03125, %v2709_v51 }
 0xbd6   :  { %v2726_v42 = vmul.f32 0.03125, %v2706_v16 }
 0xbd7   :  { %7016 = vmatmul.mubr.msk.f32.vlgmr.msra.gmra.mrb[38].mxu0 %vm3578_vm6, %v3654_v21  ;;  %v8051_v19 = vpop.eup %8050  ;;  %v9660_v37 = vsub.f32 %v9576_v4, %v2727_v17 }
 0xbd8   :  { %7589 = vmatpush3.bf16.msra.mxu0 %v9495_v32  ;;  %7022 = vmatprep.mubr.msk.f32.mxu0 %vm3578_vm6, %v3660_v39  ;;  %v3664_v57 = vmul.f32 %v8051_v19, %v9555_v30  ;;  %v8053_v61 = vpop.eup %8052  ;;  %v9646_v55 = vsub.f32 %v9561_v52, %v2726_v42  ;;  %v2715_v45 = vpop.xlane.xlu0 %2714  ;;  %v6035_v39 = vld [vmem:[%s10229_s2 + $0x168] sm:$0xff]  ;;  %v6036_v19 = vld [vmem:[%s10229_s2 + $0x170] sm:$0xff] }
 0xbd9   :  { %7591 = vmatprep.subr.bf16.mxu0 %v9500_v63  ;;  %v3666_v9 = vmul.f32 %v8053_v61, %v9553_v14  ;;  %v2712_v30 = vpop.xlane.xlu1 %2711  ;;  %v2729_v22 = vmul.f32 0.03125, %v2715_v45  ;;  %v2743_v23 = vmul.f32 %v9660_v37, %v9660_v37  ;;  %v7610_v0 = vpack.c.bf16 %v6035_v39, %v6034_v44 }
 0xbda   :  { %v2728_v20 = vmul.f32 0.03125, %v2712_v30  ;;  %v2742_v26 = vmul.f32 %v9646_v55, %v9646_v55 }
 0xbdb   :  { %v9672_v27 = vsub.f32 %v9588_v49, %v2729_v22  ;;  %v2755_v49 = vsel %vm59_vm0, %v2743_v23, 0.0 }
 0xbdc   :  { %v9654_v11 = vsub.f32 %v9570_v50, %v2728_v20  ;;  %v2752_v56 = vsel %vm59_vm0, %v2742_v26, 0.0 }
 0xbdd   :  { %v2718_v54 = vpop.xlane.xlu1 %2717  ;;  %v2745_v18 = vmul.f32 %v9672_v27, %v9672_v27 }
 0xbde   :  { %v2730_v2 = vmul.f32 0.03125, %v2718_v54  ;;  %v2744_v4 = vmul.f32 %v9654_v11, %v9654_v11 }
 0xbdf   :  { %7023 = vmatmul.mubr.msk.f32.vlgmr.msra.gmra.mrb[38].mxu0 %vm3578_vm6, %v3662_v28  ;;  %v2761_v62 = vsel %vm59_vm0, %v2745_v18, 0.0  ;;  %v6037_v28 = vld [vmem:[%s10229_s2 + $0x178] sm:$0xff] }
 0xbe0   :  { %7593 = vmatpush3.bf16.msra.mxu0 %v9500_v63  ;;  %7029 = vmatprep.mubr.msk.f32.mxu0 %vm3578_vm6, %v3664_v57  ;;  %v6022_v63 = vld [vmem:[%s10231_s5 + $0x60] ss:$0 sm:$0xff]  ;;  %v9666_v50 = vsub.f32 %v9582_v60, %v2730_v2  ;;  %v2758_v43 = vsel %vm59_vm0, %v2744_v4, 0.0  ;;  %v7614_v57 = vpack.c.bf16 %v6037_v28, %v6036_v19 }
 0xbe1   :  { %v2724_v8 = vpop.xlane.xlu1 %2723  ;;  %7611 = vmatprep.subr.bf16.mxu0 %v7610_v0 }
 0xbe2   :  { %v2732_v25 = vmul.f32 0.03125, %v2724_v8  ;;  %v2746_v47 = vmul.f32 %v9666_v50, %v9666_v50 }
 0xbe4   :  { %v9678_v60 = vsub.f32 %v9594_v6, %v2732_v25  ;;  %v2764_v5 = vsel %vm59_vm0, %v2746_v47, 0.0 }
 0xbe6   :  { %v2748_v6 = vmul.f32 %v9678_v60, %v9678_v60 }
 0xbe7   :  { %7030 = vmatmul.mubr.msk.f32.vlgmr.msra.gmra.mrb[38].mxu0 %vm3578_vm6, %v3666_v9 }
 0xbe8   :  { %7613 = vmatpush3.bf16.msra.mxu0 %v7610_v0 }
 0xbe9   :  { %7615 = vmatprep.subr.bf16.mxu0 %v7614_v57 }
 0xbec   :  { %7617 = vmatpush3.bf16.msra.mxu0 %v7614_v57 }
 0xcba   :  { %v7031_v32 = vpop.f32.mrb[38].mxu0 }
 0xcbb   :  { %v3992_v24 = vpop.f32.mrb[39].mxu0 }
 0xcbc   :  { %7040 = vmatprep.mubr.msk.f32.mxu1 %vm59_vm0, %v3992_v24 }
 0xcbd   :  { %7041 = vmatmul.mubr.msk.f32.vlgmr.msra.gmra.mrb[74].mxu1 %vm59_vm0, %v7031_v32 }
 0xd90   :  { %v7042_v14 = vpop.f32.mrb[74].mxu1 }
 0xd91   :  { %v4091_v58 = vadd.f32 %v7042_v14, %v6022_v63  ;;  %v4085_v12 = vpop.f32.mrb[75].mxu1 }
 0xd92   :  { %v4086_v48 = vadd.f32 %v6022_v63, %v4085_v12 }
 0xd93   :  { %v4095_v10 = vadd.f32 %v4091_v58, %v9440_v3  ;;  %v2721_v3 = vpop.xlane.xlu0 %2720 }
 0xd94   :  { %v4094_v33 = vadd.f32 %v4086_v48, %v9438_v1  ;;  %v2741_v1 = vmul.f32 %v9649_v15, %v9649_v15  ;;  %v2731_v13 = vmul.f32 0.03125, %v2721_v3 }
 0xd95   :  { %v4099_v52 = vsel %vm59_vm0, %v4095_v10, 0.0 }
 0xd96   :  { %4100 = vadd.xlane.f32.xlu1 %v4099_v52  ;;  %v4096_v34 = vsel %vm59_vm0, %v4094_v33, 0.0  ;;  %v2749_v41 = vsel %vm59_vm0, %v2741_v1, 0.0  ;;  %v9684_v40 = vsub.f32 %v9599_v7, %v2731_v13  ;;  %v2770_v7 = vsel %vm59_vm0, %v2748_v6, 0.0  ;;  %v9727_v1 = vld [vmem:[%s10231_s5 + $0x5b] ss:$0 sm:$0xff] }
 0xd97   :  { %4097 = vadd.xlane.f32.xlu0 %v4096_v34 }
 0xd98   :  { %v2747_v46 = vmul.f32 %v9684_v40, %v9684_v40 }
 0xd9a   :  { %2753 = vadd.xlane.f32.xlu1 %v2752_v56  ;;  %v2767_v21 = vsel %vm59_vm0, %v2747_v46, 0.0 }
 0xd9b   :  { %2750 = vadd.xlane.f32.xlu0 %v2749_v41 }
 0xd9e   :  { %2759 = vadd.xlane.f32.xlu1 %v2758_v43  ;;  %v9735_v43 = vmul.f32 %v9727_v1, %v9646_v55 }
 0xd9f   :  { %2756 = vadd.xlane.f32.xlu0 %v2755_v49 }
 0xda2   :  { %2765 = vadd.xlane.f32.xlu1 %v2764_v5 }
 0xda3   :  { %2762 = vadd.xlane.f32.xlu0 %v2761_v62 }
 0xda6   :  { %2771 = vadd.xlane.f32.xlu1 %v2770_v7 }
 0xda7   :  { %2768 = vadd.xlane.f32.xlu0 %v2767_v21 }
 0xe23   :  { %v4101_v61 = vpop.xlane.xlu1 %4100 }
 0xe24   :  { %v4103_v9 = vmul.f32 0.03125, %v4101_v61  ;;  %v4098_v32 = vpop.xlane.xlu0 %4097 }
 0xe25   :  { %v4102_v24 = vmul.f32 0.03125, %v4098_v32 }
 0xe26   :  { %v9709_v16 = vsub.f32 %v4095_v10, %v4103_v9 }
 0xe27   :  { %v9711_v35 = vsub.f32 %v4094_v33, %v4102_v24  ;;  %v2754_v30 = vpop.xlane.xlu1 %2753 }
 0xe28   :  { %v2774_v51 = vmul.f32 0.032258064, %v2754_v30  ;;  %v2751_v42 = vpop.xlane.xlu0 %2750  ;;  %v4107_v36 = vmul.f32 %v9709_v16, %v9709_v16 }
 0xe29   :  { %v2773_v63 = vmul.f32 0.032258064, %v2751_v42  ;;  %v4106_v54 = vmul.f32 %v9711_v35, %v9711_v35 }
 0xe2a   :  { %8054 = vrsqrt.f32 %v2774_v51  ;;  %v4111_v20 = vsel %vm59_vm0, %v4107_v36, 0.0  ;;  %vm2803_vm7 = vcmp.eq.f32.partialorder %v2774_v51, inf  ;;  %vm2805_vm8 = vcmp.eq.f32.partialorder %v2774_v51, 0.0 }
 0xe2b   :  { %8056 = vrsqrt.f32 %v2773_v63  ;;  %v2760_v14 = vpop.xlane.xlu1 %2759  ;;  %v4108_v58 = vsel %vm59_vm0, %v4106_v54, 0.0  ;;  %4112 = vadd.xlane.f32.xlu1 %v4111_v20  ;;  %v2806_v56 = vand.u32 2147483648, %v2774_v51  ;;  %vm2796_vm9 = vcmp.eq.f32.partialorder %v2773_v63, inf }
 0xe2c   :  { %v2776_v45 = vmul.f32 0.032258064, %v2760_v14  ;;  %v2757_v12 = vpop.xlane.xlu0 %2756  ;;  %4109 = vadd.xlane.f32.xlu0 %v4108_v58  ;;  %v2799_v41 = vand.u32 2147483648, %v2773_v63  ;;  %vm2798_vm10 = vcmp.eq.f32.partialorder %v2773_v63, 0.0 }
 0xe2d   :  { %v2775_v17 = vmul.f32 0.032258064, %v2757_v12 }
 0xe2e   :  { %8058 = vrsqrt.f32 %v2776_v45  ;;  %vm2817_vm11 = vcmp.eq.f32.partialorder %v2776_v45, inf  ;;  %vm2819_vm12 = vcmp.eq.f32.partialorder %v2776_v45, 0.0  ;;  %v2820_v46 = vand.u32 2147483648, %v2776_v45 }
 0xe2f   :  { %8060 = vrsqrt.f32 %v2775_v17  ;;  %v2766_v48 = vpop.xlane.xlu1 %2765  ;;  %vm2810_vm13 = vcmp.eq.f32.partialorder %v2775_v17, inf  ;;  %v2813_v39 = vand.u32 2147483648, %v2775_v17  ;;  %vm2812_vm14 = vcmp.eq.f32.partialorder %v2775_v17, 0.0 }
 0xe30   :  { %v2778_v10 = vmul.f32 0.032258064, %v2766_v48  ;;  %v2763_v33 = vpop.xlane.xlu0 %2762 }
 0xe31   :  { %v9719_v2 = vmul.f32 0.032258064, %v2763_v33 }
 0xe32   :  { %8062 = vrsqrt.f32 %v2778_v10  ;;  %vm2831_vm15 = vcmp.eq.f32.partialorder %v2778_v10, inf  ;;  %vm2833_vm3 = vcmp.eq.f32.partialorder %v2778_v10, 0.0  ;;  %v2834_v32 = vand.u32 2147483648, %v2778_v10 }
 0xe33   :  { %8064 = vrsqrt.f32 %v9719_v2  ;;  %v2772_v52 = vpop.xlane.xlu1 %2771  ;;  %vm2824_vm4 = vcmp.eq.f32.partialorder %v9719_v2, inf  ;;  %v2827_v42 = vand.u32 2147483648, %v9719_v2  ;;  %vm2826_vm5 = vcmp.eq.f32.partialorder %v9719_v2, 0.0 }
 0xe34   :  { %v8055_v26 = vpop.eup %8054  ;;  %v9722_v22 = vmul.f32 0.032258064, %v2772_v52  ;;  %v2769_v8 = vpop.xlane.xlu0 %2768 }
 0xe35   :  { %v8057_v34 = vpop.eup %8056  ;;  %v2802_v3 = vmul.f32 %v8055_v26, %v2774_v51  ;;  %v9729_v25 = vmul.f32 0.032258064, %v2769_v8  ;;  %v2786_v8 = vmul.f32 %v9727_v1, %v9649_v15  ;;  %v2788_v15 = vmul.f32 %v9727_v1, %v9660_v37 }
 0xe36   :  { %v2795_v4 = vmul.f32 %v8057_v34, %v2773_v63  ;;  %8066 = vrsqrt.f32 %v9722_v22  ;;  %vm2845_vm6 = vcmp.eq.f32.partialorder %v9722_v22, inf  ;;  %v2848_v12 = vand.u32 2147483648, %v9722_v22 }
 0xe37   :  { %v2804_v13 = vsel %vm2803_vm7, %v2774_v51, %v2802_v3  ;;  %8068 = vrsqrt.f32 %v9729_v25  ;;  %vm2847_vm7 = vcmp.eq.f32.partialorder %v9722_v22, 0.0  ;;  %v2841_v33 = vand.u32 2147483648, %v9729_v25 }
 0xe38   :  { %v8059_v23 = vpop.eup %8058  ;;  %v2807_v47 = vsel %vm2805_vm8, %v2806_v56, %v2804_v13  ;;  %v2797_v49 = vsel %vm2796_vm9, %v2773_v63, %v2795_v4  ;;  %vm2838_vm8 = vcmp.eq.f32.partialorder %v9729_v25, inf  ;;  %vm2840_vm9 = vcmp.eq.f32.partialorder %v9729_v25, 0.0 }
 0xe39   :  { %v8061_v18 = vpop.eup %8060  ;;  %v2851_v5 = vadd.f32 1e-06, %v2807_v47  ;;  %v2800_v6 = vsel %vm2798_vm10, %v2799_v41, %v2797_v49  ;;  %v2816_v62 = vmul.f32 %v8059_v23, %v2776_v45  ;;  %v2790_v37 = vmul.f32 %v9727_v1, %v9672_v27 }
 0xe3a   :  { %v2809_v7 = vmul.f32 %v8061_v18, %v2775_v17  ;;  %v2850_v21 = vadd.f32 1e-06, %v2800_v6  ;;  %v2791_v6 = vmul.f32 %v9727_v1, %v9666_v50  ;;  %v6028_v50 = vld [vmem:[%s10229_s2 + $0x148] sm:$0xff] }
 0xe3b   :  { %8070 = vrcp.f32 %v2851_v5  ;;  %v2818_v44 = vsel %vm2817_vm11, %v2776_v45, %v2816_v62 }
 0xe3c   :  { %v8063_v0 = vpop.eup %8062  ;;  %v2821_v19 = vsel %vm2819_vm12, %v2820_v46, %v2818_v44  ;;  %v2811_v55 = vsel %vm2810_vm13, %v2775_v17, %v2809_v7  ;;  %8072 = vrcp.f32 %v2850_v21  ;;  %v6027_v44 = vld [vmem:[%s10229_s2 + $0x140] sm:$0xff] }
 0xe3d   :  { %v8065_v28 = vpop.eup %8064  ;;  %v2814_v57 = vsel %vm2812_vm14, %v2813_v39, %v2811_v55  ;;  %v2830_v61 = vmul.f32 %v8063_v0, %v2778_v10  ;;  %v2853_v9 = vadd.f32 1e-06, %v2821_v19  ;;  %v6029_v39 = vld [vmem:[%s10229_s2 + $0x150] sm:$0xff]  ;;  %v7602_v0 = vpack.c.bf16 %v6028_v50, %v6027_v44  ;;  %v6030_v19 = vld [vmem:[%s10229_s2 + $0x158] sm:$0xff] }
 0xe3e   :  { %v2823_v24 = vmul.f32 %v8065_v28, %v9719_v2  ;;  %v2852_v30 = vadd.f32 1e-06, %v2814_v57  ;;  %v2793_v55 = vmul.f32 %v9727_v1, %v9678_v60  ;;  %v7606_v28 = vpack.c.bf16 %v6030_v19, %v6029_v39 }
 0xe3f   :  { %v2832_v51 = vsel %vm2831_vm15, %v2778_v10, %v2830_v61  ;;  %8074 = vrcp.f32 %v2853_v9  ;;  %v2792_v61 = vmul.f32 %v9727_v1, %v9684_v40  ;;  %7603 = vmatprep.subr.bf16.mxu1 %v7602_v0  ;;  %v6047_v40 = vld [vmem:[%s10229_s2 + $0x180] sm:$0xff] }
 0xe40   :  { %v8067_v36 = vpop.eup %8066  ;;  %v2835_v63 = vsel %vm2833_vm3, %v2834_v32, %v2832_v51  ;;  %v2825_v54 = vsel %vm2824_vm4, %v9719_v2, %v2823_v24  ;;  %8076 = vrcp.f32 %v2852_v30  ;;  %7605 = vmatpush3.bf16.msra.mxu1 %v7602_v0 }
 0xe41   :  { %v8069_v14 = vpop.eup %8068  ;;  %v2828_v20 = vsel %vm2826_vm5, %v2827_v42, %v2825_v54  ;;  %v2844_v45 = vmul.f32 %v8067_v36, %v9722_v22  ;;  %v2855_v58 = vadd.f32 1e-06, %v2835_v63  ;;  %7607 = vmatprep.subr.bf16.mxu1 %v7606_v28 }
 0xe42   :  { %v2837_v17 = vmul.f32 %v8069_v14, %v9729_v25  ;;  %v2854_v48 = vadd.f32 1e-06, %v2828_v20 }
 0xe43   :  { %v2846_v10 = vsel %vm2845_vm6, %v9722_v22, %v2844_v45  ;;  %8078 = vrcp.f32 %v2855_v58  ;;  %v5966_v22 = vld [vmem:[%s10231_s5 + $0x5c] ss:$0 sm:$0xff] }
 0xe44   :  { %v2849_v2 = vsel %vm2847_vm7, %v2848_v12, %v2846_v10  ;;  %v2839_v52 = vsel %vm2838_vm8, %v9729_v25, %v2837_v17  ;;  %8080 = vrcp.f32 %v2854_v48  ;;  %v2789_v25 = vmul.f32 %v9727_v1, %v9654_v11  ;;  %7609 = vmatpush3.bf16.msra.mxu1 %v7606_v28  ;;  %v6048_v1 = vld [vmem:[%s10229_s2 + $0x188] sm:$0xff] }
 0xe45   :  { %v8071_v26 = vpop.eup %8070  ;;  %v2842_v34 = vsel %vm2840_vm9, %v2841_v33, %v2839_v52  ;;  %v2857_v3 = vadd.f32 1e-06, %v2849_v2  ;;  %v7618_v36 = vpack.c.bf16 %v6048_v1, %v6047_v40  ;;  %v9915_v1 = vld [vmem:[%s10231_s5 + $0x65] ss:$0 sm:$0xff] }
 0xe46   :  { %v8073_v56 = vpop.eup %8072  ;;  %v2861_v4 = vmul.f32 %v8071_v26, %v9735_v43  ;;  %v2856_v13 = vadd.f32 1e-06, %v2842_v34 }
 0xe47   :  { %v2859_v41 = vmul.f32 %v8073_v56, %v2786_v8  ;;  %8082 = vrcp.f32 %v2857_v3  ;;  %7619 = vmatprep.subr.bf16.mxu1 %v7618_v36  ;;  %v6025_v3 = vld [vmem:[%s10231_s5 + $0x61] ss:$0 sm:$0xff] }
 0xe48   :  { %8084 = vrcp.f32 %v2856_v13  ;;  %v9764_v18 = vadd.f32 %v5966_v22, %v2861_v4  ;;  %v4122_v56 = vmul.f32 %v6025_v3, %v9709_v16  ;;  %v4121_v4 = vmul.f32 %v6025_v3, %v9711_v35 }
 0xe49   :  { %v8075_v23 = vpop.eup %8074  ;;  %v9762_v47 = vadd.f32 %v5966_v22, %v2859_v41 }
 0xe4a   :  { %v8077_v49 = vpop.eup %8076  ;;  %v2865_v5 = vmul.f32 %v8075_v23, %v2789_v25  ;;  %v6026_v25 = vld [vmem:[%s10231_s5 + $0x62] ss:$0 sm:$0xff] }
 0xe4b   :  { %7062 = vmatprep.mubr.msk.f32.mxu0 %vm59_vm0, %v9762_v47  ;;  %v2863_v43 = vmul.f32 %v8077_v49, %v2788_v15  ;;  %v6049_v15 = vld [vmem:[%s10229_s2 + $0x190] sm:$0xff]  ;;  %v6050_v49 = vld [vmem:[%s10229_s2 + $0x198] sm:$0xff] }
 0xe4c   :  { %7063 = vmatmul.mubr.msk.f32.vlgmr.msra.gmra.mrb[40].mxu0 %vm59_vm0, %v9764_v18  ;;  %v9776_v7 = vadd.f32 %v5966_v22, %v2865_v5  ;;  %v7622_v35 = vpack.c.bf16 %v6050_v49, %v6049_v15 }
 0xe4d   :  { %v8079_v11 = vpop.eup %8078  ;;  %v9774_v62 = vadd.f32 %v5966_v22, %v2863_v43 }
 0xe4e   :  { %v8081_v46 = vpop.eup %8080  ;;  %v2869_v21 = vmul.f32 %v8079_v11, %v2791_v6 }
 0xe4f   :  { %7065 = vmatprep.mubr.msk.f32.mxu0 %vm59_vm0, %v9774_v62  ;;  %v2867_v27 = vmul.f32 %v8081_v46, %v2790_v37 }
 0xe50   :  { %7066 = vmatmul.mubr.msk.f32.gmra.mrb[42].mxu0 %vm59_vm0, %v9776_v7  ;;  %v9800_v24 = vadd.f32 %v5966_v22, %v2869_v21 }
 0xe51   :  { %v8083_v57 = vpop.eup %8082  ;;  %v9798_v9 = vadd.f32 %v5966_v22, %v2867_v27 }
 0xe52   :  { %v8085_v32 = vpop.eup %8084  ;;  %v2873_v30 = vmul.f32 %v8083_v57, %v2793_v55 }
 0xe53   :  { %7068 = vmatprep.mubr.msk.f32.mxu0 %vm59_vm0, %v9798_v9  ;;  %v2871_v60 = vmul.f32 %v8085_v32, %v2792_v61  ;;  %v6031_v32 = vld [vmem:[%s10231_s5 + $0x63] ss:$0 sm:$0xff] }
 0xe54   :  { %7069 = vmatmul.mubr.msk.f32.gmra.mrb[44].mxu0 %vm59_vm0, %v9800_v24  ;;  %v2886_v42 = vadd.f32 %v5966_v22, %v2873_v30 }
 0xe55   :  { %v2885_v51 = vadd.f32 %v5966_v22, %v2871_v60 }
 0xe57   :  { %7071 = vmatprep.mubr.msk.f32.mxu0 %vm59_vm0, %v2885_v51 }
 0xe58   :  { %7072 = vmatmul.mubr.msk.f32.gmra.mrb[46].mxu0 %vm59_vm0, %v2886_v42 }
 0xeb8   :  { %v4113_v63 = vpop.xlane.xlu1 %4112 }
 0xeb9   :  { %v4110_v54 = vpop.xlane.xlu0 %4109  ;;  %v4115_v14 = vmul.f32 0.032258064, %v4113_v63 }
 0xeba   :  { %v4114_v20 = vmul.f32 0.032258064, %v4110_v54 }
 0xebb   :  { %8086 = vrsqrt.f32 %v4115_v14  ;;  %vm4132_vm10 = vcmp.eq.f32.partialorder %v4115_v14, inf  ;;  %v4135_v17 = vand.u32 2147483648, %v4115_v14  ;;  %vm4134_vm11 = vcmp.eq.f32.partialorder %v4115_v14, 0.0 }
 0xebc   :  { %8088 = vrsqrt.f32 %v4114_v20  ;;  %vm4125_vm12 = vcmp.eq.f32.partialorder %v4114_v20, inf  ;;  %v4128_v33 = vand.u32 2147483648, %v4114_v20  ;;  %vm4127_vm13 = vcmp.eq.f32.partialorder %v4114_v20, 0.0 }
 0xec5   :  { %v8087_v45 = vpop.eup %8086 }
 0xec6   :  { %v8089_v58 = vpop.eup %8088  ;;  %v4131_v12 = vmul.f32 %v8087_v45, %v4115_v14 }
 0xec7   :  { %v4124_v48 = vmul.f32 %v8089_v58, %v4114_v20 }
 0xec8   :  { %v4133_v10 = vsel %vm4132_vm10, %v4115_v14, %v4131_v12 }
 0xec9   :  { %v4136_v2 = vsel %vm4134_vm11, %v4135_v17, %v4133_v10  ;;  %v4126_v52 = vsel %vm4125_vm12, %v4114_v20, %v4124_v48 }
 0xeca   :  { %v4138_v26 = vadd.f32 1e-06, %v4136_v2  ;;  %v4129_v8 = vsel %vm4127_vm13, %v4128_v33, %v4126_v52 }
 0xecb   :  { %v4137_v34 = vadd.f32 1e-06, %v4129_v8 }
 0xecc   :  { %8090 = vrcp.f32 %v4138_v26 }
 0xecd   :  { %8092 = vrcp.f32 %v4137_v34 }
 0xed6   :  { %v8091_v22 = vpop.eup %8090 }
 0xed7   :  { %v8093_v13 = vpop.eup %8092  ;;  %v4142_v41 = vmul.f32 %v8091_v22, %v4122_v56 }
 0xed8   :  { %v4140_v23 = vmul.f32 %v8093_v13, %v4121_v4 }
 0xed9   :  { %v9830_v16 = vadd.f32 %v6026_v25, %v4142_v41 }
 0xeda   :  { %v9828_v5 = vadd.f32 %v6026_v25, %v4140_v23 }
 0xedc   :  { %7051 = vmatprep.mubr.msk.f32.mxu1 %vm59_vm0, %v9828_v5 }
 0xedd   :  { %7052 = vmatmul.mubr.msk.f32.vlgmr.msra.gmra.mrb[76].mxu1 %vm59_vm0, %v9830_v16 }
 0xede   :  { %7621 = vmatpush3.bf16.msra.mxu1 %v7618_v36  ;;  %7082 = vmatprep.mubr.msk.f32.mxu1 %vm59_vm0, %v9762_v47  ;;  %v6038_v47 = vld [vmem:[%s10231_s5 + $0x64] ss:$0 sm:$0xff] }
 0xedf   :  { %7623 = vmatprep.subr.bf16.mxu1 %v7622_v35 }
 0xee2   :  { %7625 = vmatpush3.bf16.msra.mxu1 %v7622_v35 }
 0xee5   :  { %7083 = vmatmul.mubr.msk.f32.vlgmr.msra.gmra.mrb[78].mxu1 %vm59_vm0, %v9764_v18 }
 0xee6   :  { %7085 = vmatprep.mubr.msk.f32.mxu1 %vm59_vm0, %v9774_v62 }
 0xee9   :  { %7086 = vmatmul.mubr.msk.f32.gmra.mrb[80].mxu1 %vm59_vm0, %v9776_v7 }
 0xeea   :  { %7088 = vmatprep.mubr.msk.f32.mxu1 %vm59_vm0, %v9798_v9 }
 0xeed   :  { %7089 = vmatmul.mubr.msk.f32.gmra.mrb[82].mxu1 %vm59_vm0, %v9800_v24 }
 0xeee   :  { %7091 = vmatprep.mubr.msk.f32.mxu1 %vm59_vm0, %v2885_v51 }
 0xef1   :  { %7092 = vmatmul.mubr.msk.f32.gmra.mrb[84].mxu1 %vm59_vm0, %v2886_v42 }
 0xf1f   :  { %v7064_v18 = vpop.f32.mrb[40].mxu0 }
 0xf20   :  { %v4349_v43 = vadd.f32 %v7064_v18, %v6038_v47  ;;  %v4343_v6 = vpop.f32.mrb[41].mxu0 }
 0xf21   :  { %v4344_v11 = vadd.f32 %v6038_v47, %v4343_v6 }
 0xf23   :  { %v7626_v37 = vpack.c.bf16 %v4349_v43, %v4344_v11  ;;  %v7067_v62 = vpop.f32.mrb[42].mxu0 }
 0xf24   :  { %v4359_v46 = vadd.f32 %v7067_v62, %v6038_v47  ;;  %v4353_v7 = vpop.f32.mrb[43].mxu0 }
 0xf25   :  { %v4354_v21 = vadd.f32 %v6038_v47, %v4353_v7  ;;  %7628 = vmatprep.subr.msk.bf16.mxu0 %vm8370_vm1, %v7626_v37  ;;  %7652 = vmatprep.subr.msk.bf16.mxu1 %vm8370_vm1, %v7626_v37 }
 0xf26   :  { %7631 = vmatpush3.bf16.xpose.msk.msra.mxu0 %vm8370_vm1, %v7626_v37  ;;  %7655 = vmatpush3.bf16.xpose.msk.msra.mxu1 %vm8370_vm1, %v7626_v37 }
 0xf27   :  { %v9861_v44 = vpack.c.bf16 %v4359_v46, %v4354_v21  ;;  %v7070_v50 = vpop.f32.mrb[44].mxu0 }
 0xf28   :  { %v4369_v39 = vadd.f32 %v7070_v50, %v6038_v47  ;;  %v4363_v27 = vpop.f32.mrb[45].mxu0 }
 0xf29   :  { %v4364_v0 = vadd.f32 %v6038_v47, %v4363_v27  ;;  %7634 = vmatprep.subr.msk.bf16.mxu0 %vm8370_vm1, %v9861_v44  ;;  %7658 = vmatprep.subr.msk.bf16.mxu1 %vm8370_vm1, %v9861_v44 }
 0xf2b   :  { %v9869_v19 = vpack.c.bf16 %v4369_v39, %v4364_v0  ;;  %v7073_v55 = vpop.f32.mrb[46].mxu0 }
 0xf2c   :  { %v4379_v28 = vadd.f32 %v7073_v55, %v6038_v47  ;;  %v4373_v57 = vpop.f32.mrb[47].mxu0 }
 0xf2d   :  { %v4374_v61 = vadd.f32 %v6038_v47, %v4373_v57 }
 0xf2e   :  { %7637 = vmatpush3.bf16.xpose.msk.msra.mxu0 %vm8370_vm1, %v9861_v44  ;;  %7661 = vmatpush3.bf16.xpose.msk.msra.mxu1 %vm8370_vm1, %v9861_v44 }
 0xf2f   :  { %v9877_v9 = vpack.c.bf16 %v4379_v28, %v4374_v61  ;;  %7640 = vmatprep.subr.msk.bf16.mxu0 %vm8370_vm1, %v9869_v19  ;;  %7664 = vmatprep.subr.msk.bf16.mxu1 %vm8370_vm1, %v9869_v19 }
 0xf36   :  { %7643 = vmatpush3.bf16.xpose.msk.msra.mxu0 %vm8370_vm1, %v9869_v19  ;;  %7667 = vmatpush3.bf16.xpose.msk.msra.mxu1 %vm8370_vm1, %v9869_v19 }
 0xf37   :  { %7646 = vmatprep.subr.msk.bf16.mxu0 %vm8370_vm1, %v9877_v9  ;;  %7670 = vmatprep.subr.msk.bf16.mxu1 %vm8370_vm1, %v9877_v9 }
 0xf3e   :  { %7649 = vmatpush3.bf16.xpose.msk.msra.mxu0 %vm8370_vm1, %v9877_v9  ;;  %7673 = vmatpush3.bf16.xpose.msk.msra.mxu1 %vm8370_vm1, %v9877_v9 }
 0xf3f   :  { %7676 = vmatprep.subr.msk.bf16.mxu0 %vm8370_vm1, %v7626_v37  ;;  %7700 = vmatprep.subr.msk.bf16.mxu1 %vm8370_vm1, %v7626_v37 }
 0xfb0   :  { %v7053_v24 = vpop.f32.mrb[76].mxu1 }
 0xfb1   :  { %v4238_v30 = vadd.f32 %v7053_v24, %v6031_v32  ;;  %v4232_v60 = vpop.f32.mrb[77].mxu1 }
 0xfb2   :  { %v4233_v51 = vadd.f32 %v6031_v32, %v4232_v60 }
 0xfb3   :  { %v9910_v42 = vmul.f32 0.35355338, %v4238_v30 }
 0xfb4   :  { %v4241_v40 = vmul.f32 0.35355338, %v4233_v51 }
 0xfb5   :  { %v4498_v54 = vmul.f32 %v9910_v42, %v10264_v53  ;;  %v4605_v14 = vmul.f32 %v9910_v42, %v10265_v29 }
 0xfb6   :  { %v4497_v36 = vmul.f32 %v4241_v40, %v10264_v53  ;;  %v4604_v63 = vmul.f32 %v4241_v40, %v10265_v29  ;;  %v4687_v12 = vmul.f32 %v4241_v40, %v10266_v59  ;;  %v4770_v48 = vmul.f32 %v4241_v40, %v10267_v38 }
 0xfb8   :  { %v7084_v20 = vpop.f32.mrb[78].mxu1  ;;  %7110 = vmatprep.mubr.msk.f32.mxu0 %vm59_vm0, %v4497_v36  ;;  %7129 = vmatprep.mubr.msk.f32.mxu1 %vm59_vm0, %v4604_v63 }
 0xfb9   :  { %v4464_v45 = vadd.f32 %v7084_v20, %v9915_v1  ;;  %v4458_v58 = vpop.f32.mrb[79].mxu1  ;;  %7111 = vmatmul.mubr.msk.f32.vlgmr.msra.gmra.mrb[48].mxu0 %vm59_vm0, %v4498_v54  ;;  %7130 = vmatmul.mubr.msk.f32.vlgmr.msra.gmra.mrb[86].mxu1 %vm59_vm0, %v4605_v14 }
 0xfba   :  { %v4459_v17 = vadd.f32 %v9915_v1, %v4458_v58  ;;  %7679 = vmatpush3.bf16.xpose.msk.msra.mxu0 %vm8370_vm1, %v7626_v37  ;;  %7703 = vmatpush3.bf16.xpose.msk.msra.mxu1 %vm8370_vm1, %v7626_v37 }
 0xfbb   :  { %7682 = vmatprep.subr.msk.bf16.mxu0 %vm8370_vm1, %v9861_v44  ;;  %7148 = vmatprep.mubr.msk.f32.mxu0 %vm59_vm0, %v4687_v12  ;;  %v4950_v10 = vmul.f32 %v4464_v45, %v10265_v29  ;;  %v4942_v33 = vmul.f32 %v4464_v45, %v10264_v53  ;;  %v5120_v2 = vmul.f32 %v4464_v45, %v10266_v59 }
 0xfbc   :  { %7706 = vmatprep.subr.msk.bf16.mxu1 %vm8370_vm1, %v9861_v44  ;;  %7167 = vmatprep.mubr.msk.f32.mxu1 %vm59_vm0, %v4770_v48  ;;  %v7087_v52 = vpop.f32.mrb[80].mxu1  ;;  %v4949_v26 = vmul.f32 %v4459_v17, %v10265_v29  ;;  %v4941_v8 = vmul.f32 %v4459_v17, %v10264_v53  ;;  %v5119_v34 = vmul.f32 %v4459_v17, %v10266_v59 }
 0xfbd   :  { %v4474_v3 = vadd.f32 %v7087_v52, %v9915_v1  ;;  %v4468_v56 = vpop.f32.mrb[81].mxu1  ;;  %v5210_v22 = vmul.f32 %v4459_v17, %v10267_v38  ;;  %v5211_v4 = vmul.f32 %v4464_v45, %v10267_v38 }
 0xfbe   :  { %v4469_v13 = vadd.f32 %v9915_v1, %v4468_v56  ;;  %v9953_v41 = vpack.c.bf16 %v4950_v10, %v4949_v26  ;;  %v9955_v25 = vpack.c.bf16 %v4942_v33, %v4941_v8  ;;  %v9957_v23 = vpack.c.bf16 %v5120_v2, %v5119_v34 }
 0xfbf   :  { %v4952_v15 = vmul.f32 %v4474_v3, %v10265_v29  ;;  %v4944_v49 = vmul.f32 %v4474_v3, %v10264_v53  ;;  %v5122_v35 = vmul.f32 %v4474_v3, %v10266_v59  ;;  %v9962_v47 = vpack.c.bf16 %v5211_v4, %v5210_v22 }
 0xfc0   :  { %v7090_v18 = vpop.f32.mrb[82].mxu1  ;;  %v4951_v43 = vmul.f32 %v4469_v13, %v10265_v29  ;;  %v4943_v6 = vmul.f32 %v4469_v13, %v10264_v53  ;;  %v5121_v11 = vmul.f32 %v4469_v13, %v10266_v59  ;;  %v5212_v46 = vmul.f32 %v4469_v13, %v10267_v38 }
 0xfc1   :  { %v4484_v37 = vadd.f32 %v7090_v18, %v9915_v1  ;;  %v4478_v62 = vpop.f32.mrb[83].mxu1  ;;  %v5213_v7 = vmul.f32 %v4474_v3, %v10267_v38  ;;  %v4771_v26 = vmul.f32 %v9910_v42, %v10267_v38 }
 0xfc2   :  { %v4479_v21 = vadd.f32 %v9915_v1, %v4478_v62  ;;  %7685 = vmatpush3.bf16.xpose.msk.msra.mxu0 %vm8370_vm1, %v9861_v44  ;;  %7709 = vmatpush3.bf16.xpose.msk.msra.mxu1 %vm8370_vm1, %v9861_v44  ;;  %v7726_v50 = vpack.c.bf16 %v4952_v15, %v4951_v43  ;;  %v9977_v39 = vpack.c.bf16 %v4944_v49, %v4943_v6 }
 0xfc3   :  { %7688 = vmatprep.subr.msk.bf16.mxu0 %vm8370_vm1, %v9869_v19  ;;  %7712 = vmatprep.subr.msk.bf16.mxu1 %vm8370_vm1, %v9869_v19  ;;  %v4954_v27 = vmul.f32 %v4484_v37, %v10265_v29  ;;  %v4946_v0 = vmul.f32 %v4484_v37, %v10264_v53  ;;  %v9987_v55 = vpack.c.bf16 %v5122_v35, %v5121_v11 }
 0xfc4   :  { %v7093_v28 = vpop.f32.mrb[84].mxu1  ;;  %v4953_v44 = vmul.f32 %v4479_v21, %v10265_v29  ;;  %v4945_v57 = vmul.f32 %v4479_v21, %v10264_v53  ;;  %v5123_v61 = vmul.f32 %v4479_v21, %v10266_v59  ;;  %v5124_v32 = vmul.f32 %v4484_v37, %v10266_v59 }
 0xfc5   :  { %v4494_v24 = vadd.f32 %v7093_v28, %v9915_v1  ;;  %v4488_v30 = vpop.f32.mrb[85].mxu1  ;;  %v9994_v60 = vpack.c.bf16 %v5213_v7, %v5212_v46  ;;  %v5214_v51 = vmul.f32 %v4479_v21, %v10267_v38  ;;  %v5215_v40 = vmul.f32 %v4484_v37, %v10267_v38 }
 0xfc6   :  { %v4489_v36 = vadd.f32 %v9915_v1, %v4488_v30  ;;  %v7730_v63 = vpack.c.bf16 %v4954_v27, %v4953_v44  ;;  %v9999_v54 = vpack.c.bf16 %v4946_v0, %v4945_v57  ;;  %v10001_v14 = vpack.c.bf16 %v5124_v32, %v5123_v61 }
 0xfc7   :  { %v4956_v20 = vmul.f32 %v4494_v24, %v10265_v29  ;;  %v4948_v45 = vmul.f32 %v4494_v24, %v10264_v53  ;;  %v5126_v58 = vmul.f32 %v4494_v24, %v10266_v59  ;;  %v10006_v12 = vpack.c.bf16 %v5215_v40, %v5214_v51 }
 0xfc8   :  { %v4955_v17 = vmul.f32 %v4489_v36, %v10265_v29  ;;  %v4947_v48 = vmul.f32 %v4489_v36, %v10264_v53  ;;  %v5125_v10 = vmul.f32 %v4489_v36, %v10266_v59  ;;  %v5216_v1 = vmul.f32 %v4489_v36, %v10267_v38 }
 0xfc9   :  { %v5217_v33 = vmul.f32 %v4494_v24, %v10267_v38 }
 0xfca   :  { %7691 = vmatpush3.bf16.xpose.msk.msra.mxu0 %vm8370_vm1, %v9869_v19  ;;  %7715 = vmatpush3.bf16.xpose.msk.msra.mxu1 %vm8370_vm1, %v9869_v19  ;;  %v7734_v2 = vpack.c.bf16 %v4956_v20, %v4955_v17  ;;  %v10019_v52 = vpack.c.bf16 %v4948_v45, %v4947_v48  ;;  %v10021_v29 = vpack.c.bf16 %v5126_v58, %v5125_v10 }
 0xfcb   :  { %7694 = vmatprep.subr.msk.bf16.mxu0 %vm8370_vm1, %v9877_v9  ;;  %7718 = vmatprep.subr.msk.bf16.mxu1 %vm8370_vm1, %v9877_v9  ;;  %v10029_v53 = vpack.c.bf16 %v5217_v33, %v5216_v1  ;;  %v4688_v19 = vmul.f32 %v9910_v42, %v10266_v59  ;;  %v35_v59 = vld [vmem:[%s10232_s1 + $0x40] sm:$0xff] }
 0xfd2   :  { %7697 = vmatpush3.bf16.xpose.msk.msra.mxu0 %vm8370_vm1, %v9877_v9  ;;  %7721 = vmatpush3.bf16.xpose.msk.msra.mxu1 %vm8370_vm1, %v9877_v9 }
 0xfd3   :  { %7723 = vmatprep.subr.bf16.mxu0 %v9953_v41 }
 0xfd9   :  { %7149 = vmatmul.mubr.msk.f32.vlgmr.msra.gmra.mrb[50].mxu0 %vm59_vm0, %v4688_v19  ;;  %7168 = vmatmul.mubr.msk.f32.vlgmr.msra.gmra.mrb[88].mxu1 %vm59_vm0, %v4771_v26 }
 0xfda   :  { %7725 = vmatpush3.bf16.msra.mxu0 %v9953_v41 }
 0xfdb   :  { %7727 = vmatprep.subr.bf16.mxu0 %v7726_v50 }
 0xfde   :  { %7729 = vmatpush3.bf16.msra.mxu0 %v7726_v50 }
 0xfdf   :  { %7731 = vmatprep.subr.bf16.mxu0 %v7730_v63 }
 0xfe2   :  { %7733 = vmatpush3.bf16.msra.mxu0 %v7730_v63 }
 0xfe3   :  { %7735 = vmatprep.subr.bf16.mxu0 %v7734_v2 }
 0xfe6   :  { %7737 = vmatpush3.bf16.msra.mxu0 %v7734_v2 }
 0xfe7   :  { %7739 = vmatprep.subr.bf16.mxu0 %v9955_v25 }
0x108c   :  { %v7112_v38 = vpop.f32.mrb[48].mxu0  ;;  %v7131_v9 = vpop.f32.mrb[86].mxu1 }
0x108d   :  { %v4684_v42 = vadd.f32 %v7131_v9, %v36_v31  ;;  %v4595_v8 = vpop.f32.mrb[49].mxu0  ;;  %v4678_v34 = vpop.f32.mrb[87].mxu1  ;;  %v4601_v56 = vadd.f32 %v7112_v38, %v36_v31 }
0x108e   :  { %v4679_v3 = vadd.f32 %v4678_v34, %v35_v59  ;;  %v4596_v4 = vadd.f32 %v4595_v8, %v35_v59 }
0x108f   :  { %v4862_v22 = vsel %vm1154_vm2, %v4684_v42, -inf  ;;  %v4856_v41 = vsel %vm1154_vm2, %v4601_v56, -inf }
0x1090   :  { %4863 = vmax.xlane.f32.xlu1 %v4862_v22  ;;  %v4859_v13 = vsel %vm1154_vm2, %v4679_v3, -inf  ;;  %v4853_v15 = vsel %vm1154_vm2, %v4596_v4, -inf }
0x1091   :  { %4860 = vmax.xlane.f32.xlu0 %v4859_v13 }
0x1094   :  { %4857 = vmax.xlane.f32.xlu1 %v4856_v41 }
0x1095   :  { %4854 = vmax.xlane.f32.xlu0 %v4853_v15 }
0x10ac   :  { %v7150_v49 = vpop.f32.mrb[50].mxu0  ;;  %v7169_v35 = vpop.f32.mrb[88].mxu1 }
0x10ad   :  { %v4767_v18 = vadd.f32 %v7150_v49, %v36_v31  ;;  %v4761_v43 = vpop.f32.mrb[51].mxu0  ;;  %v4844_v6 = vpop.f32.mrb[89].mxu1  ;;  %v4850_v37 = vadd.f32 %v7169_v35, %v36_v31 }
0x10ae   :  { %v4762_v11 = vadd.f32 %v4761_v43, %v35_v59  ;;  %v4845_v46 = vadd.f32 %v4844_v6, %v35_v59  ;;  %v6109_v43 = vld [vmem:[%s10229_s2 + $0x1a8] sm:$0xff]  ;;  %v6110_v6 = vld [vmem:[%s10229_s2 + $0x1b0] sm:$0xff] }
0x10af   :  { %v4868_v62 = vsel %vm1154_vm2, %v4767_v18, -inf  ;;  %v4874_v21 = vsel %vm1154_vm2, %v4850_v37, -inf }
0x10b0   :  { %4869 = vmax.xlane.f32.xlu1 %v4868_v62  ;;  %v4865_v7 = vsel %vm1154_vm2, %v4762_v11, -inf  ;;  %v4871_v50 = vsel %vm1154_vm2, %v4845_v46, -inf }
0x10b1   :  { %4866 = vmax.xlane.f32.xlu0 %v4865_v7 }
0x10b4   :  { %4875 = vmax.xlane.f32.xlu1 %v4874_v21 }
0x10b5   :  { %4872 = vmax.xlane.f32.xlu0 %v4871_v50 }
0x111d   :  { %v4864_v27 = vpop.xlane.xlu1 %4863 }
0x111e   :  { %v4880_v0 = vsub.f32 %v4684_v42, %v4864_v27  ;;  %v4861_v28 = vpop.xlane.xlu0 %4860 }
0x111f   :  { %v4879_v44 = vsub.f32 %v4679_v3, %v4861_v28 }
0x1120   :  { %v4891_v57 = vmul.f32 1.442695, %v4880_v0 }
0x1121   :  { %v4889_v61 = vmul.f32 1.442695, %v4879_v44  ;;  %v4858_v32 = vpop.xlane.xlu1 %4857 }
0x1122   :  { %8094 = vpow2.f32 %v4891_v57  ;;  %v4878_v24 = vsub.f32 %v4601_v56, %v4858_v32  ;;  %v4855_v30 = vpop.xlane.xlu0 %4854 }
0x1123   :  { %8096 = vpow2.f32 %v4889_v61  ;;  %v4877_v51 = vsub.f32 %v4596_v4, %v4855_v30 }
0x1124   :  { %v4887_v40 = vmul.f32 1.442695, %v4878_v24 }
0x1125   :  { %v4885_v36 = vmul.f32 1.442695, %v4877_v51 }
0x1126   :  { %8098 = vpow2.f32 %v4887_v40 }
0x1127   :  { %8100 = vpow2.f32 %v4885_v36 }
0x112c   :  { %v8095_v63 = vpop.eup %8094 }
0x112d   :  { %v8097_v20 = vpop.eup %8096  ;;  %v4910_v45 = vsel %vm1154_vm2, %v8095_v63, 0.0 }
0x112e   :  { %4911 = vadd.xlane.f32.xlu1 %v4910_v45  ;;  %v4907_v58 = vsel %vm1154_vm2, %v8097_v20, 0.0 }
0x112f   :  { %4908 = vadd.xlane.f32.xlu0 %v4907_v58 }
0x1130   :  { %v10062_v17 = vpop.eup %8098 }
0x1131   :  { %v8101_v48 = vpop.eup %8100  ;;  %v4904_v10 = vsel %vm1154_vm2, %v10062_v17, 0.0 }
0x1132   :  { %4905 = vadd.xlane.f32.xlu1 %v4904_v10  ;;  %v4901_v1 = vsel %vm1154_vm2, %v8101_v48, 0.0 }
0x1133   :  { %4902 = vadd.xlane.f32.xlu0 %v4901_v1 }
0x113d   :  { %v4870_v33 = vpop.xlane.xlu1 %4869 }
0x113e   :  { %v4882_v2 = vsub.f32 %v4767_v18, %v4870_v33  ;;  %v4867_v19 = vpop.xlane.xlu0 %4866  ;;  %v6108_v18 = vld [vmem:[%s10229_s2 + $0x1a0] sm:$0xff] }
0x113f   :  { %v4881_v26 = vsub.f32 %v4762_v11, %v4867_v19  ;;  %v7786_v11 = vpack.c.bf16 %v6109_v43, %v6108_v18 }
0x1140   :  { %v4895_v31 = vmul.f32 1.442695, %v4882_v2 }
0x1141   :  { %v4893_v59 = vmul.f32 1.442695, %v4881_v26  ;;  %v4876_v38 = vpop.xlane.xlu1 %4875  ;;  %7787 = vmatprep.subr.bf16.mxu1 %v7786_v11 }
0x1142   :  { %8102 = vpow2.f32 %v4895_v31  ;;  %v4884_v9 = vsub.f32 %v4850_v37, %v4876_v38  ;;  %v4873_v42 = vpop.xlane.xlu0 %4872  ;;  %v6111_v37 = vld [vmem:[%s10229_s2 + $0x1b8] sm:$0xff]  ;;  %7789 = vmatpush3.bf16.msra.mxu1 %v7786_v11 }
0x1143   :  { %8104 = vpow2.f32 %v4893_v59  ;;  %v4883_v8 = vsub.f32 %v4845_v46, %v4873_v42  ;;  %v7790_v62 = vpack.c.bf16 %v6111_v37, %v6110_v6  ;;  %v6118_v42 = vld [vmem:[%s10233_s3 + $0x28] sm:$0xff] }
0x1144   :  { %v4899_v34 = vmul.f32 1.442695, %v4884_v9 }
0x1145   :  { %v4897_v3 = vmul.f32 1.442695, %v4883_v8  ;;  %7791 = vmatprep.subr.bf16.mxu1 %v7790_v62  ;;  %v6119_v8 = vld [vmem:[%s10233_s3 + $0x30] sm:$0xff] }
0x1146   :  { %8106 = vpow2.f32 %v4899_v34  ;;  %7793 = vmatpush3.bf16.msra.mxu1 %v7790_v62 }
0x1147   :  { %8108 = vpow2.f32 %v4897_v3  ;;  %v6120_v3 = vld [vmem:[%s10233_s3 + $0x38] sm:$0xff] }
0x114c   :  { %v10067_v56 = vpop.eup %8102 }
0x114d   :  { %v10069_v22 = vpop.eup %8104  ;;  %v4916_v4 = vsel %vm1154_vm2, %v10067_v56, 0.0 }
0x114e   :  { %4917 = vadd.xlane.f32.xlu1 %v4916_v4  ;;  %v4913_v13 = vsel %vm1154_vm2, %v10069_v22, 0.0  ;;  %v6125_v4 = vld [vmem:[%s10234_s4 + $0x48] sm:$0xff] }
0x114f   :  { %4914 = vadd.xlane.f32.xlu0 %v4913_v13 }
0x1150   :  { %v10075_v41 = vpop.eup %8106 }
0x1151   :  { %v10077_v15 = vpop.eup %8108  ;;  %v4922_v49 = vsel %vm1154_vm2, %v10075_v41, 0.0 }
0x1152   :  { %4923 = vadd.xlane.f32.xlu1 %v4922_v49  ;;  %v4919_v35 = vsel %vm1154_vm2, %v10077_v15, 0.0 }
0x1153   :  { %4920 = vadd.xlane.f32.xlu0 %v4919_v35 }
0x11bb   :  { %v4912_v46 = vpop.xlane.xlu1 %4911 }
0x11bc   :  { %8110 = vrcp.f32 %v4912_v46  ;;  %v4909_v7 = vpop.xlane.xlu0 %4908 }
0x11bd   :  { %8112 = vrcp.f32 %v4909_v7 }
0x11bf   :  { %v4906_v44 = vpop.xlane.xlu1 %4905 }
0x11c0   :  { %v4903_v21 = vpop.xlane.xlu0 %4902 }
0x11c1   :  { %8114 = vrcp.f32 %v4903_v21 }
0x11c2   :  { %8116 = vrcp.f32 %v4906_v44 }
0x11c6   :  { %v8111_v50 = vpop.eup %8110 }
0x11c7   :  { %v8113_v27 = vpop.eup %8112  ;;  %v4932_v28 = vmul.f32 %v8111_v50, %v8095_v63 }
0x11c8   :  { %v4930_v0 = vmul.f32 %v8113_v27, %v8097_v20 }
0x11ca   :  { %7186 = vmatprep.mubr.msk.f32.mxu0 %vm1154_vm2, %v4930_v0 }
0x11cb   :  { %v8115_v57 = vpop.eup %8114  ;;  %7187 = vmatmul.mubr.msk.f32.vlgmr.msra.gmra.mrb[52].mxu0 %vm1154_vm2, %v4932_v28  ;;  %v6115_v28 = vld [vmem:[%s10231_s5 + $0x67] ss:$0 sm:$0xff] }
0x11cc   :  { %7741 = vmatpush3.bf16.msra.mxu0 %v9955_v25  ;;  %v4926_v61 = vmul.f32 %v8115_v57, %v8101_v48  ;;  %v8117_v32 = vpop.eup %8116 }
0x11cd   :  { %7743 = vmatprep.subr.bf16.mxu0 %v9977_v39  ;;  %v4928_v24 = vmul.f32 %v8117_v32, %v10062_v17 }
0x11ce   :  { %7205 = vmatprep.mubr.msk.f32.mxu0 %vm1154_vm2, %v4926_v61 }
0x11d0   :  { %7745 = vmatpush3.bf16.msra.mxu0 %v9977_v39 }
0x11d1   :  { %7747 = vmatprep.subr.bf16.mxu0 %v9999_v54 }
0x11d4   :  { %7749 = vmatpush3.bf16.msra.mxu0 %v9999_v54 }
0x11d5   :  { %7751 = vmatprep.subr.bf16.mxu0 %v10019_v52 }
0x11d8   :  { %7753 = vmatpush3.bf16.msra.mxu0 %v10019_v52 }
0x11d9   :  { %7755 = vmatprep.subr.bf16.mxu0 %v9957_v23 }
0x11db   :  { %v4918_v25 = vpop.xlane.xlu1 %4917  ;;  %7206 = vmatmul.mubr.msk.f32.vlgmr.msra.gmra.mrb[52].mxu0 %vm1154_vm2, %v4928_v24 }
0x11dc   :  { %8118 = vrcp.f32 %v4918_v25  ;;  %7757 = vmatpush3.bf16.msra.mxu0 %v9957_v23  ;;  %v4915_v39 = vpop.xlane.xlu0 %4914  ;;  %v6116_v25 = vld [vmem:[%s10231_s5 + $0x68] ss:$0 sm:$0xff] }
0x11dd   :  { %8120 = vrcp.f32 %v4915_v39  ;;  %7759 = vmatprep.subr.bf16.mxu0 %v9987_v55 }
0x11df   :  { %v4924_v40 = vpop.xlane.xlu1 %4923 }
0x11e0   :  { %7761 = vmatpush3.bf16.msra.mxu0 %v9987_v55  ;;  %v4921_v54 = vpop.xlane.xlu0 %4920 }
0x11e1   :  { %8122 = vrcp.f32 %v4921_v54  ;;  %7763 = vmatprep.subr.bf16.mxu0 %v10001_v14  ;;  %v6126_v54 = vld [vmem:[%s10234_s4 + $0x50] sm:$0xff] }
0x11e2   :  { %8124 = vrcp.f32 %v4924_v40  ;;  %v6128_v40 = vld [vmem:[%s10234_s4 + $0x60] sm:$0xff] }
0x11e4   :  { %7765 = vmatpush3.bf16.msra.mxu0 %v10001_v14 }
0x11e5   :  { %7767 = vmatprep.subr.bf16.mxu0 %v10021_v29 }
0x11e6   :  { %v8119_v52 = vpop.eup %8118 }
0x11e7   :  { %v8121_v30 = vpop.eup %8120  ;;  %v4936_v51 = vmul.f32 %v8119_v52, %v10067_v56  ;;  %v7798_v56 = vpack.c.bf16 %v6120_v3, %v6119_v8  ;;  %v6127_v52 = vld [vmem:[%s10234_s4 + $0x58] sm:$0xff] }
0x11e8   :  { %7769 = vmatpush3.bf16.msra.mxu0 %v10021_v29  ;;  %v4934_v23 = vmul.f32 %v8121_v30, %v10069_v22  ;;  %v6124_v22 = vld [vmem:[%s10234_s4 + $0x40] sm:$0xff] }
0x11e9   :  { %7771 = vmatprep.subr.bf16.mxu0 %v9962_v47  ;;  %v7802_v13 = vpack.c.bf16 %v6125_v4, %v6124_v22  ;;  %v6137_v22 = vld [vmem:[%s10229_s2 + $0x1c0] sm:$0xff]  ;;  %v6138_v4 = vld [vmem:[%s10229_s2 + $0x1c8] sm:$0xff] }
0x11ea   :  { %7224 = vmatprep.mubr.msk.f32.mxu0 %vm1154_vm2, %v4934_v23 }
0x11eb   :  { %v8123_v55 = vpop.eup %8122  ;;  %7225 = vmatmul.mubr.msk.f32.vlgmr.msra.gmra.mrb[52].mxu0 %vm1154_vm2, %v4936_v51  ;;  %v7806_v51 = vpack.c.bf16 %v6127_v52, %v6126_v54  ;;  %v6136_v52 = vld [vmem:[%s10231_s5 + $0x6b] ss:$0 sm:$0xff] }
0x11ec   :  { %7773 = vmatpush3.bf16.msra.mxu0 %v9962_v47  ;;  %v4938_v14 = vmul.f32 %v8123_v55, %v10077_v15  ;;  %v8125_v29 = vpop.eup %8124  ;;  %v6129_v55 = vld [vmem:[%s10234_s4 + $0x68] sm:$0xff] }
0x11ed   :  { %7775 = vmatprep.subr.bf16.mxu0 %v9994_v60  ;;  %v4940_v36 = vmul.f32 %v8125_v29, %v10075_v41  ;;  %v6130_v29 = vld [vmem:[%s10234_s4 + $0x70] sm:$0xff] }
0x11ee   :  { %7243 = vmatprep.mubr.msk.f32.mxu0 %vm1154_vm2, %v4938_v14  ;;  %v7810_v14 = vpack.c.bf16 %v6129_v55, %v6128_v40  ;;  %v6141_v40 = vld [vmem:[%s10231_s5 + $0x6c] ss:$0 sm:$0xff] }
0x11f0   :  { %7777 = vmatpush3.bf16.msra.mxu0 %v9994_v60  ;;  %v6112_v60 = vld [vmem:[%s10231_s5 + $0x66] ss:$0 sm:$0xff] }
0x11f1   :  { %7779 = vmatprep.subr.bf16.mxu0 %v10006_v12 }
0x11f4   :  { %7781 = vmatpush3.bf16.msra.mxu0 %v10006_v12 }
0x11f5   :  { %7783 = vmatprep.subr.bf16.mxu0 %v10029_v53 }
0x11f8   :  { %7785 = vmatpush3.bf16.msra.mxu0 %v10029_v53 }
0x11fb   :  { %7244 = vmatmul.mubr.msk.f32.vlgmr.msra.gmra.mrb[52].mxu0 %vm1154_vm2, %v4940_v36  ;;  %v6131_v36 = vld [vmem:[%s10234_s4 + $0x78] sm:$0xff] }
0x12ce   :  { %v7245_v47 = vpop.f32.mrb[52].mxu0 }
0x12cf   :  { %v5290_v63 = vpop.f32.mrb[53].mxu0 }
0x12d0   :  { %7254 = vmatprep.mubr.msk.f32.mxu1 %vm59_vm0, %v5290_v63  ;;  %v6121_v63 = vld [vmem:[%s10235_s6 + $0x1] ss:$0 sm:$0xff] }
0x12d1   :  { %7255 = vmatmul.mubr.msk.f32.vlgmr.msra.gmra.mrb[90].mxu1 %vm59_vm0, %v7245_v47  ;;  %v7814_v47 = vpack.c.bf16 %v6131_v36, %v6130_v29 }
0x13a4   :  { %v7256_v12 = vpop.f32.mrb[90].mxu1 }
0x13a5   :  { %v5389_v20 = vadd.f32 %v7256_v12, %v6112_v60  ;;  %v5383_v45 = vpop.f32.mrb[91].mxu1 }
0x13a6   :  { %v5384_v58 = vadd.f32 %v6112_v60, %v5383_v45 }
0x13a7   :  { %v5393_v53 = vadd.f32 %v5389_v20, %v9830_v16 }
0x13a8   :  { %v5392_v17 = vadd.f32 %v5384_v58, %v9828_v5  ;;  %v6117_v5 = vld [vmem:[%s10233_s3 + $0x20] sm:$0xff] }
0x13a9   :  { %v5397_v48 = vsel %vm59_vm0, %v5393_v53, 0.0  ;;  %v7794_v34 = vpack.c.bf16 %v6118_v42, %v6117_v5 }
0x13aa   :  { %5398 = vadd.xlane.f32.xlu1 %v5397_v48  ;;  %v5394_v10 = vsel %vm59_vm0, %v5392_v17, 0.0 }
0x13ab   :  { %5395 = vadd.xlane.f32.xlu0 %v5394_v10  ;;  %7795 = vmatprep.subr.bf16.mxu1 %v7794_v34 }
0x13ac   :  { %7797 = vmatpush3.bf16.msra.mxu1 %v7794_v34 }
0x13ad   :  { %7799 = vmatprep.subr.bf16.mxu1 %v7798_v56 }
0x13b0   :  { %7801 = vmatpush3.bf16.msra.mxu1 %v7798_v56 }
0x13b1   :  { %7803 = vmatprep.subr.bf16.mxu1 %v7802_v13 }
0x1437   :  { %v5399_v1 = vpop.xlane.xlu1 %5398 }
0x1438   :  { %v5401_v33 = vmul.f32 0.03125, %v5399_v1  ;;  %v5396_v2 = vpop.xlane.xlu0 %5395 }
0x1439   :  { %v5400_v19 = vmul.f32 0.03125, %v5396_v2 }
0x143a   :  { %v5403_v26 = vsub.f32 %v5393_v53, %v5401_v33 }
0x143b   :  { %v5402_v31 = vsub.f32 %v5392_v17, %v5400_v19  ;;  %v6132_v17 = vld [vmem:[%s10231_s5 + $0x69] ss:$0 sm:$0xff] }
0x143c   :  { %v5405_v59 = vmul.f32 %v5403_v26, %v5403_v26  ;;  %v5420_v44 = vmul.f32 %v6115_v28, %v5403_v26 }
0x143d   :  { %v5404_v38 = vmul.f32 %v5402_v31, %v5402_v31  ;;  %v5419_v61 = vmul.f32 %v6115_v28, %v5402_v31 }
0x143e   :  { %v5409_v9 = vsel %vm59_vm0, %v5405_v59, 0.0 }
0x143f   :  { %5410 = vadd.xlane.f32.xlu1 %v5409_v9  ;;  %v5406_v16 = vsel %vm59_vm0, %v5404_v38, 0.0 }
0x1440   :  { %5407 = vadd.xlane.f32.xlu0 %v5406_v16 }
0x14cc   :  { %v5411_v41 = vpop.xlane.xlu1 %5410 }
0x14cd   :  { %v5413_v15 = vmul.f32 0.032258064, %v5411_v41  ;;  %v5408_v49 = vpop.xlane.xlu0 %5407  ;;  %v7818_v41 = vpack.c.bf16 %v6138_v4, %v6137_v22 }
0x14ce   :  { %v5412_v35 = vmul.f32 0.032258064, %v5408_v49 }
0x14cf   :  { %8126 = vrsqrt.f32 %v5413_v15  ;;  %vm5430_vm1 = vcmp.eq.f32.partialorder %v5413_v15, inf  ;;  %v5433_v11 = vand.u32 2147483648, %v5413_v15  ;;  %vm5432_vm14 = vcmp.eq.f32.partialorder %v5413_v15, 0.0 }
0x14d0   :  { %8128 = vrsqrt.f32 %v5412_v35  ;;  %vm5423_vm15 = vcmp.eq.f32.partialorder %v5412_v35, inf  ;;  %v5426_v46 = vand.u32 2147483648, %v5412_v35  ;;  %vm5425_vm3 = vcmp.eq.f32.partialorder %v5412_v35, 0.0 }
0x14d9   :  { %v8127_v18 = vpop.eup %8126 }
0x14da   :  { %v8129_v43 = vpop.eup %8128  ;;  %v5429_v6 = vmul.f32 %v8127_v18, %v5413_v15 }
0x14db   :  { %v5422_v37 = vmul.f32 %v8129_v43, %v5412_v35 }
0x14dc   :  { %v5431_v62 = vsel %vm5430_vm1, %v5413_v15, %v5429_v6  ;;  %v6140_v15 = vld [vmem:[%s10229_s2 + $0x1d8] sm:$0xff] }
0x14dd   :  { %v5434_v7 = vsel %vm5432_vm14, %v5433_v11, %v5431_v62  ;;  %v5424_v21 = vsel %vm5423_vm15, %v5412_v35, %v5422_v37 }
0x14de   :  { %v5436_v50 = vadd.f32 1e-06, %v5434_v7  ;;  %v5427_v27 = vsel %vm5425_vm3, %v5426_v46, %v5424_v21 }
0x14df   :  { %v5435_v0 = vadd.f32 1e-06, %v5427_v27 }
0x14e0   :  { %8130 = vrcp.f32 %v5436_v50 }
0x14e1   :  { %8132 = vrcp.f32 %v5435_v0 }
0x14ea   :  { %v8131_v57 = vpop.eup %8130 }
0x14eb   :  { %v8133_v32 = vpop.eup %8132  ;;  %v5440_v24 = vmul.f32 %v8131_v57, %v5420_v44 }
0x14ec   :  { %v5438_v39 = vmul.f32 %v8133_v32, %v5419_v61  ;;  %v6135_v61 = vld [vmem:[%s10231_s5 + $0x6a] ss:$0 sm:$0xff] }
0x14ed   :  { %v5447_v23 = vadd.f32 %v6116_v25, %v5440_v24 }
0x14ee   :  { %v5446_v30 = vadd.f32 %v6116_v25, %v5438_v39 }
0x14f0   :  { %7265 = vmatprep.mubr.msk.f32.mxu1 %vm59_vm0, %v5446_v30 }
0x14f1   :  { %7266 = vmatmul.mubr.msk.f32.vlgmr.msra.gmra.mrb[92].mxu1 %vm59_vm0, %v5447_v23 }
0x14f2   :  { %7805 = vmatpush3.bf16.msra.mxu1 %v7802_v13  ;;  %v6139_v13 = vld [vmem:[%s10229_s2 + $0x1d0] sm:$0xff] }
0x14f3   :  { %7807 = vmatprep.subr.bf16.mxu1 %v7806_v51  ;;  %v7822_v49 = vpack.c.bf16 %v6140_v15, %v6139_v13 }
0x14f6   :  { %7809 = vmatpush3.bf16.msra.mxu1 %v7806_v51 }
0x14f7   :  { %7811 = vmatprep.subr.bf16.mxu1 %v7810_v14 }
0x14fa   :  { %7813 = vmatpush3.bf16.msra.mxu1 %v7810_v14 }
0x14fb   :  { %7815 = vmatprep.subr.bf16.mxu1 %v7814_v47 }
0x14fe   :  { %7817 = vmatpush3.bf16.msra.mxu1 %v7814_v47 }
0x14ff   :  { %7819 = vmatprep.subr.bf16.mxu1 %v7818_v41 }
0x15c4   :  { %v7267_v60 = vpop.f32.mrb[92].mxu1 }
0x15c5   :  { %v5536_v12 = vadd.f32 %v7267_v60, %v6121_v63  ;;  %v5530_v20 = vpop.f32.mrb[93].mxu1 }
0x15c6   :  { %v5531_v45 = vadd.f32 %v6121_v63, %v5530_v20 }
0x15c7   :  { %v5540_v53 = vmax.f32 %v5536_v12, 0.0 }
0x15c8   :  { %v5539_v58 = vmax.f32 %v5531_v45, 0.0 }
0x15ca   :  { %7284 = vmatprep.mubr.msk.f32.mxu1 %vm1154_vm2, %v5539_v58 }
0x15cb   :  { %7285 = vmatmul.mubr.msk.f32.vlgmr.msra.gmra.mrb[94].mxu1 %vm1154_vm2, %v5540_v53 }
0x15cc   :  { %7821 = vmatpush3.bf16.msra.mxu1 %v7818_v41 }
0x15cd   :  { %7823 = vmatprep.subr.bf16.mxu1 %v7822_v49 }
0x15d0   :  { %7825 = vmatpush3.bf16.msra.mxu1 %v7822_v49 }
0x169e   :  { %v7286_v48 = vpop.f32.mrb[94].mxu1 }
0x169f   :  { %v5633_v10 = vadd.f32 %v7286_v48, %v6132_v17  ;;  %v5627_v1 = vpop.f32.mrb[95].mxu1 }
0x16a0   :  { %v5628_v33 = vadd.f32 %v6132_v17, %v5627_v1 }
0x16a1   :  { %v5637_v2 = vadd.f32 %v5633_v10, %v5447_v23 }
0x16a2   :  { %v5636_v19 = vadd.f32 %v5628_v33, %v5446_v30 }
0x16a3   :  { %v5641_v26 = vsel %vm59_vm0, %v5637_v2, 0.0 }
0x16a4   :  { %5642 = vadd.xlane.f32.xlu1 %v5641_v26  ;;  %v5638_v31 = vsel %vm59_vm0, %v5636_v19, 0.0 }
0x16a5   :  { %5639 = vadd.xlane.f32.xlu0 %v5638_v31 }
0x1731   :  { %v5643_v59 = vpop.xlane.xlu1 %5642 }
0x1732   :  { %v5645_v38 = vmul.f32 0.03125, %v5643_v59  ;;  %v5640_v9 = vpop.xlane.xlu0 %5639 }
0x1733   :  { %v5644_v16 = vmul.f32 0.03125, %v5640_v9 }
0x1734   :  { %v5647_v5 = vsub.f32 %v5637_v2, %v5645_v38 }
0x1735   :  { %v5646_v42 = vsub.f32 %v5636_v19, %v5644_v16 }
0x1736   :  { %v5649_v8 = vmul.f32 %v5647_v5, %v5647_v5  ;;  %v5664_v32 = vmul.f32 %v6135_v61, %v5647_v5 }
0x1737   :  { %v5648_v34 = vmul.f32 %v5646_v42, %v5646_v42  ;;  %v5663_v25 = vmul.f32 %v6135_v61, %v5646_v42 }
0x1738   :  { %v5653_v3 = vsel %vm59_vm0, %v5649_v8, 0.0 }
0x1739   :  { %5654 = vadd.xlane.f32.xlu1 %v5653_v3  ;;  %v5650_v56 = vsel %vm59_vm0, %v5648_v34, 0.0 }
0x173a   :  { %5651 = vadd.xlane.f32.xlu0 %v5650_v56 }
0x17c6   :  { %v5655_v35 = vpop.xlane.xlu1 %5654 }
0x17c7   :  { %v5657_v18 = vmul.f32 0.032258064, %v5655_v35  ;;  %v5652_v43 = vpop.xlane.xlu0 %5651 }
0x17c8   :  { %v5656_v6 = vmul.f32 0.032258064, %v5652_v43 }
0x17c9   :  { %8134 = vrsqrt.f32 %v5657_v18  ;;  %vm5674_vm2 = vcmp.eq.f32.partialorder %v5657_v18, inf  ;;  %v5677_v46 = vand.u32 2147483648, %v5657_v18  ;;  %vm5676_vm4 = vcmp.eq.f32.partialorder %v5657_v18, 0.0 }
0x17ca   :  { %8136 = vrsqrt.f32 %v5656_v6  ;;  %vm5667_vm5 = vcmp.eq.f32.partialorder %v5656_v6, inf  ;;  %v5670_v50 = vand.u32 2147483648, %v5656_v6  ;;  %vm5669_vm6 = vcmp.eq.f32.partialorder %v5656_v6, 0.0 }
0x17d3   :  { %v8135_v11 = vpop.eup %8134 }
0x17d4   :  { %v8137_v37 = vpop.eup %8136  ;;  %v5673_v62 = vmul.f32 %v8135_v11, %v5657_v18 }
0x17d5   :  { %v5666_v7 = vmul.f32 %v8137_v37, %v5656_v6 }
0x17d6   :  { %v5675_v21 = vsel %vm5674_vm2, %v5657_v18, %v5673_v62 }
0x17d7   :  { %v5678_v27 = vsel %vm5676_vm4, %v5677_v46, %v5675_v21  ;;  %v5668_v0 = vsel %vm5667_vm5, %v5656_v6, %v5666_v7 }
0x17d8   :  { %v5680_v28 = vadd.f32 1e-06, %v5678_v27  ;;  %v5671_v44 = vsel %vm5669_vm6, %v5670_v50, %v5668_v0 }
0x17d9   :  { %v5679_v57 = vadd.f32 1e-06, %v5671_v44 }
0x17da   :  { %8138 = vrcp.f32 %v5680_v28 }
0x17db   :  { %8140 = vrcp.f32 %v5679_v57 }
0x17e4   :  { %v8139_v24 = vpop.eup %8138 }
0x17e5   :  { %v8141_v39 = vpop.eup %8140  ;;  %v5684_v54 = vmul.f32 %v8139_v24, %v5664_v32 }
0x17e6   :  { %v5682_v30 = vmul.f32 %v8141_v39, %v5663_v25 }
0x17e7   :  { %v5691_v51 = vadd.f32 %v6136_v52, %v5684_v54 }
0x17e8   :  { %v5690_v23 = vadd.f32 %v6136_v52, %v5682_v30 }
0x17ea   :  { %7295 = vmatprep.mubr.msk.f32.mxu1 %vm59_vm0, %v5690_v23 }
0x17eb   :  { %7296 = vmatmul.mubr.msk.f32.vlgmr.msra.gmra.mrb[96].mxu1 %vm59_vm0, %v5691_v51 }
0x18be   :  { %v7297_v55 = vpop.f32.mrb[96].mxu1 }
0x18bf   :  { %v5780_v14 = vadd.f32 %v7297_v55, %v6141_v40  ;;  %v5774_v29 = vpop.f32.mrb[97].mxu1 }
0x18c0   :  { %v5775_v36 = vadd.f32 %v6141_v40, %v5774_v29 }
0x18c1   :  { %5784 = vst.msk [vmem:[%s10236_s7 + $0x8] sm:$0xff] %vm59_vm0, %v5780_v14 }
0x18c2   :  { %5783 = vst.msk [vmem:[%s10236_s7] sm:$0xff] %vm59_vm0, %v5775_v36 }

</bundles_post_ra>
